<compile_context>
chip_gen: v5e
topology: v5e:2x2
jax: 0.10.0
libtpu: 0.0.40
codegen_flags: <defaults>
</compile_context>

<pallas_src>
import math

import jax
import jax.numpy as jnp
from jax.experimental import pallas as pl
from jax.experimental.pallas import tpu as pltpu


# ----------------------------------------------------------------------------
# Small helpers
# ----------------------------------------------------------------------------
def _cparams(sem, block_bytes):
    """CompilerParams with an explicit scoped-VMEM limit sized from the blocks."""
    limit = int(2 * block_bytes) + (8 << 20)          # double-buffer + headroom
    limit = max(limit, 16 << 20)
    limit = min(limit, 64 << 20)                      # stay under v7x physical VMEM
    return pltpu.CompilerParams(dimension_semantics=sem, vmem_limit_bytes=limit)


def _pick_cout_tile(co):
    if co <= 256:
        return co
    for t in (256, 128):
        if co % t == 0:
            return t
    return co


def _row_tile(H, W, target_rows=512):
    """Spatial row tile (divides H, keeps th*W sublane-aligned, ~target flattened rows)."""
    cap = max(1, min(H, target_rows // max(W, 1)))
    if H >= 2:
        cap = min(cap, max(1, H // 2))   # keep >=2 row tiles when possible (pipelining)
    for th in range(cap, 0, -1):
        if H % th == 0 and ((th * W) % 8 == 0 or th == H):
            return th
    return H


def _flat_row_tile(N, target=512):
    """Row tile over a flattened H*W axis (divides N, multiple of 8, <= target)."""
    cap = min(N, target)
    if N >= 16:
        cap = min(cap, N // 2)
    for R in range(cap, 7, -1):
        if N % R == 0 and R % 8 == 0:
            return R
    return N


# ----------------------------------------------------------------------------
# Kernel 1: fused 3x3 reflect-padded conv for one FFC layer
# (l2l + g2l + l2g folded into one HWIO weight; g->g spatial block is zero).
# 9-tap accumulate loop over a row tile: each tap is a (th*W, Ci) x (Ci, tco) bf16
# MXU matmul accumulated in f32 — no im2col scratch, no cross-step state.
# ----------------------------------------------------------------------------
def _make_conv3x3_kernel(H, W, Ci, th, tco, KH=3, KW=3):
    def kernel(xpad_ref, w_ref, o_ref):
        rs = pl.multiple_of(pl.program_id(1) * th, th)      # first output row of this tile
        acc = jnp.zeros((th * W, tco), jnp.float32)
        for t in range(KH * KW):
            dy, dx = divmod(t, KW)
            # Padded rows [rs+dy, rs+dy+th), padded cols [dx, dx+W)  (reflect pad = +1 halo).
            xs = xpad_ref[0, pl.ds(rs + dy, th), dx:dx + W, :]        # (th, W, Ci) bf16
            xs = xs.reshape(th * W, Ci)
            acc = acc + jnp.dot(xs, w_ref[t * Ci:(t + 1) * Ci, :],
                                preferred_element_type=jnp.float32)
        o_ref[...] = acc[None].astype(o_ref.dtype)

    return kernel


def conv3x3_reflect(x, w_hwio):
    """x: (B, H, W, Ci) f32; w_hwio: (3, 3, Ci, Co). Reflect-padded 3x3 conv (f32 out)."""
    B, H, W, Ci = x.shape
    Co = w_hwio.shape[-1]
    # TODO(synk): fold the reflect padding into the kernel (halo DMA with reflected edge
    #             indices) to avoid the extra XLA pad pass over HBM.
    xpad = jnp.pad(x.astype(jnp.bfloat16), ((0, 0), (1, 1), (1, 1), (0, 0)), mode="reflect")
    w2d = w_hwio.reshape(9 * Ci, Co).astype(jnp.bfloat16)
    tco = _pick_cout_tile(Co)
    n_co = Co // tco
    th = _row_tile(H, W)
    n_rows = H // th

    block_bytes = ((H + 2) * (W + 2) * Ci * 2      # bf16 padded image (index-invariant per b)
                   + 9 * Ci * tco * 2              # bf16 weight tile
                   + th * W * tco * 4)             # f32 output tile
    out = pl.pallas_call(
        _make_conv3x3_kernel(H, W, Ci, th, tco),
        out_shape=jax.ShapeDtypeStruct((B, H * W, Co), jnp.float32),
        grid=(B, n_rows, n_co),
        in_specs=[
            # Whole padded image per batch; its block index only depends on b, so the
            # pipeline elides re-DMA across the row / C_out steps.
            pl.BlockSpec((1, H + 2, W + 2, Ci), lambda b, r, j: (b, 0, 0, 0)),
            pl.BlockSpec((9 * Ci, tco), lambda b, r, j: (0, j)),
        ],
        out_specs=pl.BlockSpec((1, th * W, tco), lambda b, r, j: (b, r, j)),
        compiler_params=_cparams(("parallel", "parallel", "parallel"), block_bytes),
    )(xpad, w2d)
    return out.reshape(B, H, W, Co)


# ----------------------------------------------------------------------------
# Kernel 2: pointwise (1x1 conv) channel matmul with fused ReLU, row-tiled.
# ----------------------------------------------------------------------------
def _pw_relu_kernel(x_ref, w_ref, o_ref):
    y = jnp.dot(x_ref[0].astype(jnp.bfloat16), w_ref[...],
                preferred_element_type=jnp.float32)
    o_ref[...] = jnp.maximum(y, 0.0)[None].astype(o_ref.dtype)


def pointwise_relu(x, w):
    """ReLU(x @ w) over the channel axis. x: (B, H, W, Ci) f32; w: (Ci, Co)."""
    B, H, W, Ci = x.shape
    Co = w.shape[1]
    N = H * W
    R = _flat_row_tile(N)
    xf = x.reshape(B, N, Ci)                  # contiguous collapse (free glue)
    wb = w.astype(jnp.bfloat16)

    block_bytes = R * Ci * 4 + Ci * Co * 2 + R * Co * 4
    out = pl.pallas_call(
        _pw_relu_kernel,
        out_shape=jax.ShapeDtypeStruct((B, N, Co), jnp.float32),
        grid=(B, N // R),
        in_specs=[
            pl.BlockSpec((1, R, Ci), lambda b, r: (b, r, 0)),
            pl.BlockSpec((Ci, Co), lambda b, r: (0, 0)),
        ],
        out_specs=pl.BlockSpec((1, R, Co), lambda b, r: (b, r, 0)),
        compiler_params=_cparams(("parallel", "parallel"), block_bytes),
    )(xf, wb)
    return out.reshape(B, H, W, Co)


# ----------------------------------------------------------------------------
# Kernel 3: SpectralTransform.conv2 fused with the (x1 + fu + lfu) sum and the
# spatial l2g contribution to the global branch (produces out_g directly), row-tiled.
# ----------------------------------------------------------------------------
def _spec_out_kernel(x1_ref, fu_ref, lf_ref, spg_ref, w2_ref, o_ref):
    s = (x1_ref[0] + fu_ref[0] + lf_ref[0]).astype(jnp.bfloat16)
    y = jnp.dot(s, w2_ref[...], preferred_element_type=jnp.float32)
    o_ref[...] = (y + spg_ref[0])[None].astype(o_ref.dtype)


def spectral_output(x1, fu, lf, sp_g, w2):
    B, H, W, c = x1.shape
    cg = w2.shape[1]
    N = H * W
    R = _flat_row_tile(N)
    flat = lambda a: a.reshape(B, N, a.shape[-1])
    w2b = w2.astype(jnp.bfloat16)

    block_bytes = 3 * R * c * 4 + R * cg * 4 + c * cg * 2 + R * cg * 4
    out = pl.pallas_call(
        _spec_out_kernel,
        out_shape=jax.ShapeDtypeStruct((B, N, cg), jnp.float32),
        grid=(B, N // R),
        in_specs=[
            pl.BlockSpec((1, R, c), lambda b, r: (b, r, 0)),
            pl.BlockSpec((1, R, c), lambda b, r: (b, r, 0)),
            pl.BlockSpec((1, R, c), lambda b, r: (b, r, 0)),
            pl.BlockSpec((1, R, cg), lambda b, r: (b, r, 0)),
            pl.BlockSpec((c, cg), lambda b, r: (0, 0)),
        ],
        out_specs=pl.BlockSpec((1, R, cg), lambda b, r: (b, r, 0)),
        compiler_params=_cparams(("parallel", "parallel"), block_bytes),
    )(flat(x1), flat(fu), flat(lf), flat(sp_g), w2b)
    return out.reshape(B, H, W, cg)


# ----------------------------------------------------------------------------
# FourierUnit / SpectralTransform / FFC layer / FFCBlock forward
# ----------------------------------------------------------------------------
def fourier_unit(x, w_fu_block, out_h, out_w):
    """torch FourierUnit (fft_norm='ortho'): rfft2 -> [re | im] block channels ->
    1x1 conv + ReLU (Pallas) -> complex -> irfft2.  The weight was permuted at init from
    torch's interleaved (re,im) channel layout to the block layout, so no stride-2
    shuffles are needed here.  FFTs are XLA glue (no Pallas FFT)."""
    B, H, W, C = x.shape
    f = jnp.fft.rfft2(x, axes=(1, 2), norm="ortho")            # (B, H, W//2+1, C) complex64
    fr = jnp.concatenate([jnp.real(f), jnp.imag(f)], axis=-1)  # (B, H, Wf, 2C) block layout
    g = pointwise_relu(fr, w_fu_block)                         # (B, H, Wf, 2C)
    comp = jax.lax.complex(g[..., :C], g[..., C:])
    out = jnp.fft.irfft2(comp, s=(out_h, out_w), axes=(1, 2), norm="ortho")
    return out.astype(jnp.float32)


def spectral_transform(x_g, p, sp_g):
    """torch SpectralTransform (stride=1, enable_lfu=True, groups=1); the spatial
    l2g contribution `sp_g` is fused into the final 1x1-conv kernel."""
    B, H, W, _ = x_g.shape
    c = p["w1"].shape[1]                                       # out_cg // 2
    x1 = pointwise_relu(x_g, p["w1"])                          # conv1 + ReLU
    fu = fourier_unit(x1, p["w_fu"], H, W)                     # global Fourier unit
    # Local Fourier unit: first c//4 channels, 2x2 spatial quadrants stacked on channels.
    assert H == W and H % 2 == 0 and c % 4 == 0, "LFU needs square even H=W and c % 4 == 0"
    c4, h2 = c // 4, H // 2
    xs = x1[..., :c4]
    xs = jnp.concatenate([xs[:, :h2], xs[:, h2:]], axis=-1)        # (B, H/2, W, 2*c4)
    xs = jnp.concatenate([xs[:, :, :h2], xs[:, :, h2:]], axis=-1)  # (B, H/2, W/2, c)
    lf = fourier_unit(xs, p["w_lfu"], h2, h2)
    # TODO(synk): feed the (B, H/2, W/2, c) LFU result directly and broadcast it to the
    #             four output quadrants via the spectral_output index_map instead of
    #             materializing the 2x2 tile in HBM.
    lf = jnp.tile(lf, (1, 2, 2, 1))                                # (B, H, W, c)
    return spectral_output(x1, fu, lf, sp_g, p["w2"])              # conv2 + branch merge


def ffc_layer(x, p, cl):
    """One FFC_BN_ACT layer. Activation is Identity (activation='linear').
    # TODO(synk): the FcF reference has the SyncBatchNorm lines commented out of
    #             FFC_BN_ACT (and it is identity at init); if a trained-checkpoint
    #             variant applies BN in conv1/FU/LFU, fold its scale/bias into
    #             w1/w_fu/w_lfu (+ a bias add) here."""
    sp = conv3x3_reflect(x, p["w_spatial"])        # (B,H,W,dim): [out_l | l2g part of out_g]
    sp_l, sp_g = sp[..., :cl], sp[..., cl:]
    out_g = spectral_transform(x[..., cl:], p, sp_g)
    return jnp.concatenate([sp_l, out_g], axis=-1)


def ffc_block_forward(params, gen_ft, mask=None):
    """FFCBlock.forward. gen_ft: (B, dim, H, W) NCHW (torch layout).
    `mask` is accepted but unused, exactly as in the reference forward."""
    del mask
    x = gen_ft.astype(jnp.float32)
    # TODO(synk): keep NHWC end-to-end in the surrounding network to drop these transposes.
    x_nhwc = jnp.transpose(x, (0, 2, 3, 1))
    dim = x_nhwc.shape[-1]
    in_cg = params["conv1"]["w1"].shape[0]         # == ffc.global_in_num
    cl = dim - in_cg
    y = ffc_layer(x_nhwc, params["conv1"], cl)     # FFC_BN_ACT #1
    y = ffc_layer(y, params["conv2"], cl)          # FFC_BN_ACT #2
    # FFCResnetBlock residual + FFCBlock residual + final `+ gen_ft.float()`  =>  y + 3*x
    out = y + 3.0 * x_nhwc
    return jnp.transpose(out, (0, 3, 1, 2))


# ----------------------------------------------------------------------------
# Parameter construction (torch-layout weights folded into kernel-friendly layout)
# ----------------------------------------------------------------------------
def init_ffc_layer_params(key, dim, ratio_gin=0.75, ratio_gout=0.75):
    in_cg = int(dim * ratio_gin)
    in_cl = dim - in_cg
    out_cg = int(dim * ratio_gout)
    out_cl = dim - out_cg
    c = out_cg // 2
    ks = jax.random.split(key, 7)

    def conv_w(k, o, i, kh, kw):   # torch-like fan-in scaled init, OIHW layout
        return jax.random.normal(k, (o, i, kh, kw), jnp.float32) / math.sqrt(i * kh * kw)

    w_l2l = conv_w(ks[0], out_cl, in_cl, 3, 3)
    w_l2g = conv_w(ks[1], out_cg, in_cl, 3, 3)
    w_g2l = conv_w(ks[2], out_cl, in_cg, 3, 3)
    w_sp1 = conv_w(ks[3], c, in_cg, 1, 1)           # SpectralTransform.conv1
    w_fu = conv_w(ks[4], 2 * c, 2 * c, 1, 1)        # FourierUnit conv (torch interleaved re/im)
    w_lfu = conv_w(ks[5], 2 * c, 2 * c, 1, 1)       # local FourierUnit conv
    w_sp2 = conv_w(ks[6], out_cg, c, 1, 1)          # SpectralTransform.conv2

    hwio = lambda w: jnp.transpose(w, (2, 3, 1, 0))           # OIHW -> HWIO
    pw = lambda w: jnp.transpose(w[:, :, 0, 0], (1, 0))        # (O,I,1,1) -> (I,O)

    # Fold l2l / g2l / l2g into one (3,3,dim,dim) HWIO weight; the g->g spatial block
    # stays zero (that path is carried by the SpectralTransform). This turns three
    # small-K convs into one lane-dense MXU matmul with K = 9*dim.
    w_spatial = jnp.zeros((3, 3, dim, dim), jnp.float32)
    w_spatial = w_spatial.at[:, :, :in_cl, :out_cl].set(hwio(w_l2l))
    w_spatial = w_spatial.at[:, :, in_cl:, :out_cl].set(hwio(w_g2l))
    w_spatial = w_spatial.at[:, :, :in_cl, out_cl:].set(hwio(w_l2g))

    # Permute the FourierUnit weights ONCE from torch's interleaved (c0_re, c0_im, ...)
    # channel layout to the block ([re | im]) layout used inside fourier_unit(); this
    # removes the per-forward stride-2 channel shuffles.
    perm = jnp.concatenate([jnp.arange(0, 2 * c, 2), jnp.arange(1, 2 * c, 2)])
    reim_block = lambda w: pw(w)[perm][:, perm]

    return {"w_spatial": w_spatial, "w1": pw(w_sp1), "w_fu": reim_block(w_fu),
            "w_lfu": reim_block(w_lfu), "w2": pw(w_sp2)}


# ----------------------------------------------------------------------------
if __name__ == "__main__":
    key = jax.random.PRNGKey(0)
    k1, k2, k3, k4 = jax.random.split(key, 4)

    # dim=32, ratio 0.75 -> 8 local / 24 global channels (smallest shape for which the
    # reference LFU path is well-defined: out_cg//2 divisible by 4, even square spatial).
    # Note: at this toy dim all lane widths are < 128 (masked stores / idle MXU columns);
    # production FcF dims (>=256) make every channel width a multiple of 128.
    B, dim, H, W = 2, 32, 16, 16
    params = {
        "conv1": init_ffc_layer_params(k1, dim),
        "conv2": init_ffc_layer_params(k2, dim),
    }
    gen_ft = jax.random.normal(k3, (B, dim, H, W), jnp.float32)
    mask = (jax.random.uniform(k4, (B, 1, H, W)) > 0.5).astype(jnp.float32)  # unused (as in ref)

    fwd = jax.jit(ffc_block_forward)
    out = fwd(params, gen_ft, mask)
    jax.block_until_ready(out)
    assert out.shape == (B, dim, H, W)
    assert out.dtype == jnp.float32
    print("KERNEL_OK")
</pallas_src>

<mosaic_0001>
module attributes {stable_mosaic.version = 11 : i64} {
  func.func @_pw_relu_kernel(%arg0: i32, %arg1: i32, %arg2: memref<1x128x24xf32, #tpu.memory_space<vmem>>, %arg3: memref<24x12xbf16, #tpu.memory_space<vmem>>, %arg4: memref<1x128x12xf32, #tpu.memory_space<vmem>>) attributes {dimension_semantics = [#tpu.dimension_semantics<parallel>, #tpu.dimension_semantics<parallel>], iteration_bounds = array<i64: 2, 2>, scalar_prefetch = 0 : i64, scratch_operands = 0 : i64, tpu.core_type = #tpu.core_type<tc>, window_params = [{transform_indices = @transform_0, window_bounds = array<i64: 1, 128, 24>}, {pipeline_mode = #tpu.pipeline_mode<synchronous>, transform_indices = @transform_1, window_bounds = array<i64: 24, 12>}, {transform_indices = @transform_2, window_bounds = array<i64: 1, 128, 12>}]} {
    %c0 = arith.constant 0 : index
    %c0_0 = arith.constant 0 : index
    %c0_1 = arith.constant 0 : index
    %0 = vector.load %arg2[%c0, %c0_0, %c0_1] : memref<1x128x24xf32, #tpu.memory_space<vmem>>, vector<1x128x24xf32>
    %1 = vector.shape_cast %0 : vector<1x128x24xf32> to vector<128x24xf32>
    %2 = arith.truncf %1 : vector<128x24xf32> to vector<128x24xbf16>
    %c0_2 = arith.constant 0 : index
    %c0_3 = arith.constant 0 : index
    %3 = vector.load %arg3[%c0_2, %c0_3] : memref<24x12xbf16, #tpu.memory_space<vmem>>, vector<24x12xbf16>
    %cst = arith.constant dense<0.000000e+00> : vector<128x12xf32>
    %4 = tpu.matmul %2, %3, %cst {dimension_numbers = #tpu.dot_dimension_numbers<[1], [0], [0], [1], [0, 0, 1, 1], [], []>} : vector<128x24xbf16>, vector<24x12xbf16>, vector<128x12xf32> -> vector<128x12xf32>
    %cst_4 = arith.constant 0.000000e+00 : f32
    %5 = vector.broadcast %cst_4 : f32 to vector<128x12xf32>
    %6 = arith.maximumf %4, %5 : vector<128x12xf32>
    %7 = vector.shape_cast %6 : vector<128x12xf32> to vector<1x128x12xf32>
    %c0_5 = arith.constant 0 : index
    %c0_6 = arith.constant 0 : index
    %c0_7 = arith.constant 0 : index
    %8 = vector.load %arg4[%c0_5, %c0_6, %c0_7] : memref<1x128x12xf32, #tpu.memory_space<vmem>>, vector<1x128x12xf32>
    tpu.vector_store %arg4[%c0_5, %c0_6, %c0_7], %7 {strides = array<i32>} : memref<1x128x12xf32, #tpu.memory_space<vmem>>, vector<1x128x12xf32>,
    return
  }
  func.func @transform_0(%arg0: i32, %arg1: i32) -> (i32, i32, i32) {
    %c0_i32 = arith.constant 0 : i32
    %c0_i32_0 = arith.constant 0 : i32
    return %arg0, %arg1, %c0_i32 : i32, i32, i32
  }
  func.func @transform_1(%arg0: i32, %arg1: i32) -> (i32, i32) {
    %c0_i32 = arith.constant 0 : i32
    %c0_i32_0 = arith.constant 0 : i32
    %c0_i32_1 = arith.constant 0 : i32
    return %c0_i32, %c0_i32_0 : i32, i32
  }
  func.func @transform_2(%arg0: i32, %arg1: i32) -> (i32, i32, i32) {
    %c0_i32 = arith.constant 0 : i32
    %c0_i32_0 = arith.constant 0 : i32
    return %arg0, %arg1, %c0_i32 : i32, i32, i32
  }
}

module attributes {stable_mosaic.version = 11 : i64} {
  func.func @_pw_relu_kernel(%arg0: i32, %arg1: i32, %arg2: memref<1x8x24xf32, #tpu.memory_space<vmem>>, %arg3: memref<24x24xbf16, #tpu.memory_space<vmem>>, %arg4: memref<1x8x24xf32, #tpu.memory_space<vmem>>) attributes {dimension_semantics = [#tpu.dimension_semantics<parallel>, #tpu.dimension_semantics<parallel>], iteration_bounds = array<i64: 2, 5>, scalar_prefetch = 0 : i64, scratch_operands = 0 : i64, tpu.core_type = #tpu.core_type<tc>, window_params = [{transform_indices = @transform_0, window_bounds = array<i64: 1, 8, 24>}, {pipeline_mode = #tpu.pipeline_mode<synchronous>, transform_indices = @transform_1, window_bounds = array<i64: 24, 24>}, {transform_indices = @transform_2, window_bounds = array<i64: 1, 8, 24>}]} {
    %c0 = arith.constant 0 : index
    %c0_0 = arith.constant 0 : index
    %c0_1 = arith.constant 0 : index
    %0 = vector.load %arg2[%c0, %c0_0, %c0_1] : memref<1x8x24xf32, #tpu.memory_space<vmem>>, vector<1x8x24xf32>
    %1 = vector.shape_cast %0 : vector<1x8x24xf32> to vector<8x24xf32>
    %2 = arith.truncf %1 : vector<8x24xf32> to vector<8x24xbf16>
    %c0_2 = arith.constant 0 : index
    %c0_3 = arith.constant 0 : index
    %3 = vector.load %arg3[%c0_2, %c0_3] : memref<24x24xbf16, #tpu.memory_space<vmem>>, vector<24x24xbf16>
    %cst = arith.constant dense<0.000000e+00> : vector<8x24xf32>
    %4 = tpu.matmul %2, %3, %cst {dimension_numbers = #tpu.dot_dimension_numbers<[1], [0], [0], [1], [0, 0, 1, 1], [], []>} : vector<8x24xbf16>, vector<24x24xbf16>, vector<8x24xf32> -> vector<8x24xf32>
    %cst_4 = arith.constant 0.000000e+00 : f32
    %5 = vector.broadcast %cst_4 : f32 to vector<8x24xf32>
    %6 = arith.maximumf %4, %5 : vector<8x24xf32>
    %7 = vector.shape_cast %6 : vector<8x24xf32> to vector<1x8x24xf32>
    %c0_5 = arith.constant 0 : index
    %c0_6 = arith.constant 0 : index
    %c0_7 = arith.constant 0 : index
    %8 = vector.load %arg4[%c0_5, %c0_6, %c0_7] : memref<1x8x24xf32, #tpu.memory_space<vmem>>, vector<1x8x24xf32>
    tpu.vector_store %arg4[%c0_5, %c0_6, %c0_7], %7 {strides = array<i32>} : memref<1x8x24xf32, #tpu.memory_space<vmem>>, vector<1x8x24xf32>,
    return
  }
  func.func @transform_0(%arg0: i32, %arg1: i32) -> (i32, i32, i32) {
    %c0_i32 = arith.constant 0 : i32
    %c0_i32_0 = arith.constant 0 : i32
    return %arg0, %arg1, %c0_i32 : i32, i32, i32
  }
  func.func @transform_1(%arg0: i32, %arg1: i32) -> (i32, i32) {
    %c0_i32 = arith.constant 0 : i32
    %c0_i32_0 = arith.constant 0 : i32
    %c0_i32_1 = arith.constant 0 : i32
    return %c0_i32, %c0_i32_0 : i32, i32
  }
  func.func @transform_2(%arg0: i32, %arg1: i32) -> (i32, i32, i32) {
    %c0_i32 = arith.constant 0 : i32
    %c0_i32_0 = arith.constant 0 : i32
    return %arg0, %arg1, %c0_i32 : i32, i32, i32
  }
}

module attributes {stable_mosaic.version = 11 : i64} {
  func.func @_pw_relu_kernel(%arg0: i32, %arg1: i32, %arg2: memref<1x72x24xf32, #tpu.memory_space<vmem>>, %arg3: memref<24x24xbf16, #tpu.memory_space<vmem>>, %arg4: memref<1x72x24xf32, #tpu.memory_space<vmem>>) attributes {dimension_semantics = [#tpu.dimension_semantics<parallel>, #tpu.dimension_semantics<parallel>], iteration_bounds = array<i64: 2, 2>, scalar_prefetch = 0 : i64, scratch_operands = 0 : i64, tpu.core_type = #tpu.core_type<tc>, window_params = [{transform_indices = @transform_0, window_bounds = array<i64: 1, 72, 24>}, {pipeline_mode = #tpu.pipeline_mode<synchronous>, transform_indices = @transform_1, window_bounds = array<i64: 24, 24>}, {transform_indices = @transform_2, window_bounds = array<i64: 1, 72, 24>}]} {
    %c0 = arith.constant 0 : index
    %c0_0 = arith.constant 0 : index
    %c0_1 = arith.constant 0 : index
    %0 = vector.load %arg2[%c0, %c0_0, %c0_1] : memref<1x72x24xf32, #tpu.memory_space<vmem>>, vector<1x72x24xf32>
    %1 = vector.shape_cast %0 : vector<1x72x24xf32> to vector<72x24xf32>
    %2 = arith.truncf %1 : vector<72x24xf32> to vector<72x24xbf16>
    %c0_2 = arith.constant 0 : index
    %c0_3 = arith.constant 0 : index
    %3 = vector.load %arg3[%c0_2, %c0_3] : memref<24x24xbf16, #tpu.memory_space<vmem>>, vector<24x24xbf16>
    %cst = arith.constant dense<0.000000e+00> : vector<72x24xf32>
    %4 = tpu.matmul %2, %3, %cst {dimension_numbers = #tpu.dot_dimension_numbers<[1], [0], [0], [1], [0, 0, 1, 1], [], []>} : vector<72x24xbf16>, vector<24x24xbf16>, vector<72x24xf32> -> vector<72x24xf32>
    %cst_4 = arith.constant 0.000000e+00 : f32
    %5 = vector.broadcast %cst_4 : f32 to vector<72x24xf32>
    %6 = arith.maximumf %4, %5 : vector<72x24xf32>
    %7 = vector.shape_cast %6 : vector<72x24xf32> to vector<1x72x24xf32>
    %c0_5 = arith.constant 0 : index
    %c0_6 = arith.constant 0 : index
    %c0_7 = arith.constant 0 : index
    %8 = vector.load %arg4[%c0_5, %c0_6, %c0_7] : memref<1x72x24xf32, #tpu.memory_space<vmem>>, vector<1x72x24xf32>
    tpu.vector_store %arg4[%c0_5, %c0_6, %c0_7], %7 {strides = array<i32>} : memref<1x72x24xf32, #tpu.memory_space<vmem>>, vector<1x72x24xf32>,
    return
  }
  func.func @transform_0(%arg0: i32, %arg1: i32) -> (i32, i32, i32) {
    %c0_i32 = arith.constant 0 : i32
    %c0_i32_0 = arith.constant 0 : i32
    return %arg0, %arg1, %c0_i32 : i32, i32, i32
  }
  func.func @transform_1(%arg0: i32, %arg1: i32) -> (i32, i32) {
    %c0_i32 = arith.constant 0 : i32
    %c0_i32_0 = arith.constant 0 : i32
    %c0_i32_1 = arith.constant 0 : i32
    return %c0_i32, %c0_i32_0 : i32, i32
  }
  func.func @transform_2(%arg0: i32, %arg1: i32) -> (i32, i32, i32) {
    %c0_i32 = arith.constant 0 : i32
    %c0_i32_0 = arith.constant 0 : i32
    return %arg0, %arg1, %c0_i32 : i32, i32, i32
  }
}

module attributes {stable_mosaic.version = 11 : i64} {
  func.func @kernel(%arg0: i32, %arg1: i32, %arg2: i32, %arg3: memref<1x18x18x32xbf16, #tpu.memory_space<vmem>>, %arg4: memref<288x32xbf16, #tpu.memory_space<vmem>>, %arg5: memref<1x128x32xf32, #tpu.memory_space<vmem>>) attributes {dimension_semantics = [#tpu.dimension_semantics<parallel>, #tpu.dimension_semantics<parallel>, #tpu.dimension_semantics<parallel>], iteration_bounds = array<i64: 2, 2, 1>, scalar_prefetch = 0 : i64, scratch_operands = 0 : i64, tpu.core_type = #tpu.core_type<tc>, window_params = [{transform_indices = @transform_0, window_bounds = array<i64: 1, 18, 18, 32>}, {transform_indices = @transform_1, window_bounds = array<i64: 288, 32>}, {transform_indices = @transform_2, window_bounds = array<i64: 1, 128, 32>}]} {
    %c8_i32 = arith.constant 8 : i32
    %0 = arith.muli %arg1, %c8_i32 : i32
    %1 = tpu.assume_multiple %0, 8 : i32
    %cst = arith.constant 0.000000e+00 : f32
    %2 = vector.broadcast %cst : f32 to vector<128x32xf32>
    %c0_i32 = arith.constant 0 : i32
    %3 = arith.addi %1, %c0_i32 : i32
    %c0 = arith.constant 0 : index
    %4 = arith.index_cast %3 : i32 to index
    %c0_0 = arith.constant 0 : index
    %c0_1 = arith.constant 0 : index
    %5 = vector.load %arg3[%c0, %4, %c0_0, %c0_1] : memref<1x18x18x32xbf16, #tpu.memory_space<vmem>>, vector<1x8x16x32xbf16>
    %6 = vector.shape_cast %5 : vector<1x8x16x32xbf16> to vector<8x16x32xbf16>
    %7 = vector.shape_cast %6 : vector<8x16x32xbf16> to vector<128x32xbf16>
    %c0_2 = arith.constant 0 : index
    %c0_3 = arith.constant 0 : index
    %8 = vector.load %arg4[%c0_2, %c0_3] : memref<288x32xbf16, #tpu.memory_space<vmem>>, vector<32x32xbf16>
    %cst_4 = arith.constant dense<0.000000e+00> : vector<128x32xf32>
    %9 = tpu.matmul %7, %8, %cst_4 {dimension_numbers = #tpu.dot_dimension_numbers<[1], [0], [0], [1], [0, 0, 1, 1], [], []>} : vector<128x32xbf16>, vector<32x32xbf16>, vector<128x32xf32> -> vector<128x32xf32>
    %10 = arith.addf %2, %9 : vector<128x32xf32>
    %c0_i32_5 = arith.constant 0 : i32
    %11 = arith.addi %1, %c0_i32_5 : i32
    %c0_6 = arith.constant 0 : index
    %12 = arith.index_cast %11 : i32 to index
    %c1 = arith.constant 1 : index
    %c0_7 = arith.constant 0 : index
    %13 = vector.load %arg3[%c0_6, %12, %c1, %c0_7] : memref<1x18x18x32xbf16, #tpu.memory_space<vmem>>, vector<1x8x16x32xbf16>
    %14 = vector.shape_cast %13 : vector<1x8x16x32xbf16> to vector<8x16x32xbf16>
    %15 = vector.shape_cast %14 : vector<8x16x32xbf16> to vector<128x32xbf16>
    %c32 = arith.constant 32 : index
    %c0_8 = arith.constant 0 : index
    %16 = vector.load %arg4[%c32, %c0_8] : memref<288x32xbf16, #tpu.memory_space<vmem>>, vector<32x32xbf16>
    %cst_9 = arith.constant dense<0.000000e+00> : vector<128x32xf32>
    %17 = tpu.matmul %15, %16, %cst_9 {dimension_numbers = #tpu.dot_dimension_numbers<[1], [0], [0], [1], [0, 0, 1, 1], [], []>} : vector<128x32xbf16>, vector<32x32xbf16>, vector<128x32xf32> -> vector<128x32xf32>
    %18 = arith.addf %10, %17 : vector<128x32xf32>
    %c0_i32_10 = arith.constant 0 : i32
    %19 = arith.addi %1, %c0_i32_10 : i32
    %c0_11 = arith.constant 0 : index
    %20 = arith.index_cast %19 : i32 to index
    %c2 = arith.constant 2 : index
    %c0_12 = arith.constant 0 : index
    %21 = vector.load %arg3[%c0_11, %20, %c2, %c0_12] : memref<1x18x18x32xbf16, #tpu.memory_space<vmem>>, vector<1x8x16x32xbf16>
    %22 = vector.shape_cast %21 : vector<1x8x16x32xbf16> to vector<8x16x32xbf16>
    %23 = vector.shape_cast %22 : vector<8x16x32xbf16> to vector<128x32xbf16>
    %c64 = arith.constant 64 : index
    %c0_13 = arith.constant 0 : index
    %24 = vector.load %arg4[%c64, %c0_13] : memref<288x32xbf16, #tpu.memory_space<vmem>>, vector<32x32xbf16>
    %cst_14 = arith.constant dense<0.000000e+00> : vector<128x32xf32>
    %25 = tpu.matmul %23, %24, %cst_14 {dimension_numbers = #tpu.dot_dimension_numbers<[1], [0], [0], [1], [0, 0, 1, 1], [], []>} : vector<128x32xbf16>, vector<32x32xbf16>, vector<128x32xf32> -> vector<128x32xf32>
    %26 = arith.addf %18, %25 : vector<128x32xf32>
    %c1_i32 = arith.constant 1 : i32
    %27 = arith.addi %1, %c1_i32 : i32
    %c0_15 = arith.constant 0 : index
    %28 = arith.index_cast %27 : i32 to index
    %c0_16 = arith.constant 0 : index
    %c0_17 = arith.constant 0 : index
    %29 = vector.load %arg3[%c0_15, %28, %c0_16, %c0_17] : memref<1x18x18x32xbf16, #tpu.memory_space<vmem>>, vector<1x8x16x32xbf16>
    %30 = vector.shape_cast %29 : vector<1x8x16x32xbf16> to vector<8x16x32xbf16>
    %31 = vector.shape_cast %30 : vector<8x16x32xbf16> to vector<128x32xbf16>
    %c96 = arith.constant 96 : index
    %c0_18 = arith.constant 0 : index
    %32 = vector.load %arg4[%c96, %c0_18] : memref<288x32xbf16, #tpu.memory_space<vmem>>, vector<32x32xbf16>
    %cst_19 = arith.constant dense<0.000000e+00> : vector<128x32xf32>
    %33 = tpu.matmul %31, %32, %cst_19 {dimension_numbers = #tpu.dot_dimension_numbers<[1], [0], [0], [1], [0, 0, 1, 1], [], []>} : vector<128x32xbf16>, vector<32x32xbf16>, vector<128x32xf32> -> vector<128x32xf32>
    %34 = arith.addf %26, %33 : vector<128x32xf32>
    %c1_i32_20 = arith.constant 1 : i32
    %35 = arith.addi %1, %c1_i32_20 : i32
    %c0_21 = arith.constant 0 : index
    %36 = arith.index_cast %35 : i32 to index
    %c1_22 = arith.constant 1 : index
    %c0_23 = arith.constant 0 : index
    %37 = vector.load %arg3[%c0_21, %36, %c1_22, %c0_23] : memref<1x18x18x32xbf16, #tpu.memory_space<vmem>>, vector<1x8x16x32xbf16>
    %38 = vector.shape_cast %37 : vector<1x8x16x32xbf16> to vector<8x16x32xbf16>
    %39 = vector.shape_cast %38 : vector<8x16x32xbf16> to vector<128x32xbf16>
    %c128 = arith.constant 128 : index
    %c0_24 = arith.constant 0 : index
    %40 = vector.load %arg4[%c128, %c0_24] : memref<288x32xbf16, #tpu.memory_space<vmem>>, vector<32x32xbf16>
    %cst_25 = arith.constant dense<0.000000e+00> : vector<128x32xf32>
    %41 = tpu.matmul %39, %40, %cst_25 {dimension_numbers = #tpu.dot_dimension_numbers<[1], [0], [0], [1], [0, 0, 1, 1], [], []>} : vector<128x32xbf16>, vector<32x32xbf16>, vector<128x32xf32> -> vector<128x32xf32>
    %42 = arith.addf %34, %41 : vector<128x32xf32>
    %c1_i32_26 = arith.constant 1 : i32
    %43 = arith.addi %1, %c1_i32_26 : i32
    %c0_27 = arith.constant 0 : index
    %44 = arith.index_cast %43 : i32 to index
    %c2_28 = arith.constant 2 : index
    %c0_29 = arith.constant 0 : index
    %45 = vector.load %arg3[%c0_27, %44, %c2_28, %c0_29] : memref<1x18x18x32xbf16, #tpu.memory_space<vmem>>, vector<1x8x16x32xbf16>
    %46 = vector.shape_cast %45 : vector<1x8x16x32xbf16> to vector<8x16x32xbf16>
    %47 = vector.shape_cast %46 : vector<8x16x32xbf16> to vector<128x32xbf16>
    %c160 = arith.constant 160 : index
    %c0_30 = arith.constant 0 : index
    %48 = vector.load %arg4[%c160, %c0_30] : memref<288x32xbf16, #tpu.memory_space<vmem>>, vector<32x32xbf16>
    %cst_31 = arith.constant dense<0.000000e+00> : vector<128x32xf32>
    %49 = tpu.matmul %47, %48, %cst_31 {dimension_numbers = #tpu.dot_dimension_numbers<[1], [0], [0], [1], [0, 0, 1, 1], [], []>} : vector<128x32xbf16>, vector<32x32xbf16>, vector<128x32xf32> -> vector<128x32xf32>
    %50 = arith.addf %42, %49 : vector<128x32xf32>
    %c2_i32 = arith.constant 2 : i32
    %51 = arith.addi %1, %c2_i32 : i32
    %c0_32 = arith.constant 0 : index
    %52 = arith.index_cast %51 : i32 to index
    %c0_33 = arith.constant 0 : index
    %c0_34 = arith.constant 0 : index
    %53 = vector.load %arg3[%c0_32, %52, %c0_33, %c0_34] : memref<1x18x18x32xbf16, #tpu.memory_space<vmem>>, vector<1x8x16x32xbf16>
    %54 = vector.shape_cast %53 : vector<1x8x16x32xbf16> to vector<8x16x32xbf16>
    %55 = vector.shape_cast %54 : vector<8x16x32xbf16> to vector<128x32xbf16>
    %c192 = arith.constant 192 : index
    %c0_35 = arith.constant 0 : index
    %56 = vector.load %arg4[%c192, %c0_35] : memref<288x32xbf16, #tpu.memory_space<vmem>>, vector<32x32xbf16>
    %cst_36 = arith.constant dense<0.000000e+00> : vector<128x32xf32>
    %57 = tpu.matmul %55, %56, %cst_36 {dimension_numbers = #tpu.dot_dimension_numbers<[1], [0], [0], [1], [0, 0, 1, 1], [], []>} : vector<128x32xbf16>, vector<32x32xbf16>, vector<128x32xf32> -> vector<128x32xf32>
    %58 = arith.addf %50, %57 : vector<128x32xf32>
    %c2_i32_37 = arith.constant 2 : i32
    %59 = arith.addi %1, %c2_i32_37 : i32
    %c0_38 = arith.constant 0 : index
    %60 = arith.index_cast %59 : i32 to index
    %c1_39 = arith.constant 1 : index
    %c0_40 = arith.constant 0 : index
    %61 = vector.load %arg3[%c0_38, %60, %c1_39, %c0_40] : memref<1x18x18x32xbf16, #tpu.memory_space<vmem>>, vector<1x8x16x32xbf16>
    %62 = vector.shape_cast %61 : vector<1x8x16x32xbf16> to vector<8x16x32xbf16>
    %63 = vector.shape_cast %62 : vector<8x16x32xbf16> to vector<128x32xbf16>
    %c224 = arith.constant 224 : index
    %c0_41 = arith.constant 0 : index
    %64 = vector.load %arg4[%c224, %c0_41] : memref<288x32xbf16, #tpu.memory_space<vmem>>, vector<32x32xbf16>
    %cst_42 = arith.constant dense<0.000000e+00> : vector<128x32xf32>
    %65 = tpu.matmul %63, %64, %cst_42 {dimension_numbers = #tpu.dot_dimension_numbers<[1], [0], [0], [1], [0, 0, 1, 1], [], []>} : vector<128x32xbf16>, vector<32x32xbf16>, vector<128x32xf32> -> vector<128x32xf32>
    %66 = arith.addf %58, %65 : vector<128x32xf32>
    %c2_i32_43 = arith.constant 2 : i32
    %67 = arith.addi %1, %c2_i32_43 : i32
    %c0_44 = arith.constant 0 : index
    %68 = arith.index_cast %67 : i32 to index
    %c2_45 = arith.constant 2 : index
    %c0_46 = arith.constant 0 : index
    %69 = vector.load %arg3[%c0_44, %68, %c2_45, %c0_46] : memref<1x18x18x32xbf16, #tpu.memory_space<vmem>>, vector<1x8x16x32xbf16>
    %70 = vector.shape_cast %69 : vector<1x8x16x32xbf16> to vector<8x16x32xbf16>
    %71 = vector.shape_cast %70 : vector<8x16x32xbf16> to vector<128x32xbf16>
    %c256 = arith.constant 256 : index
    %c0_47 = arith.constant 0 : index
    %72 = vector.load %arg4[%c256, %c0_47] : memref<288x32xbf16, #tpu.memory_space<vmem>>, vector<32x32xbf16>
    %cst_48 = arith.constant dense<0.000000e+00> : vector<128x32xf32>
    %73 = tpu.matmul %71, %72, %cst_48 {dimension_numbers = #tpu.dot_dimension_numbers<[1], [0], [0], [1], [0, 0, 1, 1], [], []>} : vector<128x32xbf16>, vector<32x32xbf16>, vector<128x32xf32> -> vector<128x32xf32>
    %74 = arith.addf %66, %73 : vector<128x32xf32>
    %75 = vector.shape_cast %74 : vector<128x32xf32> to vector<1x128x32xf32>
    %c0_49 = arith.constant 0 : index
    %c0_50 = arith.constant 0 : index
    %c0_51 = arith.constant 0 : index
    %76 = vector.load %arg5[%c0_49, %c0_50, %c0_51] : memref<1x128x32xf32, #tpu.memory_space<vmem>>, vector<1x128x32xf32>
    tpu.vector_store %arg5[%c0_49, %c0_50, %c0_51], %75 {strides = array<i32>} : memref<1x128x32xf32, #tpu.memory_space<vmem>>, vector<1x128x32xf32>,
    return
  }
  func.func @transform_0(%arg0: i32, %arg1: i32, %arg2: i32) -> (i32, i32, i32, i32) {
    %c0_i32 = arith.constant 0 : i32
    %c0_i32_0 = arith.constant 0 : i32
    %c0_i32_1 = arith.constant 0 : i32
    %c0_i32_2 = arith.constant 0 : i32
    return %arg0, %c0_i32, %c0_i32_0, %c0_i32_1 : i32, i32, i32, i32
  }
  func.func @transform_1(%arg0: i32, %arg1: i32, %arg2: i32) -> (i32, i32) {
    %c0_i32 = arith.constant 0 : i32
    %c0_i32_0 = arith.constant 0 : i32
    return %c0_i32, %arg2 : i32, i32
  }
  func.func @transform_2(%arg0: i32, %arg1: i32, %arg2: i32) -> (i32, i32, i32) {
    %c0_i32 = arith.constant 0 : i32
    return %arg0, %arg1, %arg2 : i32, i32, i32
  }
}

module attributes {stable_mosaic.version = 11 : i64} {
  func.func @_spec_out_kernel(%arg0: i32, %arg1: i32, %arg2: memref<1x128x12xf32, #tpu.memory_space<vmem>>, %arg3: memref<1x128x12xf32, #tpu.memory_space<vmem>>, %arg4: memref<1x128x12xf32, #tpu.memory_space<vmem>>, %arg5: memref<1x128x24xf32, #tpu.memory_space<vmem>>, %arg6: memref<12x24xbf16, #tpu.memory_space<vmem>>, %arg7: memref<1x128x24xf32, #tpu.memory_space<vmem>>) attributes {dimension_semantics = [#tpu.dimension_semantics<parallel>, #tpu.dimension_semantics<parallel>], iteration_bounds = array<i64: 2, 2>, scalar_prefetch = 0 : i64, scratch_operands = 0 : i64, tpu.core_type = #tpu.core_type<tc>, window_params = [{transform_indices = @transform_0, window_bounds = array<i64: 1, 128, 12>}, {transform_indices = @transform_1, window_bounds = array<i64: 1, 128, 12>}, {transform_indices = @transform_2, window_bounds = array<i64: 1, 128, 12>}, {transform_indices = @transform_3, window_bounds = array<i64: 1, 128, 24>}, {pipeline_mode = #tpu.pipeline_mode<synchronous>, transform_indices = @transform_4, window_bounds = array<i64: 12, 24>}, {transform_indices = @transform_5, window_bounds = array<i64: 1, 128, 24>}]} {
    %c0 = arith.constant 0 : index
    %c0_0 = arith.constant 0 : index
    %c0_1 = arith.constant 0 : index
    %0 = vector.load %arg2[%c0, %c0_0, %c0_1] : memref<1x128x12xf32, #tpu.memory_space<vmem>>, vector<1x128x12xf32>
    %1 = vector.shape_cast %0 : vector<1x128x12xf32> to vector<128x12xf32>
    %c0_2 = arith.constant 0 : index
    %c0_3 = arith.constant 0 : index
    %c0_4 = arith.constant 0 : index
    %2 = vector.load %arg3[%c0_2, %c0_3, %c0_4] : memref<1x128x12xf32, #tpu.memory_space<vmem>>, vector<1x128x12xf32>
    %3 = vector.shape_cast %2 : vector<1x128x12xf32> to vector<128x12xf32>
    %4 = arith.addf %1, %3 : vector<128x12xf32>
    %c0_5 = arith.constant 0 : index
    %c0_6 = arith.constant 0 : index
    %c0_7 = arith.constant 0 : index
    %5 = vector.load %arg4[%c0_5, %c0_6, %c0_7] : memref<1x128x12xf32, #tpu.memory_space<vmem>>, vector<1x128x12xf32>
    %6 = vector.shape_cast %5 : vector<1x128x12xf32> to vector<128x12xf32>
    %7 = arith.addf %4, %6 : vector<128x12xf32>
    %8 = arith.truncf %7 : vector<128x12xf32> to vector<128x12xbf16>
    %c0_8 = arith.constant 0 : index
    %c0_9 = arith.constant 0 : index
    %9 = vector.load %arg6[%c0_8, %c0_9] : memref<12x24xbf16, #tpu.memory_space<vmem>>, vector<12x24xbf16>
    %cst = arith.constant dense<0.000000e+00> : vector<128x24xf32>
    %10 = tpu.matmul %8, %9, %cst {dimension_numbers = #tpu.dot_dimension_numbers<[1], [0], [0], [1], [0, 0, 1, 1], [], []>} : vector<128x12xbf16>, vector<12x24xbf16>, vector<128x24xf32> -> vector<128x24xf32>
    %c0_10 = arith.constant 0 : index
    %c0_11 = arith.constant 0 : index
    %c0_12 = arith.constant 0 : index
    %11 = vector.load %arg5[%c0_10, %c0_11, %c0_12] : memref<1x128x24xf32, #tpu.memory_space<vmem>>, vector<1x128x24xf32>
    %12 = vector.shape_cast %11 : vector<1x128x24xf32> to vector<128x24xf32>
    %13 = arith.addf %10, %12 : vector<128x24xf32>
    %14 = vector.shape_cast %13 : vector<128x24xf32> to vector<1x128x24xf32>
    %c0_13 = arith.constant 0 : index
    %c0_14 = arith.constant 0 : index
    %c0_15 = arith.constant 0 : index
    %15 = vector.load %arg7[%c0_13, %c0_14, %c0_15] : memref<1x128x24xf32, #tpu.memory_space<vmem>>, vector<1x128x24xf32>
    tpu.vector_store %arg7[%c0_13, %c0_14, %c0_15], %14 {strides = array<i32>} : memref<1x128x24xf32, #tpu.memory_space<vmem>>, vector<1x128x24xf32>,
    return
  }
  func.func @transform_0(%arg0: i32, %arg1: i32) -> (i32, i32, i32) {
    %c0_i32 = arith.constant 0 : i32
    %c0_i32_0 = arith.constant 0 : i32
    return %arg0, %arg1, %c0_i32 : i32, i32, i32
  }
  func.func @transform_1(%arg0: i32, %arg1: i32) -> (i32, i32, i32) {
    %c0_i32 = arith.constant 0 : i32
    %c0_i32_0 = arith.constant 0 : i32
    return %arg0, %arg1, %c0_i32 : i32, i32, i32
  }
  func.func @transform_2(%arg0: i32, %arg1: i32) -> (i32, i32, i32) {
    %c0_i32 = arith.constant 0 : i32
    %c0_i32_0 = arith.constant 0 : i32
    return %arg0, %arg1, %c0_i32 : i32, i32, i32
  }
  func.func @transform_3(%arg0: i32, %arg1: i32) -> (i32, i32, i32) {
    %c0_i32 = arith.constant 0 : i32
    %c0_i32_0 = arith.constant 0 : i32
    return %arg0, %arg1, %c0_i32 : i32, i32, i32
  }
  func.func @transform_4(%arg0: i32, %arg1: i32) -> (i32, i32) {
    %c0_i32 = arith.constant 0 : i32
    %c0_i32_0 = arith.constant 0 : i32
    %c0_i32_1 = arith.constant 0 : i32
    return %c0_i32, %c0_i32_0 : i32, i32
  }
  func.func @transform_5(%arg0: i32, %arg1: i32) -> (i32, i32, i32) {
    %c0_i32 = arith.constant 0 : i32
    %c0_i32_0 = arith.constant 0 : i32
    return %arg0, %arg1, %c0_i32 : i32, i32, i32
  }
}

</mosaic_0001>

<bundles_post_ra>
// kernel: ffc_block_forward.11
= control target key start
LH: loop header
LB: loop body
LE: loop exit
PB: predicated region body
PF: predicated region fallthrough
CT: control target
= control target key end

     0   :  { %s548_s9 = smov 0   ;;  %s550_s10 = smov 0   ;;  %s654_s0 = inlined_call_operand.vmem [shape: f32[2,256,24], index: 0, kind: input, shape index: {}]   ;;  %s655_s1 = inlined_call_operand.vmem [shape: bf16[24,12], index: 1, kind: input, shape index: {}]   ;;  %s656_s2 = inlined_call_operand.vmem [shape: f32[2,256,12], index: 2, kind: output, shape index: {}]  }
   0x1   :  { %s552_s11 = smov 0   ;;  %s554_s12 = smov 0  }
   0x2   :  { %s556_s13 = smov 0  }
   0x3 LB: > { %s21_s14 = sadd.s32 1, %s523_s11  ;;  %s24_s15 = sadd.s32 1, %s527_s12  ;;  %s531_s13 = sphi %s556_s13, %s12_s13   ;;  %s527_s12 = sphi %s554_s12, %s660_s12   ;;  %s523_s11 = sphi %s552_s11, %s659_s11   ;;  %s519_s10 = sphi %s550_s10, %s658_s10   ;;  %s515_s9 = sphi %s548_s9, %s657_s9  }
   0x4   : > { %p22_p0 = scmp.ge.s32.totalorder %s21_s14, 2  ;;  %p425_p1 = scmp.ge.s32.totalorder %s531_s13, 1 }
   0x5   : > { %p133_p2 = scmp.lt.s32.totalorder %s531_s13, 5 }
   0x6   : > { %s662_s14 = smov (%p22_p0, %s21_s14), 0  ;;  %s664_s15 = smov (!%p22_p0, %s24_s15), %s527_s12 }
   0x7   : > { %p134_p3 = pnand %p425_p1, %p133_p2  ;;  %p26_p4 = scmp.ge.s32.totalorder %s664_s15, 2 }
   0x8   : > { %s426_s18 = sshll.u32 (!%p134_p3), %s515_s9, 4  ;;  %p164_p5 = scmp.lt.s32.totalorder (!%p134_p3), %s519_s10, 1 }
   0x9   : > { %s666_s15 = smov (%p26_p4, %s664_s15), 0  ;;  %137 = sbr.rel (%p134_p3) target bundleno = 188 (0xbc), region = 28 }
   0xa   : > { %p166_p6 = scmp.lt.s32.totalorder (!%p134_p3), %s426_s18, 31 }
   0xe   : > { %v210_v0 = vld [vmem:[%s655_s1 + $0x8] sm:$0xf]  ;;  %vm245_vm0 = vcmask 1043456   ;;  %s668_s10 = smov (!%p164_p5, %s519_s10), 1  ;;  %s670_s18 = smov (!%p166_p6, %s426_s18), 31  ;;  %v446_v4 = vld [vmem:[%s655_s1] sm:$0xff] }
   0xf   : > { %v216_v1 = vunpack.c.l.b16 %v210_v0  ;;  %s427_s19 = sshll.u32 %s668_s10, 5  ;;  %vm220_vm1 = vcmask 195584   ;;  %vm314_vm2 = vcmask 97280  }
  0x10   : > { %s581_s20 = sadd.s32 %s427_s19, %s670_s18 }
  0x11   : > { %v218_v2 = vpack.c.b16 %v216_v1, %v216_v1  ;;  %s428_s23 = sshll.u32 %s581_s20, 3 }
  0x12   : > { %s171_s26 = scalar_lea.vmem %s654_s0, %s428_s23  ;;  %s605_s29 = scalar_lea.vmem %s656_s2, %s428_s23 }
  0x13   : > { %v247_v3 = vsel %vm245_vm0, %v218_v2, 0  ;;  %v184_v5 = vld [vmem:[%s171_s26] sm:$0xff]  ;;  %v185_v6 = vld [vmem:[%s171_s26 + $0x8] sm:$0xff]  ;;  %v186_v17 = vld [vmem:[%s171_s26 + $0x10] sm:$0xff] }
  0x14   : > { %255 = vmatpush.bf16.msra.mxu0 %v247_v3  ;;  %447 = vmatpush.bf16.msra.mxu1 %v247_v3  ;;  %v188_v7 = vld [vmem:[%s171_s26 + $0x20] sm:$0xff]  ;;  %v200_v8 = vpack.c.bf16 %v185_v6, %v184_v5  ;;  %v189_v9 = vld [vmem:[%s171_s26 + $0x28] sm:$0xff]  ;;  %v187_v18 = vld [vmem:[%s171_s26 + $0x18] sm:$0xff] }
  0x15   : > { %448 = vmatpush.bf16.msra.mxu2 %v247_v3  ;;  %449 = vmatpush.bf16.msra.mxu3 %v247_v3  ;;  %v192_v10 = vld [vmem:[%s171_s26 + $0x40] sm:$0xff]  ;;  %v193_v11 = vld [vmem:[%s171_s26 + $0x48] sm:$0xff]  ;;  %v202_v12 = vpack.c.bf16 %v189_v9, %v188_v7  ;;  %v190_v19 = vld [vmem:[%s171_s26 + $0x30] sm:$0xff]  ;;  %v201_v25 = vpack.c.bf16 %v187_v18, %v186_v17 }
  0x16   : > { %v204_v13 = vpack.c.bf16 %v193_v11, %v192_v10  ;;  %v196_v14 = vld [vmem:[%s171_s26 + $0x60] sm:$0xff]  ;;  %v197_v15 = vld [vmem:[%s171_s26 + $0x68] sm:$0xff]  ;;  %v191_v20 = vld [vmem:[%s171_s26 + $0x38] sm:$0xff] }
  0x17   : > { %v206_v16 = vpack.c.bf16 %v197_v15, %v196_v14  ;;  %v194_v21 = vld [vmem:[%s171_s26 + $0x50] sm:$0xff]  ;;  %v195_v22 = vld [vmem:[%s171_s26 + $0x58] sm:$0xff]  ;;  %v203_v26 = vpack.c.bf16 %v191_v20, %v190_v19 }
  0x18   : > { %256 = vmatpush.bf16.msra.mxu0 %v446_v4  ;;  %450 = vmatpush.bf16.msra.mxu1 %v446_v4  ;;  %v198_v23 = vld [vmem:[%s171_s26 + $0x70] sm:$0xff]  ;;  %v199_v24 = vld [vmem:[%s171_s26 + $0x78] sm:$0xff]  ;;  %v205_v27 = vpack.c.bf16 %v195_v22, %v194_v21 }
  0x19   : > { %451 = vmatpush.bf16.msra.mxu2 %v446_v4  ;;  %452 = vmatpush.bf16.msra.mxu3 %v446_v4  ;;  %v207_v28 = vpack.c.bf16 %v199_v24, %v198_v23 }
  0x1b   : > { %436 = vmatmul.msk.bf16.vlgmr.msra.gmra.mxu0 %vm220_vm1, %v200_v8  ;;  %438 = vmatmul.msk.bf16.vlgmr.msra.gmra.mxu1 %vm220_vm1, %v202_v12 }
  0x1c   : > { %440 = vmatmul.msk.bf16.vlgmr.msra.gmra.mxu2 %vm220_vm1, %v204_v13  ;;  %442 = vmatmul.msk.bf16.vlgmr.msra.gmra.mxu3 %vm220_vm1, %v206_v16 }
  0x2b   : > { %437 = vmatmul.msk.bf16.gmra.mxu0 %vm220_vm1, %v201_v25  ;;  %439 = vmatmul.msk.bf16.gmra.mxu1 %vm220_vm1, %v203_v26 }
  0x2c   : > { %441 = vmatmul.msk.bf16.gmra.mxu2 %vm220_vm1, %v205_v27  ;;  %443 = vmatmul.msk.bf16.gmra.mxu3 %vm220_vm1, %v207_v28 }
  0x98   : > { %v258_v29 = vpop.f32.mrf.mxu0  ;;  %v268_v30 = vpop.f32.mrf.mxu1 }
  0x99   : > { %v298_v31 = vmax.f32 %v258_v29, 0.0  ;;  %v302_v32 = vmax.f32 %v268_v30, 0.0 }
  0x9b   : > { %315 = vst.msk [vmem:[%s605_s29] sm:$0xff] %vm314_vm2, %v298_v31 }
  0x9c   : > { %319 = vst.msk [vmem:[%s605_s29 + $0x20] sm:$0xff] %vm314_vm2, %v302_v32 }
  0x9f   : > { %v278_v33 = vpop.f32.mrf.mxu2  ;;  %v288_v34 = vpop.f32.mrf.mxu3 }
  0xa0   : > { %v306_v35 = vmax.f32 %v278_v33, 0.0  ;;  %v310_v36 = vmax.f32 %v288_v34, 0.0  ;;  %v260_v37 = vpop.f32.mrf.mxu0  ;;  %v270_v38 = vpop.f32.mrf.mxu1 }
  0xa1   : > { %v299_v39 = vmax.f32 %v260_v37, 0.0  ;;  %v303_v40 = vmax.f32 %v270_v38, 0.0 }
  0xa2   : > { %323 = vst.msk [vmem:[%s605_s29 + $0x40] sm:$0xff] %vm314_vm2, %v306_v35 }
  0xa3   : > { %327 = vst.msk [vmem:[%s605_s29 + $0x60] sm:$0xff] %vm314_vm2, %v310_v36 }
  0xa4   : > { %316 = vst.msk [vmem:[%s605_s29 + $0x8] sm:$0xff] %vm314_vm2, %v299_v39 }
  0xa5   : > { %320 = vst.msk [vmem:[%s605_s29 + $0x28] sm:$0xff] %vm314_vm2, %v303_v40 }
  0xa7   : > { %v280_v41 = vpop.f32.mrf.mxu2  ;;  %v290_v42 = vpop.f32.mrf.mxu3 }
  0xa8   : > { %v307_v43 = vmax.f32 %v280_v41, 0.0  ;;  %v311_v44 = vmax.f32 %v290_v42, 0.0  ;;  %v263_v45 = vpop.f32.mrf.mxu0  ;;  %v273_v46 = vpop.f32.mrf.mxu1 }
  0xa9   : > { %v300_v47 = vmax.f32 %v263_v45, 0.0  ;;  %v304_v48 = vmax.f32 %v273_v46, 0.0 }
  0xaa   : > { %324 = vst.msk [vmem:[%s605_s29 + $0x48] sm:$0xff] %vm314_vm2, %v307_v43 }
  0xab   : > { %328 = vst.msk [vmem:[%s605_s29 + $0x68] sm:$0xff] %vm314_vm2, %v311_v44 }
  0xac   : > { %317 = vst.msk [vmem:[%s605_s29 + $0x10] sm:$0xff] %vm314_vm2, %v300_v47 }
  0xad   : > { %321 = vst.msk [vmem:[%s605_s29 + $0x30] sm:$0xff] %vm314_vm2, %v304_v48 }
  0xaf   : > { %v283_v49 = vpop.f32.mrf.mxu2  ;;  %v293_v50 = vpop.f32.mrf.mxu3 }
  0xb0   : > { %v308_v51 = vmax.f32 %v283_v49, 0.0  ;;  %v312_v52 = vmax.f32 %v293_v50, 0.0  ;;  %v265_v53 = vpop.f32.mrf.mxu0  ;;  %v275_v54 = vpop.f32.mrf.mxu1 }
  0xb1   : > { %v301_v55 = vmax.f32 %v265_v53, 0.0  ;;  %v305_v56 = vmax.f32 %v275_v54, 0.0 }
  0xb2   : > { %325 = vst.msk [vmem:[%s605_s29 + $0x50] sm:$0xff] %vm314_vm2, %v308_v51 }
  0xb3   : > { %329 = vst.msk [vmem:[%s605_s29 + $0x70] sm:$0xff] %vm314_vm2, %v312_v52 }
  0xb4   : > { %318 = vst.msk [vmem:[%s605_s29 + $0x18] sm:$0xff] %vm314_vm2, %v301_v55 }
  0xb5   : > { %322 = vst.msk [vmem:[%s605_s29 + $0x38] sm:$0xff] %vm314_vm2, %v305_v56 }
  0xb7   : > { %v285_v57 = vpop.f32.mrf.mxu2  ;;  %v295_v58 = vpop.f32.mrf.mxu3 }
  0xb8   : > { %v309_v59 = vmax.f32 %v285_v57, 0.0  ;;  %v313_v60 = vmax.f32 %v295_v58, 0.0 }
  0xba   : > { %326 = vst.msk [vmem:[%s605_s29 + $0x58] sm:$0xff] %vm314_vm2, %v309_v59 }
  0xbb   : > { %330 = vst.msk [vmem:[%s605_s29 + $0x78] sm:$0xff] %vm314_vm2, %v313_v60 }
  0xbc PF: > { %s12_s13 = sadd.s32 1, %s531_s13   ;;  %s657_s9 = smov %s523_s11 }
  0xbd   : > { %p9_p7 = scmp.ge.s32.totalorder %s12_s13, 6   ;;  %s658_s10 = smov %s527_s12 }
  0xbe   : > { %s659_s11 = smov %s662_s14  ;;  %s660_s12 = smov %s666_s15 }
  0xbf   :  { %11 = sbr.rel (!%p9_p7) target bundleno = 3 (0x3), region = 58 }

// kernel: reverse.10
= control target key start
LH: loop header
LB: loop body
LE: loop exit
PB: predicated region body
PF: predicated region fallthrough
CT: control target
= control target key end

     0   :  { %s80_s0 = inlined_call_operand.vmem [shape: f32[2,12,8,3], index: 0, kind: input, shape index: {}]   ;;  %s81_s1 = inlined_call_operand.vmem [shape: f32[2,12,8,3], index: 1, kind: output, shape index: {}]  }
   0x1   :  { %v24_v0 = vld [vmem:[%s80_s0 + $0x10] sm:$0xff]  ;;  %v25_v1 = vld [vmem:[%s80_s0 + $0x28] sm:$0xff]  ;;  %v29_v3 = vld [vmem:[%s80_s0 + $0x20] sm:$0xff] }
   0x2   :  { %v27_v2 = vld [vmem:[%s80_s0 + $0x8] sm:$0xff]  ;;  %4 = vst [vmem:[%s81_s1] sm:$0xff] %v24_v0  ;;  %v17_v4 = vld [vmem:[%s80_s0] sm:$0xff]  ;;  %v32_v5 = vld [vmem:[%s80_s0 + $0x18] sm:$0xff] }
   0x3   :  { %26 = vst [vmem:[%s81_s1 + $0x18] sm:$0xff] %v25_v1 }
   0x4   :  { %28 = vst [vmem:[%s81_s1 + $0x8] sm:$0xff] %v27_v2 }
   0x5   :  { %30 = vst [vmem:[%s81_s1 + $0x20] sm:$0xff] %v29_v3 }
   0x6   :  { %31 = vst [vmem:[%s81_s1 + $0x10] sm:$0xff] %v17_v4 }
   0x7   :  { %33 = vst [vmem:[%s81_s1 + $0x28] sm:$0xff] %v32_v5 }

// kernel: ffc_block_forward.13
= control target key start
LH: loop header
LB: loop body
LE: loop exit
PB: predicated region body
PF: predicated region fallthrough
CT: control target
= control target key end

     0   :  { %s410_s9 = smov 0   ;;  %s412_s10 = smov 0   ;;  %s467_s0 = inlined_call_operand.vmem [shape: f32[2,40,24], index: 0, kind: input, shape index: {}]   ;;  %s468_s1 = inlined_call_operand.vmem [shape: bf16[24,24], index: 1, kind: input, shape index: {}]   ;;  %s469_s2 = inlined_call_operand.vmem [shape: f32[2,40,24], index: 2, kind: output, shape index: {}]  }
   0x1   :  { %s414_s11 = smov 0   ;;  %s416_s12 = smov 0  }
   0x2   :  { %s418_s13 = smov 0  }
   0x3 LB: > { %s21_s14 = sadd.s32 1, %s385_s11  ;;  %s24_s15 = sadd.s32 1, %s389_s12  ;;  %s393_s13 = sphi %s418_s13, %s12_s13   ;;  %s389_s12 = sphi %s416_s12, %s473_s12   ;;  %s385_s11 = sphi %s414_s11, %s472_s11   ;;  %s381_s10 = sphi %s412_s10, %s471_s10   ;;  %s377_s9 = sphi %s410_s9, %s470_s9  }
   0x4   : > { %p22_p0 = scmp.ge.s32.totalorder %s21_s14, 5  ;;  %p303_p1 = scmp.ge.s32.totalorder %s393_s13, 1 }
   0x5   : > { %p131_p2 = scmp.lt.s32.totalorder %s393_s13, 11 }
   0x6   : > { %s475_s14 = smov (%p22_p0, %s21_s14), 0  ;;  %s477_s15 = smov (!%p22_p0, %s24_s15), %s389_s12 }
   0x7   : > { %p132_p3 = pnand %p303_p1, %p131_p2  ;;  %p26_p4 = scmp.ge.s32.totalorder %s477_s15, 2 }
   0x8   : > { %p159_p5 = scmp.lt.s32.totalorder (!%p132_p3), %s381_s10, 1  ;;  %p161_p6 = scmp.lt.s32.totalorder (!%p132_p3), %s377_s9, 4 }
   0x9   : > { %s479_s15 = smov (%p26_p4, %s477_s15), 0  ;;  %135 = sbr.rel (%p132_p3) target bundleno = 161 (0xa1), region = 28 }
   0xe   : > { %v180_v0 = vld [vmem:[%s468_s1 + $0x8] sm:$0xf]  ;;  %vm194_vm0 = vcmask 1043456   ;;  %s481_s10 = smov (!%p159_p5, %s381_s10), 1  ;;  %s483_s9 = smov (!%p161_p6, %s377_s9), 4  ;;  %v313_v4 = vld [vmem:[%s468_s1] sm:$0xff] }
   0xf   : > { %v186_v1 = vunpack.c.l.b16 %v180_v0  ;;  %s314_s18 = smul.u32 5, %s481_s10  ;;  %vm190_vm1 = vcmask 195584  }
  0x11   : > { %v188_v2 = vpack.c.b16 %v186_v1, %v186_v1  ;;  %s164_s21 = sadd.s32 %s314_s18, %s483_s9 }
  0x12   : > { %s304_s22 = sshll.u32 %s164_s21, 3 }
  0x13   : > { %v196_v3 = vsel %vm194_vm0, %v188_v2, 0  ;;  %s166_s25 = scalar_lea.vmem %s467_s0, %s304_s22  ;;  %s174_s28 = scalar_lea.vmem %s469_s2, %s304_s22 }
  0x14   : > { %204 = vmatpush.bf16.msra.mxu0 %v196_v3  ;;  %v176_v5 = vld [vmem:[%s166_s25] sm:$0xff] }
  0x15   : > { %v177_v6 = vpack.c.bf16 %v176_v5, %v176_v5 }
  0x18   : > { %205 = vmatpush.bf16.msra.mxu0 %v313_v4 }
  0x1b   : > { %310 = vmatmul.msk.bf16.vlgmr.msra.gmra.mxu0 %vm190_vm1, %v177_v6 }
  0x98   : > { %v207_v7 = vpop.f32.mrf.mxu0 }
  0x99   : > { %v211_v8 = vmax.f32 %v207_v7, 0.0 }
  0x9b   : > { %212 = vst.msk [vmem:[%s174_s28] sm:$0xff] %vm190_vm1, %v211_v8 }
  0xa0   : > { %v209_v9 = vpop.f32.mrf.mxu0 }
  0xa1 PF: > { %s12_s13 = sadd.s32 1, %s393_s13   ;;  %s470_s9 = smov %s385_s11 }
  0xa2   : > { %p9_p7 = scmp.ge.s32.totalorder %s12_s13, 12   ;;  %s471_s10 = smov %s389_s12 }
  0xa3   : > { %s472_s11 = smov %s475_s14  ;;  %s473_s12 = smov %s479_s15 }
  0xa4   :  { %11 = sbr.rel (!%p9_p7) target bundleno = 3 (0x3), region = 58 }

// kernel: ffc_block_forward.12
= control target key start
LH: loop header
LB: loop body
LE: loop exit
PB: predicated region body
PF: predicated region fallthrough
CT: control target
= control target key end

     0   :  { %s492_s9 = smov 0   ;;  %s494_s10 = smov 0   ;;  %s570_s0 = inlined_call_operand.vmem [shape: f32[2,144,24], index: 0, kind: input, shape index: {}]   ;;  %s571_s1 = inlined_call_operand.vmem [shape: bf16[24,24], index: 1, kind: input, shape index: {}]   ;;  %s572_s2 = inlined_call_operand.vmem [shape: f32[2,144,24], index: 2, kind: output, shape index: {}]  }
   0x1   :  { %s496_s11 = smov 0   ;;  %s498_s12 = smov 0  }
   0x2   :  { %s500_s13 = smov 0  }
   0x3 LB: > { %s21_s14 = sadd.s32 1, %s467_s11  ;;  %s24_s15 = sadd.s32 1, %s471_s12  ;;  %s475_s13 = sphi %s500_s13, %s12_s13   ;;  %s471_s12 = sphi %s498_s12, %s576_s12   ;;  %s467_s11 = sphi %s496_s11, %s575_s11   ;;  %s463_s10 = sphi %s494_s10, %s574_s10   ;;  %s459_s9 = sphi %s492_s9, %s573_s9  }
   0x4   : > { %p22_p0 = scmp.ge.s32.totalorder %s21_s14, 2  ;;  %p375_p1 = scmp.ge.s32.totalorder %s475_s13, 1 }
   0x5   : > { %p133_p2 = scmp.lt.s32.totalorder %s475_s13, 5 }
   0x6   : > { %s578_s14 = smov (%p22_p0, %s21_s14), 0  ;;  %s580_s15 = smov (!%p22_p0, %s24_s15), %s471_s12 }
   0x7   : > { %p134_p3 = pnand %p375_p1, %p133_p2  ;;  %p26_p4 = scmp.ge.s32.totalorder %s580_s15, 2 }
   0x8   : > { %s163_s18 = smul.u32 (!%p134_p3), 9, %s459_s9  ;;  %p164_p5 = scmp.lt.s32.totalorder (!%p134_p3), %s463_s10, 1 }
   0x9   : > { %s582_s15 = smov (%p26_p4, %s580_s15), 0  ;;  %137 = sbr.rel (%p134_p3) target bundleno = 186 (0xba), region = 28 }
   0xa   : > { %p166_p6 = scmp.lt.s32.totalorder (!%p134_p3), %s163_s18, 17 }
   0xe   : > { %v200_v0 = vld [vmem:[%s571_s1 + $0x8] sm:$0xf]  ;;  %vm226_vm0 = vcmask 1043456   ;;  %s584_s10 = smov (!%p164_p5, %s463_s10), 1  ;;  %s586_s18 = smov (!%p166_p6, %s163_s18), 17  ;;  %v389_v4 = vld [vmem:[%s571_s1] sm:$0xff] }
   0xf   : > { %v206_v1 = vunpack.c.l.b16 %v200_v0  ;;  %s396_s19 = smul.u32 18, %s584_s10  ;;  %vm210_vm1 = vcmask 195584  }
  0x11   : > { %v208_v2 = vpack.c.b16 %v206_v1, %v206_v1  ;;  %s528_s22 = sadd.s32 %s396_s19, %s586_s18 }
  0x12   : > { %s376_s23 = sshll.u32 %s528_s22, 3 }
  0x13   : > { %v228_v3 = vsel %vm226_vm0, %v208_v2, 0  ;;  %s171_s26 = scalar_lea.vmem %s570_s0, %s376_s23  ;;  %s181_s29 = scalar_lea.vmem %s572_s2, %s376_s23 }
  0x14   : > { %391 = vmatpush.bf16.msra.mxu2 %v228_v3  ;;  %392 = vmatpush.bf16.msra.mxu3 %v228_v3  ;;  %v188_v5 = vld [vmem:[%s171_s26 + $0x20] sm:$0xff]  ;;  %v189_v6 = vld [vmem:[%s171_s26 + $0x28] sm:$0xff]  ;;  %v186_v12 = vld [vmem:[%s171_s26 + $0x10] sm:$0xff] }
  0x15   : > { %236 = vmatpush.bf16.msra.mxu0 %v228_v3  ;;  %390 = vmatpush.bf16.msra.mxu1 %v228_v3  ;;  %v192_v7 = vld [vmem:[%s171_s26 + $0x40] sm:$0xff]  ;;  %v195_v8 = vpack.c.bf16 %v189_v6, %v188_v5  ;;  %v185_v11 = vld [vmem:[%s171_s26 + $0x8] sm:$0xff]  ;;  %v187_v14 = vld [vmem:[%s171_s26 + $0x18] sm:$0xff] }
  0x16   : > { %v197_v9 = vpack.c.bf16 %v192_v7, %v192_v7  ;;  %v184_v10 = vld [vmem:[%s171_s26] sm:$0xff]  ;;  %v194_v15 = vpack.c.bf16 %v187_v14, %v186_v12  ;;  %v190_v16 = vld [vmem:[%s171_s26 + $0x30] sm:$0xff]  ;;  %v191_v17 = vld [vmem:[%s171_s26 + $0x38] sm:$0xff] }
  0x17   : > { %v193_v13 = vpack.c.bf16 %v185_v11, %v184_v10  ;;  %v196_v18 = vpack.c.bf16 %v191_v17, %v190_v16 }
  0x18   : > { %394 = vmatpush.bf16.msra.mxu2 %v389_v4  ;;  %395 = vmatpush.bf16.msra.mxu3 %v389_v4 }
  0x19   : > { %237 = vmatpush.bf16.msra.mxu0 %v389_v4  ;;  %393 = vmatpush.bf16.msra.mxu1 %v389_v4 }
  0x1b   : > { %384 = vmatmul.msk.bf16.vlgmr.msra.gmra.mxu2 %vm210_vm1, %v195_v8  ;;  %386 = vmatmul.msk.bf16.vlgmr.msra.gmra.mxu3 %vm210_vm1, %v197_v9 }
  0x1c   : > { %382 = vmatmul.msk.bf16.vlgmr.msra.gmra.mxu0 %vm210_vm1, %v193_v13  ;;  %383 = vmatmul.msk.bf16.vlgmr.msra.gmra.mxu1 %vm210_vm1, %v194_v15 }
  0x2b   : > { %385 = vmatmul.msk.bf16.gmra.mxu2 %vm210_vm1, %v196_v18 }
  0x99   : > { %v239_v19 = vpop.f32.mrf.mxu0  ;;  %v244_v21 = vpop.f32.mrf.mxu1 }
  0x9a   : > { %v263_v20 = vmax.f32 %v239_v19, 0.0  ;;  %v265_v22 = vmax.f32 %v244_v21, 0.0 }
  0x9c   : > { %272 = vst.msk [vmem:[%s181_s29] sm:$0xff] %vm210_vm1, %v263_v20 }
  0x9d   : > { %274 = vst.msk [vmem:[%s181_s29 + $0x10] sm:$0xff] %vm210_vm1, %v265_v22 }
  0x9e   : > { %v249_v23 = vpop.f32.mrf.mxu2  ;;  %v259_v24 = vpop.f32.mrf.mxu3 }
  0x9f   : > { %v267_v25 = vmax.f32 %v249_v23, 0.0  ;;  %v271_v26 = vmax.f32 %v259_v24, 0.0 }
  0xa1   : > { %276 = vst.msk [vmem:[%s181_s29 + $0x20] sm:$0xff] %vm210_vm1, %v267_v25  ;;  %v241_v27 = vpop.f32.mrf.mxu0  ;;  %v246_v29 = vpop.f32.mrf.mxu1 }
  0xa2   : > { %280 = vst.msk [vmem:[%s181_s29 + $0x40] sm:$0xff] %vm210_vm1, %v271_v26  ;;  %v264_v28 = vmax.f32 %v241_v27, 0.0  ;;  %v266_v30 = vmax.f32 %v246_v29, 0.0 }
  0xa4   : > { %273 = vst.msk [vmem:[%s181_s29 + $0x8] sm:$0xff] %vm210_vm1, %v264_v28 }
  0xa5   : > { %275 = vst.msk [vmem:[%s181_s29 + $0x18] sm:$0xff] %vm210_vm1, %v266_v30 }
  0xa6   : > { %v251_v31 = vpop.f32.mrf.mxu2  ;;  %v261_v32 = vpop.f32.mrf.mxu3 }
  0xa7   : > { %v268_v33 = vmax.f32 %v251_v31, 0.0 }
  0xa9   : > { %277 = vst.msk [vmem:[%s181_s29 + $0x28] sm:$0xff] %vm210_vm1, %v268_v33 }
  0xae   : > { %v254_v34 = vpop.f32.mrf.mxu2 }
  0xaf   : > { %v269_v35 = vmax.f32 %v254_v34, 0.0 }
  0xb1   : > { %278 = vst.msk [vmem:[%s181_s29 + $0x30] sm:$0xff] %vm210_vm1, %v269_v35 }
  0xb6   : > { %v256_v36 = vpop.f32.mrf.mxu2 }
  0xb7   : > { %v270_v37 = vmax.f32 %v256_v36, 0.0 }
  0xb9   : > { %279 = vst.msk [vmem:[%s181_s29 + $0x38] sm:$0xff] %vm210_vm1, %v270_v37 }
  0xba PF: > { %s12_s13 = sadd.s32 1, %s475_s13   ;;  %s573_s9 = smov %s467_s11 }
  0xbb   : > { %p9_p7 = scmp.ge.s32.totalorder %s12_s13, 6   ;;  %s574_s10 = smov %s471_s12 }
  0xbc   : > { %s575_s11 = smov %s578_s14  ;;  %s576_s12 = smov %s582_s15 }
  0xbd   :  { %11 = sbr.rel (!%p9_p7) target bundleno = 3 (0x3), region = 58 }

// kernel: reverse.8
= control target key start
LH: loop header
LB: loop body
LE: loop exit
PB: predicated region body
PF: predicated region fallthrough
CT: control target
= control target key end

     0   :  { %s344_s0 = inlined_call_operand.vmem [shape: f32[2,12,16,7], index: 0, kind: input, shape index: {}]   ;;  %s345_s1 = inlined_call_operand.vmem [shape: f32[2,12,16,7], index: 1, kind: output, shape index: {}]  }
   0x1   :  { %v112_v0 = vld [vmem:[%s344_s0 + $0x60] sm:$0xff]  ;;  %v113_v1 = vld [vmem:[%s344_s0 + $0xd0] sm:$0xff]  ;;  %v138_v14 = vld [vmem:[%s344_s0 + $0x68] sm:$0xff] }
   0x2   :  { %v115_v2 = vld [vmem:[%s344_s0 + $0x50] sm:$0xff]  ;;  %4 = vst [vmem:[%s345_s1] sm:$0xff] %v112_v0  ;;  %v117_v3 = vld [vmem:[%s344_s0 + $0xc0] sm:$0xff]  ;;  %v140_v15 = vld [vmem:[%s344_s0 + $0xd8] sm:$0xff] }
   0x3   :  { %114 = vst [vmem:[%s345_s1 + $0x70] sm:$0xff] %v113_v1  ;;  %v119_v4 = vld [vmem:[%s344_s0 + $0x40] sm:$0xff]  ;;  %v121_v5 = vld [vmem:[%s344_s0 + $0xb0] sm:$0xff]  ;;  %v142_v16 = vld [vmem:[%s344_s0 + $0x58] sm:$0xff] }
   0x4   :  { %116 = vst [vmem:[%s345_s1 + $0x10] sm:$0xff] %v115_v2  ;;  %v123_v6 = vld [vmem:[%s344_s0 + $0x30] sm:$0xff]  ;;  %v125_v7 = vld [vmem:[%s344_s0 + $0xa0] sm:$0xff]  ;;  %v144_v17 = vld [vmem:[%s344_s0 + $0xc8] sm:$0xff] }
   0x5   :  { %118 = vst [vmem:[%s345_s1 + $0x80] sm:$0xff] %v117_v3  ;;  %v127_v8 = vld [vmem:[%s344_s0 + $0x20] sm:$0xff]  ;;  %v129_v9 = vld [vmem:[%s344_s0 + $0x90] sm:$0xff]  ;;  %v146_v18 = vld [vmem:[%s344_s0 + $0x48] sm:$0xff] }
   0x6   :  { %120 = vst [vmem:[%s345_s1 + $0x20] sm:$0xff] %v119_v4  ;;  %v131_v10 = vld [vmem:[%s344_s0 + $0x10] sm:$0xff]  ;;  %v133_v11 = vld [vmem:[%s344_s0 + $0x80] sm:$0xff]  ;;  %v148_v19 = vld [vmem:[%s344_s0 + $0xb8] sm:$0xff] }
   0x7   :  { %122 = vst [vmem:[%s345_s1 + $0x90] sm:$0xff] %v121_v5  ;;  %v49_v12 = vld [vmem:[%s344_s0] sm:$0xff]  ;;  %v136_v13 = vld [vmem:[%s344_s0 + $0x70] sm:$0xff]  ;;  %v150_v20 = vld [vmem:[%s344_s0 + $0x38] sm:$0xff] }
   0x8   :  { %124 = vst [vmem:[%s345_s1 + $0x30] sm:$0xff] %v123_v6  ;;  %v152_v21 = vld [vmem:[%s344_s0 + $0xa8] sm:$0xff]  ;;  %v156_v23 = vld [vmem:[%s344_s0 + $0x98] sm:$0xff] }
   0x9   :  { %126 = vst [vmem:[%s345_s1 + $0xa0] sm:$0xff] %v125_v7  ;;  %v154_v22 = vld [vmem:[%s344_s0 + $0x28] sm:$0xff]  ;;  %v158_v24 = vld [vmem:[%s344_s0 + $0x18] sm:$0xff] }
   0xa   :  { %128 = vst [vmem:[%s345_s1 + $0x40] sm:$0xff] %v127_v8  ;;  %v160_v25 = vld [vmem:[%s344_s0 + $0x88] sm:$0xff]  ;;  %v164_v27 = vld [vmem:[%s344_s0 + $0x78] sm:$0xff] }
   0xb   :  { %130 = vst [vmem:[%s345_s1 + $0xb0] sm:$0xff] %v129_v9  ;;  %v162_v26 = vld [vmem:[%s344_s0 + $0x8] sm:$0xff] }
   0xc   :  { %132 = vst [vmem:[%s345_s1 + $0x50] sm:$0xff] %v131_v10 }
   0xd   :  { %134 = vst [vmem:[%s345_s1 + $0xc0] sm:$0xff] %v133_v11 }
   0xe   :  { %135 = vst [vmem:[%s345_s1 + $0x60] sm:$0xff] %v49_v12 }
   0xf   :  { %137 = vst [vmem:[%s345_s1 + $0xd0] sm:$0xff] %v136_v13 }
  0x10   :  { %139 = vst [vmem:[%s345_s1 + $0x8] sm:$0xff] %v138_v14 }
  0x11   :  { %141 = vst [vmem:[%s345_s1 + $0x78] sm:$0xff] %v140_v15 }
  0x12   :  { %143 = vst [vmem:[%s345_s1 + $0x18] sm:$0xff] %v142_v16 }
  0x13   :  { %145 = vst [vmem:[%s345_s1 + $0x88] sm:$0xff] %v144_v17 }
  0x14   :  { %147 = vst [vmem:[%s345_s1 + $0x28] sm:$0xff] %v146_v18 }
  0x15   :  { %149 = vst [vmem:[%s345_s1 + $0x98] sm:$0xff] %v148_v19 }
  0x16   :  { %151 = vst [vmem:[%s345_s1 + $0x38] sm:$0xff] %v150_v20 }
  0x17   :  { %153 = vst [vmem:[%s345_s1 + $0xa8] sm:$0xff] %v152_v21 }
  0x18   :  { %155 = vst [vmem:[%s345_s1 + $0x48] sm:$0xff] %v154_v22 }
  0x19   :  { %157 = vst [vmem:[%s345_s1 + $0xb8] sm:$0xff] %v156_v23 }
  0x1a   :  { %159 = vst [vmem:[%s345_s1 + $0x58] sm:$0xff] %v158_v24 }
  0x1b   :  { %161 = vst [vmem:[%s345_s1 + $0xc8] sm:$0xff] %v160_v25 }
  0x1c   :  { %163 = vst [vmem:[%s345_s1 + $0x68] sm:$0xff] %v162_v26 }
  0x1d   :  { %165 = vst [vmem:[%s345_s1 + $0xd8] sm:$0xff] %v164_v27 }

// kernel: ffc_block_forward.14
= control target key start
LH: loop header
LB: loop body
LE: loop exit
PB: predicated region body
PF: predicated region fallthrough
CT: control target
= control target key end

     0   :  { %s871_s18 = smov 0   ;;  %s873_s19 = smov 0   ;;  %s1058_s0 = inlined_call_operand.vmem [shape: f32[2,256,12], index: 0, kind: input, shape index: {}]   ;;  %s1059_s1 = inlined_call_operand.vmem [shape: f32[2,256,12], index: 1, kind: input, shape index: {}]   ;;  %s1060_s2 = inlined_call_operand.vmem [shape: f32[2,256,12], index: 2, kind: input, shape index: {}]   ;;  %s1061_s3 = inlined_call_operand.vmem [shape: f32[2,256,24], index: 3, kind: input, shape index: {}]   ;;  %s1062_s4 = inlined_call_operand.vmem [shape: bf16[12,24], index: 4, kind: input, shape index: {}]   ;;  %s1063_s5 = inlined_call_operand.vmem [shape: f32[2,256,24], index: 5, kind: output, shape index: {}]  }
   0x1   :  { %s875_s20 = smov 0   ;;  %s877_s21 = smov 0  }
   0x2   :  { %s879_s22 = smov 0  }
   0x3 LB: > { %s24_s23 = sadd.s32 1, %s831_s20  ;;  %s27_s24 = sadd.s32 1, %s835_s21  ;;  %s839_s22 = sphi %s879_s22, %s15_s22   ;;  %s835_s21 = sphi %s877_s21, %s1067_s21   ;;  %s831_s20 = sphi %s875_s20, %s1066_s20   ;;  %s827_s19 = sphi %s873_s19, %s1065_s19   ;;  %s823_s18 = sphi %s871_s18, %s1064_s18  }
   0x4   : > { %p25_p0 = scmp.ge.s32.totalorder %s24_s23, 2  ;;  %p727_p1 = scmp.ge.s32.totalorder %s839_s22, 1 }
   0x5   : > { %p259_p2 = scmp.lt.s32.totalorder %s839_s22, 5 }
   0x6   : > { %s1069_s23 = smov (%p25_p0, %s24_s23), 0  ;;  %s1071_s24 = smov (!%p25_p0, %s27_s24), %s835_s21 }
   0x7   : > { %p260_p3 = pnand %p727_p1, %p259_p2  ;;  %p29_p4 = scmp.ge.s32.totalorder %s1071_s24, 2 }
   0x8   : > { %s728_s29 = sshll.u32 (!%p260_p3), %s823_s18, 4  ;;  %p323_p5 = scmp.lt.s32.totalorder (!%p260_p3), %s827_s19, 1 }
   0x9   : > { %s1073_s24 = smov (%p29_p4, %s1071_s24), 0  ;;  %263 = sbr.rel (%p260_p3) target bundleno = 195 (0xc3), region = 40 }
   0xa   : > { %p325_p6 = scmp.lt.s32.totalorder (!%p260_p3), %s728_s29, 31 }
   0xe   : > { %v745_v0 = vld [vmem:[%s1062_s4] sm:$0xf]  ;;  %v757_v1 = vld [vmem:[%s1062_s4] sm:$0x30]  ;;  %vm509_vm0 = vcmask 1045504   ;;  %s1075_s19 = smov (!%p323_p5, %s827_s19), 1 }
   0xf   : > { %v746_v2 = vor.u32 %v757_v1, %v745_v0  ;;  %s1077_s29 = smov (!%p325_p6, %s728_s29), 31  ;;  %s729_s30 = sshll.u32 %s1075_s19, 5  ;;  %vm484_vm1 = vcmask 97280   ;;  %vm562_vm2 = vcmask 195584  }
  0x10   : > { %s328_s6 = sadd.s32 %s729_s30, %s1077_s29 }
  0x11   : > { %v511_v3 = vsel %vm509_vm0, %v746_v2, 0  ;;  %s907_s7 = sshll.u32 %s328_s6, 3 }
  0x12   : > { %520 = vmatpush.bf16.msra.mxu0 %v511_v3  ;;  %758 = vmatpush.bf16.msra.mxu1 %v511_v3  ;;  %s913_s10 = scalar_lea.vmem %s1058_s0, %s907_s7  ;;  %s919_s13 = scalar_lea.vmem %s1059_s1, %s907_s7 }
  0x13   : > { %759 = vmatpush.bf16.msra.mxu2 %v511_v3  ;;  %760 = vmatpush.bf16.msra.mxu3 %v511_v3  ;;  %s925_s16 = scalar_lea.vmem %s1060_s2, %s907_s7  ;;  %v373_v4 = vld [vmem:[%s913_s10] sm:$0xff]  ;;  %v374_v5 = vld [vmem:[%s913_s10 + $0x8] sm:$0xff]  ;;  %v375_v44 = vld [vmem:[%s913_s10 + $0x10] sm:$0xff]  ;;  %s987_s19 = scalar_lea.vmem %s1061_s3, %s907_s7 }
  0x14   : > { %v389_v6 = vld [vmem:[%s919_s13] sm:$0xff]  ;;  %v390_v7 = vld [vmem:[%s919_s13 + $0x8] sm:$0xff]  ;;  %v376_v46 = vld [vmem:[%s913_s10 + $0x18] sm:$0xff]  ;;  %s994_s27 = scalar_lea.vmem %s1063_s5, %s907_s7 }
  0x15   : > { %v405_v8 = vadd.f32 %v389_v6, %v373_v4  ;;  %v421_v9 = vld [vmem:[%s925_s16] sm:$0xff]  ;;  %v422_v10 = vld [vmem:[%s925_s16 + $0x8] sm:$0xff]  ;;  %v406_v11 = vadd.f32 %v390_v7, %v374_v5  ;;  %v391_v47 = vld [vmem:[%s919_s13 + $0x10] sm:$0xff] }
  0x16   : > { %v377_v12 = vld [vmem:[%s913_s10 + $0x20] sm:$0xff]  ;;  %v378_v13 = vld [vmem:[%s913_s10 + $0x28] sm:$0xff]  ;;  %v392_v48 = vld [vmem:[%s919_s13 + $0x18] sm:$0xff]  ;;  %v407_v56 = vadd.f32 %v391_v47, %v375_v44 }
  0x17   : > { %v393_v14 = vld [vmem:[%s919_s13 + $0x20] sm:$0xff]  ;;  %v437_v15 = vadd.f32 %v421_v9, %v405_v8  ;;  %v394_v16 = vld [vmem:[%s919_s13 + $0x28] sm:$0xff]  ;;  %v438_v20 = vadd.f32 %v422_v10, %v406_v11  ;;  %v379_v51 = vld [vmem:[%s913_s10 + $0x30] sm:$0xff]  ;;  %v408_v57 = vadd.f32 %v392_v48, %v376_v46 }
  0x18   : > { %v409_v17 = vadd.f32 %v393_v14, %v377_v12  ;;  %v425_v18 = vld [vmem:[%s925_s16 + $0x20] sm:$0xff]  ;;  %v426_v19 = vld [vmem:[%s925_s16 + $0x28] sm:$0xff]  ;;  %v410_v21 = vadd.f32 %v394_v16, %v378_v13  ;;  %v380_v52 = vld [vmem:[%s913_s10 + $0x38] sm:$0xff] }
  0x19   : > { %v381_v22 = vld [vmem:[%s913_s10 + $0x40] sm:$0xff]  ;;  %v382_v23 = vld [vmem:[%s913_s10 + $0x48] sm:$0xff]  ;;  %v453_v30 = vpack.c.bf16 %v438_v20, %v437_v15  ;;  %v395_v53 = vld [vmem:[%s919_s13 + $0x30] sm:$0xff] }
  0x1a   : > { %v397_v24 = vld [vmem:[%s919_s13 + $0x40] sm:$0xff]  ;;  %v441_v25 = vadd.f32 %v425_v18, %v409_v17  ;;  %v398_v26 = vld [vmem:[%s919_s13 + $0x48] sm:$0xff]  ;;  %v442_v31 = vadd.f32 %v426_v19, %v410_v21  ;;  %v396_v54 = vld [vmem:[%s919_s13 + $0x38] sm:$0xff]  ;;  %v411_v0 = vadd.f32 %v395_v53, %v379_v51 }
  0x1b   : > { %v413_v27 = vadd.f32 %v397_v24, %v381_v22  ;;  %v429_v28 = vld [vmem:[%s925_s16 + $0x40] sm:$0xff]  ;;  %v430_v29 = vld [vmem:[%s925_s16 + $0x48] sm:$0xff]  ;;  %v414_v32 = vadd.f32 %v398_v26, %v382_v23  ;;  %747 = vmatmul.msk.bf16.vlgmr.msra.gmra.mxu0 %vm484_vm1, %v453_v30  ;;  %v423_v58 = vld [vmem:[%s925_s16 + $0x10] sm:$0xff]  ;;  %v412_v1 = vadd.f32 %v396_v54, %v380_v52 }
  0x1c   : > { %v385_v33 = vld [vmem:[%s913_s10 + $0x60] sm:$0xff]  ;;  %v386_v34 = vld [vmem:[%s913_s10 + $0x68] sm:$0xff]  ;;  %v455_v41 = vpack.c.bf16 %v442_v31, %v441_v25  ;;  %v424_v59 = vld [vmem:[%s925_s16 + $0x18] sm:$0xff]  ;;  %v439_v8 = vadd.f32 %v423_v58, %v407_v56 }
  0x1d   : > { %v401_v35 = vld [vmem:[%s919_s13 + $0x60] sm:$0xff]  ;;  %v445_v36 = vadd.f32 %v429_v28, %v413_v27  ;;  %v402_v37 = vld [vmem:[%s919_s13 + $0x68] sm:$0xff]  ;;  %v446_v42 = vadd.f32 %v430_v29, %v414_v32  ;;  %v383_v60 = vld [vmem:[%s913_s10 + $0x50] sm:$0xff]  ;;  %v440_v9 = vadd.f32 %v424_v59, %v408_v57 }
  0x1e   : > { %v417_v38 = vadd.f32 %v401_v35, %v385_v33  ;;  %v433_v39 = vld [vmem:[%s925_s16 + $0x60] sm:$0xff]  ;;  %v434_v40 = vld [vmem:[%s925_s16 + $0x68] sm:$0xff]  ;;  %v418_v43 = vadd.f32 %v402_v37, %v386_v34  ;;  %749 = vmatmul.msk.bf16.vlgmr.msra.gmra.mxu1 %vm484_vm1, %v455_v41  ;;  %v384_v61 = vld [vmem:[%s913_s10 + $0x58] sm:$0xff] }
  0x1f   : > { %v457_v49 = vpack.c.bf16 %v446_v42, %v445_v36  ;;  %v399_v62 = vld [vmem:[%s919_s13 + $0x50] sm:$0xff]  ;;  %v400_v63 = vld [vmem:[%s919_s13 + $0x58] sm:$0xff]  ;;  %v454_v20 = vpack.c.bf16 %v440_v9, %v439_v8  ;;  %v463_v28 = vld [vmem:[%s987_s19] sm:$0xff] }
  0x20   : > { %v449_v45 = vadd.f32 %v433_v39, %v417_v38  ;;  %v450_v50 = vadd.f32 %v434_v40, %v418_v43  ;;  %v427_v2 = vld [vmem:[%s925_s16 + $0x30] sm:$0xff]  ;;  %v428_v3 = vld [vmem:[%s925_s16 + $0x38] sm:$0xff]  ;;  %v415_v10 = vadd.f32 %v399_v62, %v383_v60  ;;  %v416_v11 = vadd.f32 %v400_v63, %v384_v61  ;;  %v467_v30 = vld [vmem:[%s987_s19 + $0x20] sm:$0xff] }
  0x21   : > { %751 = vmatmul.msk.bf16.vlgmr.msra.gmra.mxu2 %vm484_vm1, %v457_v49  ;;  %v387_v4 = vld [vmem:[%s913_s10 + $0x70] sm:$0xff]  ;;  %v388_v5 = vld [vmem:[%s913_s10 + $0x78] sm:$0xff]  ;;  %v443_v14 = vadd.f32 %v427_v2, %v411_v0  ;;  %v444_v15 = vadd.f32 %v428_v3, %v412_v1  ;;  %v464_v34 = vld [vmem:[%s987_s19 + $0x8] sm:$0xff] }
  0x22   : > { %v459_v55 = vpack.c.bf16 %v450_v50, %v449_v45  ;;  %v403_v6 = vld [vmem:[%s919_s13 + $0x70] sm:$0xff]  ;;  %v404_v7 = vld [vmem:[%s919_s13 + $0x78] sm:$0xff]  ;;  %v471_v35 = vld [vmem:[%s987_s19 + $0x40] sm:$0xff] }
  0x23   : > { %v431_v12 = vld [vmem:[%s925_s16 + $0x50] sm:$0xff]  ;;  %v432_v13 = vld [vmem:[%s925_s16 + $0x58] sm:$0xff]  ;;  %v419_v16 = vadd.f32 %v403_v6, %v387_v4  ;;  %v420_v17 = vadd.f32 %v404_v7, %v388_v5  ;;  %v456_v23 = vpack.c.bf16 %v444_v15, %v443_v14  ;;  %v468_v37 = vld [vmem:[%s987_s19 + $0x28] sm:$0xff] }
  0x24   : > { %753 = vmatmul.msk.bf16.vlgmr.msra.gmra.mxu3 %vm484_vm1, %v459_v55  ;;  %v435_v18 = vld [vmem:[%s925_s16 + $0x70] sm:$0xff]  ;;  %v436_v19 = vld [vmem:[%s925_s16 + $0x78] sm:$0xff]  ;;  %v447_v21 = vadd.f32 %v431_v12, %v415_v10  ;;  %v448_v22 = vadd.f32 %v432_v13, %v416_v11  ;;  %v475_v40 = vld [vmem:[%s987_s19 + $0x60] sm:$0xff] }
  0x25   : > { %v451_v24 = vadd.f32 %v435_v18, %v419_v16  ;;  %v452_v25 = vadd.f32 %v436_v19, %v420_v17  ;;  %v465_v46 = vld [vmem:[%s987_s19 + $0x10] sm:$0xff]  ;;  %v472_v47 = vld [vmem:[%s987_s19 + $0x48] sm:$0xff]  ;;  %v466_v58 = vld [vmem:[%s987_s19 + $0x18] sm:$0xff] }
  0x26   : > { %v458_v26 = vpack.c.bf16 %v448_v22, %v447_v21  ;;  %v469_v49 = vld [vmem:[%s987_s19 + $0x30] sm:$0xff]  ;;  %v476_v52 = vld [vmem:[%s987_s19 + $0x68] sm:$0xff]  ;;  %v470_v61 = vld [vmem:[%s987_s19 + $0x38] sm:$0xff] }
  0x27   : > { %v460_v27 = vpack.c.bf16 %v452_v25, %v451_v24  ;;  %v473_v59 = vld [vmem:[%s987_s19 + $0x50] sm:$0xff]  ;;  %v474_v6 = vld [vmem:[%s987_s19 + $0x58] sm:$0xff] }
  0x28   : > { %v477_v0 = vld [vmem:[%s987_s19 + $0x70] sm:$0xff]  ;;  %v478_v8 = vld [vmem:[%s987_s19 + $0x78] sm:$0xff] }
  0x2b   : > { %748 = vmatmul.msk.bf16.gmra.mxu0 %vm484_vm1, %v454_v20 }
  0x2e   : > { %750 = vmatmul.msk.bf16.gmra.mxu1 %vm484_vm1, %v456_v23 }
  0x31   : > { %752 = vmatmul.msk.bf16.gmra.mxu2 %vm484_vm1, %v458_v26 }
  0x34   : > { %754 = vmatmul.msk.bf16.gmra.mxu3 %vm484_vm1, %v460_v27 }
  0x98   : > { %v522_v29 = vpop.f32.mrf.mxu0 }
  0x99   : > { %v523_v31 = vadd.f32 %v522_v29, %v463_v28 }
  0x9b   : > { %v532_v32 = vpop.f32.mrf.mxu1  ;;  %563 = vst.msk [vmem:[%s994_s27] sm:$0xff] %vm562_vm2, %v523_v31 }
  0x9c   : > { %v533_v33 = vadd.f32 %v532_v32, %v467_v30 }
  0x9e   : > { %567 = vst.msk [vmem:[%s994_s27 + $0x20] sm:$0xff] %vm562_vm2, %v533_v33 }
  0xa0   : > { %v524_v36 = vpop.f32.mrf.mxu0 }
  0xa1   : > { %v525_v38 = vadd.f32 %v524_v36, %v464_v34 }
  0xa3   : > { %v534_v41 = vpop.f32.mrf.mxu1  ;;  %564 = vst.msk [vmem:[%s994_s27 + $0x8] sm:$0xff] %vm562_vm2, %v525_v38 }
  0xa4   : > { %v542_v39 = vpop.f32.mrf.mxu2  ;;  %v535_v43 = vadd.f32 %v534_v41, %v468_v37 }
  0xa5   : > { %v543_v42 = vadd.f32 %v542_v39, %v471_v35 }
  0xa6   : > { %568 = vst.msk [vmem:[%s994_s27 + $0x28] sm:$0xff] %vm562_vm2, %v535_v43 }
  0xa7   : > { %v552_v44 = vpop.f32.mrf.mxu3  ;;  %571 = vst.msk [vmem:[%s994_s27 + $0x40] sm:$0xff] %vm562_vm2, %v543_v42 }
  0xa8   : > { %v553_v45 = vadd.f32 %v552_v44, %v475_v40  ;;  %v527_v48 = vpop.f32.mrf.mxu0 }
  0xa9   : > { %v528_v50 = vadd.f32 %v527_v48, %v465_v46 }
  0xaa   : > { %575 = vst.msk [vmem:[%s994_s27 + $0x60] sm:$0xff] %vm562_vm2, %v553_v45 }
  0xab   : > { %v537_v53 = vpop.f32.mrf.mxu1  ;;  %565 = vst.msk [vmem:[%s994_s27 + $0x10] sm:$0xff] %vm562_vm2, %v528_v50 }
  0xac   : > { %v544_v51 = vpop.f32.mrf.mxu2  ;;  %v538_v55 = vadd.f32 %v537_v53, %v469_v49 }
  0xad   : > { %v545_v54 = vadd.f32 %v544_v51, %v472_v47 }
  0xae   : > { %569 = vst.msk [vmem:[%s994_s27 + $0x30] sm:$0xff] %vm562_vm2, %v538_v55 }
  0xaf   : > { %v554_v56 = vpop.f32.mrf.mxu3  ;;  %572 = vst.msk [vmem:[%s994_s27 + $0x48] sm:$0xff] %vm562_vm2, %v545_v54 }
  0xb0   : > { %v555_v57 = vadd.f32 %v554_v56, %v476_v52  ;;  %v529_v60 = vpop.f32.mrf.mxu0 }
  0xb1   : > { %v530_v62 = vadd.f32 %v529_v60, %v466_v58 }
  0xb2   : > { %576 = vst.msk [vmem:[%s994_s27 + $0x68] sm:$0xff] %vm562_vm2, %v555_v57 }
  0xb3   : > { %v539_v1 = vpop.f32.mrf.mxu1  ;;  %566 = vst.msk [vmem:[%s994_s27 + $0x18] sm:$0xff] %vm562_vm2, %v530_v62 }
  0xb4   : > { %v547_v63 = vpop.f32.mrf.mxu2  ;;  %v540_v3 = vadd.f32 %v539_v1, %v470_v61 }
  0xb5   : > { %v548_v2 = vadd.f32 %v547_v63, %v473_v59 }
  0xb6   : > { %570 = vst.msk [vmem:[%s994_s27 + $0x38] sm:$0xff] %vm562_vm2, %v540_v3 }
  0xb7   : > { %v557_v4 = vpop.f32.mrf.mxu3  ;;  %573 = vst.msk [vmem:[%s994_s27 + $0x50] sm:$0xff] %vm562_vm2, %v548_v2 }
  0xb8   : > { %v558_v5 = vadd.f32 %v557_v4, %v477_v0 }
  0xba   : > { %577 = vst.msk [vmem:[%s994_s27 + $0x70] sm:$0xff] %vm562_vm2, %v558_v5 }
  0xbc   : > { %v549_v7 = vpop.f32.mrf.mxu2 }
  0xbd   : > { %v550_v9 = vadd.f32 %v549_v7, %v474_v6 }
  0xbf   : > { %v559_v10 = vpop.f32.mrf.mxu3  ;;  %574 = vst.msk [vmem:[%s994_s27 + $0x58] sm:$0xff] %vm562_vm2, %v550_v9 }
  0xc0   : > { %v560_v11 = vadd.f32 %v559_v10, %v478_v8 }
  0xc2   : > { %578 = vst.msk [vmem:[%s994_s27 + $0x78] sm:$0xff] %vm562_vm2, %v560_v11 }
  0xc3 PF: > { %s15_s22 = sadd.s32 1, %s839_s22   ;;  %s1064_s18 = smov %s831_s20 }
  0xc4   : > { %p12_p7 = scmp.ge.s32.totalorder %s15_s22, 6   ;;  %s1065_s19 = smov %s835_s21 }
  0xc5   : > { %s1066_s20 = smov %s1069_s23  ;;  %s1067_s21 = smov %s1073_s24 }
  0xc6   :  { %14 = sbr.rel (!%p12_p7) target bundleno = 3 (0x3), region = 79 }

// kernel: ffc_block_forward.10
= control target key start
LH: loop header
LB: loop body
LE: loop exit
PB: predicated region body
PF: predicated region fallthrough
CT: control target
= control target key end

     0   :  { %s2994_s9 = smov 0   ;;  %s2996_s10 = smov 0   ;;  %s3840_s0 = inlined_call_operand.vmem [shape: bf16[2,18,18,32], index: 0, kind: input, shape index: {}]   ;;  %s3841_s1 = inlined_call_operand.vmem [shape: bf16[288,32], index: 1, kind: input, shape index: {}]   ;;  %s3842_s2 = inlined_call_operand.vmem [shape: f32[2,256,32], index: 2, kind: output, shape index: {}]  }
   0x1   :  { %s2998_s11 = smov 0   ;;  %s3000_s12 = smov 0  }
   0x2   :  { %s3002_s13 = smov 0  }
   0x3 LB: > { %s27_s14 = sadd.s32 1, %s2969_s11  ;;  %s31_s15 = sadd.s32 1, %s2973_s12  ;;  %s2977_s13 = sphi %s3002_s13, %s12_s13   ;;  %s2973_s12 = sphi %s3000_s12, %s3850_s12   ;;  %s2969_s11 = sphi %s2998_s11, %s3849_s11   ;;  %s2965_s10 = sphi %s2996_s10, %s3848_s10   ;;  %s2961_s9 = sphi %s2994_s9, %s3847_s9  }
   0x4   : > { %p29_p0 = scmp.ge.s32.totalorder %s27_s14, 2  ;;  %p2475_p1 = scmp.ge.s32.totalorder %s2977_s13, 1 }
   0x5   : > { %p144_p2 = scmp.lt.s32.totalorder %s2977_s13, 5 }
   0x6   : > { %s3852_s14 = smov (%p29_p0, %s27_s14), 0  ;;  %s3854_s15 = smov (!%p29_p0, %s31_s15), %s2973_s12 }
   0x7   : > { %p145_p3 = pnand %p2475_p1, %p144_p2  ;;  %p33_p4 = scmp.ge.s32.totalorder %s3854_s15, 2 }
   0x8   : > { %p177_p5 = scmp.lt.s32.totalorder (!%p145_p3), %s2965_s10, 1  ;;  %s2849_s20 = smul.u32 (!%p145_p3), 96, %s2961_s9 }
   0x9   : > { %s3856_s15 = smov (%p33_p4, %s3854_s15), 0  ;;  %148 = sbr.rel (%p145_p3) target bundleno = 462 (0x1ce), region = 28 }
   0xe   : > { %v2861_v0 = vld [vmem:[%s3841_s1 + $0x18] sm:$0xff]  ;;  %v2860_v1 = vld [vmem:[%s3841_s1 + $0x10] sm:$0xff]  ;;  %s3858_s10 = smov (!%p177_p5, %s2965_s10), 1  ;;  %v2863_v2 = vld [vmem:[%s3841_s1 + $0x28] sm:$0xff]  ;;  %vm232_vm0 = vsmask.f32 3328 }
   0xf   : > { %2892 = vmatpush.bf16.msra.mxu1 %v2861_v0  ;;  %2893 = vmatpush.bf16.msra.mxu2 %v2861_v0  ;;  %s2898_s21 = smul.u32 216, %s3858_s10  ;;  %v2873_v3 = vld [vmem:[%s3841_s1 + $0x38] sm:$0xff]  ;;  %v2859_v4 = vld [vmem:[%s3841_s1 + $0x8] sm:$0xff]  ;;  %vm233_vm1 = vsmask.f32 7440  ;;  %vm467_vm2 = vcmask 261120  }
  0x10   : > { %2894 = vmatpush.bf16.msra.mxu3 %v2861_v0  ;;  %498 = vmatpush.bf16.msra.mxu0 %v2861_v0  ;;  %v2875_v5 = vld [vmem:[%s3841_s1 + $0x48] sm:$0xff]  ;;  %vm3079_vm3 = vmor %vm232_vm0, %vm233_vm1  ;;  %v2862_v55 = vld [vmem:[%s3841_s1 + $0x20] sm:$0xff]  ;;  %vm690_vm4 = vcmask 1042432   ;;  %vm691_vm5 = vcmask 1046532   ;;  %s2478_s17 = sshll.u32 %s3858_s10, 5 }
  0x11   : > { %s181_s4 = scalar_lea.vmem %s3840_s0, %s2898_s21  ;;  %vm3205_vm6 = vmor %vm690_vm4, %vm691_vm5 }
  0x12   : > { %s3051_s5 = scalar_lea.vmem %s181_s4, %s2849_s20 }
  0x13   : > { %2895 = vmatpush.bf16.msra.mxu1 %v2860_v1  ;;  %2896 = vmatpush.bf16.msra.mxu2 %v2860_v1  ;;  %v208_v6 = vld [vmem:[%s3051_s5 + $0x18] sm:$0xf]  ;;  %v3055_v7 = vld [vmem:[%s3051_s5 + $0x1c] sm:$0xf]  ;;  %v3058_v8 = vld [vmem:[%s3051_s5 + $0x20] sm:$0x1] }
  0x14   : > { %2897 = vmatpush.bf16.msra.mxu3 %v2860_v1  ;;  %499 = vmatpush.bf16.msra.mxu0 %v2860_v1  ;;  %v284_v9 = vshrl.u32 %v208_v6, 16  ;;  %v287_v10 = vshll.u32 %v208_v6, 16  ;;  %v293_v11 = vshll.u32 %v3055_v7, 16  ;;  %v297_v12 = vshrl.u32 %v3055_v7, 16  ;;  %v212_v13 = vld [vmem:[%s3051_s5 + $0x30] sm:$0xf] }
  0x15   : > { %v303_v14 = vshll.u32 %v3058_v8, 16  ;;  %v3065_v15 = vld [vmem:[%s3051_s5 + $0x34] sm:$0xf]  ;;  %v3068_v16 = vld [vmem:[%s3051_s5 + $0x38] sm:$0x1]  ;;  %v332_v17 = vshrl.u32 %v212_v13, 16 }
  0x16   : > { %v286_v18 = vrot.slane %v284_v9, 4  ;;  %v289_v19 = vrot.slane %v287_v10, 5  ;;  %v295_v20 = vrot.slane %v293_v11, 5  ;;  %v299_v21 = vrot.slane %v297_v12, 4  ;;  %v216_v22 = vld [vmem:[%s3051_s5 + $0x48] sm:$0xf] }
  0x17   : > { %819 = vmatpush.bf16.msrb.mxu2 %v2863_v2  ;;  %623 = vmatpush.bf16.msrb.mxu1 %v2859_v4  ;;  %v305_v23 = vrot.slane %v303_v14, 5  ;;  %v334_v24 = vrot.slane %v332_v17, 4  ;;  %v335_v25 = vshll.u32 %v212_v13, 16  ;;  %v341_v26 = vshll.u32 %v3065_v15, 16  ;;  %v3075_v31 = vld [vmem:[%s3051_s5 + $0x4c] sm:$0xf] }
  0x18   : > { %984 = vmatpush.bf16.msrb.mxu3 %v2873_v3  ;;  %1329 = vmatpush.bf16.msrb.mxu0 %v2875_v5  ;;  %v290_v27 = vor.u32 %v289_v19, %v286_v18  ;;  %v300_v28 = vor.u32 %v299_v21, %v295_v20  ;;  %v345_v29 = vshrl.u32 %v3065_v15, 16  ;;  %v351_v30 = vshll.u32 %v3068_v16, 16  ;;  %v3084_v42 = vld [vmem:[%s3051_s5 + $0x50] sm:$0x1]  ;;  %v204_v50 = vld [vmem:[%s3051_s5] sm:$0xf] }
  0x19   : > { %v337_v33 = vrot.slane %v335_v25, 5  ;;  %v343_v34 = vrot.slane %v341_v26, 5  ;;  %v380_v35 = vshrl.u32 %v216_v22, 16  ;;  %v383_v36 = vshll.u32 %v216_v22, 16  ;;  %v3100_v63 = vld [vmem:[%s3051_s5 + $0x4] sm:$0xf] }
  0x1a   : > { %v291_v37 = vrot.slane %v290_v27, 4  ;;  %v301_v38 = vrot.slane %v300_v28, 4  ;;  %v347_v39 = vrot.slane %v345_v29, 4  ;;  %v353_v40 = vrot.slane %v351_v30, 5  ;;  %v3105_v5 = vld [vmem:[%s3051_s5 + $0x8] sm:$0x1] }
  0x1b   : > { %v338_v41 = vor.u32 %v337_v33, %v334_v24  ;;  %v382_v43 = vrot.slane %v380_v35, 4  ;;  %v385_v44 = vrot.slane %v383_v36, 5  ;;  %v389_v45 = vshll.u32 %v3075_v31, 16  ;;  %820 = vmatpush.bf16.msrb.mxu2 %v2862_v55  ;;  %v210_v12 = vld [vmem:[%s3051_s5 + $0x24] sm:$0xf]  ;;  %v2872_v19 = vld [vmem:[%s3841_s1 + $0x30] sm:$0xff] }
  0x1c   : > { %v296_v46 = vsel %vm3079_vm3, %v291_v37, %v295_v20  ;;  %v306_v47 = vsel %vm3079_vm3, %v301_v38, %v305_v23  ;;  %v348_v48 = vor.u32 %v347_v39, %v343_v34  ;;  %v393_v49 = vshrl.u32 %v3075_v31, 16  ;;  %v2858_v20 = vld [vmem:[%s3841_s1] sm:$0xff]  ;;  %v3125_v26 = vld [vmem:[%s3051_s5 + $0x28] sm:$0xf]  ;;  %v3130_v30 = vld [vmem:[%s3051_s5 + $0x2c] sm:$0x1]  ;;  %985 = vmatpush.bf16.msrb.mxu3 %v2872_v19 }
  0x1d   : > { %v435_v51 = vunpack.c.l.b16 %v296_v46  ;;  %v436_v52 = vunpack.c.l.b16 %v306_v47  ;;  %v339_v53 = vrot.slane %v338_v41, 4  ;;  %v386_v54 = vor.u32 %v385_v44, %v382_v43  ;;  %v2874_v21 = vld [vmem:[%s3841_s1 + $0x40] sm:$0xff]  ;;  %624 = vmatpush.bf16.msrb.mxu1 %v2858_v20  ;;  %v214_v38 = vld [vmem:[%s3051_s5 + $0x3c] sm:$0xf]  ;;  %v2887_v19 = vld [vmem:[%s3841_s1 + $0x68] sm:$0xff] }
  0x1e   : > { %v349_v56 = vrot.slane %v348_v48, 4  ;;  %v391_v57 = vrot.slane %v389_v45, 5  ;;  %v395_v58 = vrot.slane %v393_v49, 4  ;;  %v399_v59 = vshll.u32 %v3084_v42, 16  ;;  %1330 = vmatpush.bf16.msrb.mxu0 %v2874_v21 }
  0x1f   : > { %v449_v60 = vpack.c.b16 %v436_v52, %v435_v51  ;;  %v344_v61 = vsel %vm3079_vm3, %v339_v53, %v343_v34  ;;  %v387_v62 = vrot.slane %v386_v54, 4  ;;  %v236_v0 = vshrl.u32 %v204_v50, 16  ;;  %v3138_v51 = vld [vmem:[%s3051_s5 + $0x40] sm:$0xf] }
  0x20   : > { %v354_v1 = vsel %vm3079_vm3, %v349_v56, %v353_v40  ;;  %v439_v2 = vunpack.c.l.b16 %v344_v61  ;;  %v396_v3 = vor.u32 %v395_v58, %v391_v57  ;;  %v401_v4 = vrot.slane %v399_v59, 5  ;;  %v3144_v56 = vld [vmem:[%s3051_s5 + $0x44] sm:$0x1]  ;;  %v218_v58 = vld [vmem:[%s3051_s5 + $0x54] sm:$0xf] }
  0x21   : > { %2493 = vmatmul.msk.bf16.vlgmr.msra.gmra.mxu1 %vm467_vm2, %v449_v60  ;;  %v440_v6 = vunpack.c.l.b16 %v354_v1  ;;  %v392_v9 = vsel %vm3079_vm3, %v387_v62, %v391_v57  ;;  %v238_v10 = vrot.slane %v236_v0, 4  ;;  %v239_v11 = vshll.u32 %v204_v50, 16 }
  0x22   : > { %v397_v13 = vrot.slane %v396_v3, 4  ;;  %v443_v14 = vunpack.c.l.b16 %v392_v9  ;;  %v245_v17 = vshll.u32 %v3100_v63, 16  ;;  %v249_v18 = vshrl.u32 %v3100_v63, 16 }
  0x23   : > { %v451_v22 = vpack.c.b16 %v440_v6, %v439_v2  ;;  %v241_v23 = vrot.slane %v239_v11, 5  ;;  %v255_v24 = vshll.u32 %v3105_v5, 16  ;;  %v698_v25 = vrot.slane %v3105_v5, 5  ;;  %v2640_v5 = vld [vmem:[%s3051_s5 + $0x18] sm:$0xf] }
  0x24   : > { %v402_v27 = vsel %vm3079_vm3, %v397_v13, %v401_v4  ;;  %v247_v28 = vrot.slane %v245_v17, 5  ;;  %v251_v29 = vrot.slane %v249_v18, 4  ;;  %v308_v33 = vshrl.u32 %v210_v12, 16  ;;  %v3155_v17 = vld [vmem:[%s3051_s5 + $0x58] sm:$0xf] }
  0x25   : > { %2495 = vmatmul.msk.bf16.vlgmr.msra.gmra.mxu2 %vm467_vm2, %v451_v22  ;;  %v444_v34 = vunpack.c.l.b16 %v402_v27  ;;  %v242_v35 = vor.u32 %v241_v23, %v238_v10  ;;  %v257_v36 = vrot.slane %v255_v24, 5  ;;  %v311_v37 = vshll.u32 %v210_v12, 16  ;;  %v3158_v18 = vld [vmem:[%s3051_s5 + $0x5c] sm:$0x1]  ;;  %v206_v24 = vld [vmem:[%s3051_s5 + $0xc] sm:$0xf] }
  0x26   : > { %v252_v39 = vor.u32 %v251_v29, %v247_v28  ;;  %v310_v40 = vrot.slane %v308_v33, 4  ;;  %v317_v41 = vshll.u32 %v3125_v26, 16  ;;  %v321_v43 = vshrl.u32 %v3125_v26, 16  ;;  %1711 = vmatpush.bf16.msra.mxu2 %v2887_v19  ;;  %v3198_v19 = vld [vmem:[%s3051_s5 + $0x10] sm:$0xf] }
  0x27   : > { %v453_v44 = vpack.c.b16 %v444_v34, %v443_v14  ;;  %v243_v45 = vrot.slane %v242_v35, 4  ;;  %v313_v46 = vrot.slane %v311_v37, 5  ;;  %v327_v47 = vshll.u32 %v3130_v30, 16 }
  0x28   : > { %v253_v48 = vrot.slane %v252_v39, 4  ;;  %v319_v49 = vrot.slane %v317_v41, 5  ;;  %v323_v50 = vrot.slane %v321_v43, 4  ;;  %v356_v52 = vshrl.u32 %v214_v38, 16 }
  0x29   : > { %2497 = vmatmul.msk.bf16.vlgmr.msra.gmra.mxu3 %vm467_vm2, %v453_v44  ;;  %v248_v53 = vsel %vm3079_vm3, %v243_v45, %v247_v28  ;;  %v314_v54 = vor.u32 %v313_v46, %v310_v40  ;;  %v329_v55 = vrot.slane %v327_v47, 5  ;;  %v359_v57 = vshll.u32 %v214_v38, 16  ;;  %v3171_v38 = vld [vmem:[%s3051_s5 + $0x10] sm:$0xf]  ;;  %v2889_v44 = vld [vmem:[%s3841_s1 + $0x78] sm:$0xff]  ;;  %v2891_v46 = vld [vmem:[%s3841_s1 + $0x88] sm:$0xff] }
  0x2a   : > { %v258_v59 = vsel %vm3079_vm3, %v253_v48, %v257_v36  ;;  %v431_v60 = vunpack.c.l.b16 %v248_v53  ;;  %v324_v61 = vor.u32 %v323_v50, %v319_v49  ;;  %v358_v62 = vrot.slane %v356_v52, 4  ;;  %v2877_v45 = vld [vmem:[%s3841_s1 + $0x58] sm:$0xff]  ;;  %v3185_v52 = vld [vmem:[%s3051_s5 + $0x14] sm:$0x1]  ;;  %2056 = vmatpush.bf16.msra.mxu3 %v2889_v44 }
  0x2b   : > { %v432_v0 = vunpack.c.l.b16 %v258_v59  ;;  %v315_v1 = vrot.slane %v314_v54, 4  ;;  %v361_v2 = vrot.slane %v359_v57, 5  ;;  %v365_v3 = vshll.u32 %v3138_v51, 16  ;;  %1546 = vmatpush.bf16.msra.mxu1 %v2877_v45 }
  0x2c   : > { %v325_v4 = vrot.slane %v324_v61, 4  ;;  %v369_v6 = vshrl.u32 %v3138_v51, 16  ;;  %v375_v9 = vshll.u32 %v3144_v56, 16  ;;  %v404_v10 = vshrl.u32 %v218_v58, 16 }
  0x2d   : > { %v447_v11 = vpack.c.b16 %v432_v0, %v431_v60  ;;  %v320_v12 = vsel %vm3079_vm3, %v315_v1, %v319_v49  ;;  %v362_v13 = vor.u32 %v361_v2, %v358_v62  ;;  %v367_v14 = vrot.slane %v365_v3, 5 }
  0x2e   : > { %v330_v20 = vsel %vm3079_vm3, %v325_v4, %v329_v55  ;;  %v437_v21 = vunpack.c.l.b16 %v320_v12  ;;  %v371_v22 = vrot.slane %v369_v6, 4  ;;  %v377_v23 = vrot.slane %v375_v9, 5  ;;  %v666_v9 = vld [vmem:[%s3051_s5] sm:$0xe] }
  0x2f   : > { %2491 = vmatmul.msk.bf16.vlgmr.msra.gmra.mxu0 %vm467_vm2, %v447_v11  ;;  %v438_v27 = vunpack.c.l.b16 %v330_v20  ;;  %v363_v28 = vrot.slane %v362_v13, 4  ;;  %v406_v29 = vrot.slane %v404_v10, 4  ;;  %v407_v33 = vshll.u32 %v218_v58, 16 }
  0x30   : > { %v372_v34 = vor.u32 %v371_v22, %v367_v14  ;;  %v413_v35 = vshll.u32 %v3155_v17, 16  ;;  %v417_v36 = vshrl.u32 %v3155_v17, 16  ;;  %v423_v37 = vshll.u32 %v3158_v18, 16  ;;  %2273 = vmatpush.bf16.msra.mxu0 %v2891_v46 }
  0x31   : > { %v450_v39 = vpack.c.b16 %v438_v27, %v437_v21  ;;  %v368_v40 = vsel %vm3079_vm3, %v363_v28, %v367_v14  ;;  %v409_v41 = vrot.slane %v407_v33, 5  ;;  %v260_v43 = vshrl.u32 %v206_v24, 16  ;;  %v2637_v14 = vld [vmem:[%s3051_s5 + $0xc] sm:$0xf] }
  0x32   : > { %v373_v47 = vrot.slane %v372_v34, 4  ;;  %v441_v48 = vunpack.c.l.b16 %v368_v40  ;;  %v415_v49 = vrot.slane %v413_v35, 5  ;;  %v419_v50 = vrot.slane %v417_v36, 4 }
  0x33   : > { %2494 = vmatmul.msk.bf16.gmra.mxu1 %vm467_vm2, %v450_v39  ;;  %v410_v53 = vor.u32 %v409_v41, %v406_v29  ;;  %v425_v54 = vrot.slane %v423_v37, 5  ;;  %v262_v55 = vrot.slane %v260_v43, 4  ;;  %v263_v57 = vshll.u32 %v206_v24, 16  ;;  %v3213_v41 = vld [vmem:[%s3051_s5 + $0x14] sm:$0x1] }
  0x34   : > { %v378_v58 = vsel %vm3079_vm3, %v373_v47, %v377_v23  ;;  %v420_v59 = vor.u32 %v419_v50, %v415_v49  ;;  %v269_v60 = vshll.u32 %v3171_v38, 16  ;;  %v273_v61 = vshrl.u32 %v3171_v38, 16 }
  0x35   : > { %v442_v62 = vunpack.c.l.b16 %v378_v58  ;;  %v411_v0 = vrot.slane %v410_v53, 4  ;;  %v265_v1 = vrot.slane %v263_v57, 5  ;;  %v279_v2 = vshll.u32 %v3185_v52, 16 }
  0x36   : > { %v421_v3 = vrot.slane %v420_v59, 4  ;;  %v271_v4 = vrot.slane %v269_v60, 5  ;;  %v275_v6 = vrot.slane %v273_v61, 4  ;;  %v2547_v27 = vrot.slane %v666_v9, 9 }
  0x37   : > { %v452_v10 = vpack.c.b16 %v442_v62, %v441_v48  ;;  %v416_v11 = vsel %vm3079_vm3, %v411_v0, %v415_v49  ;;  %v266_v12 = vor.u32 %v265_v1, %v262_v55  ;;  %v281_v13 = vrot.slane %v279_v2, 5  ;;  %v2850_v55 = vld [vmem:[%s3051_s5] sm:$0xff]  ;;  %v668_v1 = vld [vmem:[%s3051_s5 + $0x18] sm:$0xe] }
  0x38   : > { %v426_v20 = vsel %vm3079_vm3, %v421_v3, %v425_v54  ;;  %v445_v21 = vunpack.c.l.b16 %v416_v11  ;;  %v276_v22 = vor.u32 %v275_v6, %v271_v4  ;;  %v695_v28 = vrot.slane %v3100_v63, 5  ;;  %v667_v3 = vld [vmem:[%s3051_s5 + $0xc] sm:$0xe] }
  0x39   : > { %2496 = vmatmul.msk.bf16.gmra.mxu2 %vm467_vm2, %v452_v10  ;;  %v446_v23 = vunpack.c.l.b16 %v426_v20  ;;  %v267_v24 = vrot.slane %v266_v12, 4  ;;  %v1068_v34 = vshrl.u32 %v2637_v14, 16  ;;  %v1071_v35 = vshll.u32 %v2637_v14, 16 }
  0x3a   : > { %v277_v29 = vrot.slane %v276_v22, 4  ;;  %v1077_v36 = vshll.u32 %v3198_v19, 16  ;;  %v697_v40 = vrot.slane %v695_v28, 4  ;;  %v696_v46 = vsel %vm3205_vm6, %v2547_v27, %v695_v28 }
  0x3b   : > { %v454_v37 = vpack.c.b16 %v446_v23, %v445_v21  ;;  %v272_v39 = vsel %vm3079_vm3, %v267_v24, %v271_v4  ;;  %v1070_v44 = vrot.slane %v1068_v34, 4  ;;  %v1073_v47 = vrot.slane %v1071_v35, 5  ;;  %v2864_v34 = vld [vmem:[%s3051_s5 + $0xc] sm:$0xff] }
  0x3c   : > { %v282_v63 = vsel %vm3079_vm3, %v277_v29, %v281_v13  ;;  %v433_v43 = vunpack.c.l.b16 %v272_v39  ;;  %v699_v48 = vsel %vm3205_vm6, %v697_v40, %v698_v25  ;;  %v1079_v49 = vrot.slane %v1077_v36, 5  ;;  %v3230_v25 = vld [vmem:[%s3051_s5 + $0x1c] sm:$0xf] }
  0x3d   : > { %2498 = vmatmul.msk.bf16.gmra.mxu3 %vm467_vm2, %v454_v37  ;;  %v434_v45 = vunpack.c.l.b16 %v282_v63  ;;  %v1081_v50 = vshrl.u32 %v3198_v19, 16  ;;  %v1087_v53 = vshll.u32 %v3213_v41, 16  ;;  %v1074_v57 = vor.u32 %v1073_v47, %v1070_v44 }
  0x3e   : > { %v753_v59 = vunpack.c.l.b16 %v696_v46  ;;  %v754_v60 = vunpack.c.l.b16 %v699_v48  ;;  %v702_v4 = vrot.slane %v3171_v38, 5  ;;  %v1092_v6 = vshrl.u32 %v2640_v5, 16 }
  0x3f   : > { %v448_v54 = vpack.c.b16 %v434_v45, %v433_v43  ;;  %v1083_v58 = vrot.slane %v1081_v50, 4  ;;  %v1075_v61 = vrot.slane %v1074_v57, 4  ;;  %v1089_v0 = vrot.slane %v1087_v53, 5  ;;  %v2851_v50 = vld [vmem:[%s3051_s5 + $0xc] sm:$0xff] }
  0x40   : > { %v769_v9 = vpack.c.b16 %v754_v60, %v753_v59  ;;  %v1095_v10 = vshll.u32 %v2640_v5, 16  ;;  %v1101_v11 = vshll.u32 %v3230_v25, 16  ;;  %v2549_v12 = vrot.slane %v668_v1, 9  ;;  %v2643_v59 = vld [vmem:[%s3051_s5 + $0x24] sm:$0xf] }
  0x41   : > { %2492 = vmatmul.msk.bf16.gmra.mxu0 %vm467_vm2, %v448_v54  ;;  %v1084_v62 = vor.u32 %v1083_v58, %v1079_v49  ;;  %v1080_v13 = vsel %vm3079_vm3, %v1075_v61, %v1079_v49  ;;  %v1105_v20 = vshrl.u32 %v3230_v25, 16  ;;  %v709_v21 = vrot.slane %v3055_v7, 5  ;;  %v3265_v60 = vld [vmem:[%s3051_s5 + $0x28] sm:$0xf]  ;;  %v669_v5 = vld [vmem:[%s3051_s5 + $0x24] sm:$0xe] }
  0x42   : > { %v2548_v22 = vrot.slane %v667_v3, 9  ;;  %v705_v38 = vrot.slane %v3185_v52, 5  ;;  %v712_v23 = vrot.slane %v3058_v8, 5  ;;  %v704_v24 = vrot.slane %v702_v4, 4  ;;  %v3252_v8 = vld [vmem:[%s3051_s5 + $0x20] sm:$0x1] }
  0x43   : > { %2539 = vmatmul.msk.bf16.vlgmr.msrb.gmra.mxu1 %vm467_vm2, %v2850_v55  ;;  %v1085_v2 = vrot.slane %v1084_v62, 4  ;;  %v1094_v27 = vrot.slane %v1092_v6, 4  ;;  %v710_v28 = vsel %vm3205_vm6, %v2549_v12, %v709_v21  ;;  %v711_v29 = vrot.slane %v709_v21, 4 }
  0x44   : > { %v1263_v35 = vunpack.c.l.b16 %v1080_v13  ;;  %v1097_v37 = vrot.slane %v1095_v10, 5  ;;  %v757_v7 = vunpack.c.l.b16 %v710_v28  ;;  %v1103_v39 = vrot.slane %v1101_v11, 5  ;;  %v3283_v28 = vld [vmem:[%s3051_s5 + $0x2c] sm:$0x1] }
  0x45   : > { %v1090_v14 = vsel %vm3079_vm3, %v1085_v2, %v1089_v0  ;;  %v1107_v40 = vrot.slane %v1105_v20, 4  ;;  %v713_v52 = vsel %vm3205_vm6, %v711_v29, %v712_v23  ;;  %v703_v43 = vsel %vm3205_vm6, %v2548_v22, %v702_v4 }
  0x46   : > { %v1264_v36 = vunpack.c.l.b16 %v1090_v14  ;;  %v758_v63 = vunpack.c.l.b16 %v713_v52  ;;  %v706_v45 = vsel %vm3205_vm6, %v704_v24, %v705_v38  ;;  %v1098_v46 = vor.u32 %v1097_v37, %v1094_v27  ;;  %v2865_v14 = vld [vmem:[%s3051_s5 + $0x18] sm:$0xff] }
  0x47   : > { %v1108_v48 = vor.u32 %v1107_v40, %v1103_v39  ;;  %v1111_v49 = vshll.u32 %v3252_v8, 16  ;;  %v755_v53 = vunpack.c.l.b16 %v703_v43  ;;  %v756_v54 = vunpack.c.l.b16 %v706_v45  ;;  %v2852_v37 = vld [vmem:[%s3051_s5 + $0x18] sm:$0xff] }
  0x48   : > { %v1279_v44 = vpack.c.b16 %v1264_v36, %v1263_v35  ;;  %v771_v47 = vpack.c.b16 %v758_v63, %v757_v7  ;;  %v1099_v55 = vrot.slane %v1098_v46, 4  ;;  %v716_v61 = vrot.slane %v3125_v26, 5  ;;  %v2646_v7 = vld [vmem:[%s3051_s5 + $0x30] sm:$0xf] }
  0x49   : > { %2563 = vmatmul.msk.bf16.vlgmr.msrb.gmra.mxu2 %vm467_vm2, %v769_v9  ;;  %v1109_v57 = vrot.slane %v1108_v48, 4  ;;  %v1113_v58 = vrot.slane %v1111_v49, 5  ;;  %v719_v62 = vrot.slane %v3130_v30, 5  ;;  %v770_v0 = vpack.c.b16 %v756_v54, %v755_v53 }
  0x4a   : > { %v2550_v1 = vrot.slane %v669_v5, 9  ;;  %v1104_v2 = vsel %vm3079_vm3, %v1099_v55, %v1103_v39  ;;  %v1116_v3 = vshrl.u32 %v2643_v59, 16  ;;  %v1119_v4 = vshll.u32 %v2643_v59, 16  ;;  %v3291_v39 = vld [vmem:[%s3051_s5 + $0x34] sm:$0xf] }
  0x4b   : > { %v718_v6 = vrot.slane %v716_v61, 4  ;;  %v1114_v9 = vsel %vm3079_vm3, %v1109_v57, %v1113_v58  ;;  %v1125_v10 = vshll.u32 %v3265_v60, 16  ;;  %v1129_v11 = vshrl.u32 %v3265_v60, 16  ;;  %v2866_v57 = vld [vmem:[%s3051_s5 + $0x24] sm:$0xff]  ;;  %v3303_v5 = vld [vmem:[%s3051_s5 + $0x38] sm:$0x1] }
  0x4c   : > { %v717_v26 = vsel %vm3205_vm6, %v2550_v1, %v716_v61  ;;  %v1265_v20 = vunpack.c.l.b16 %v1104_v2  ;;  %v1266_v21 = vunpack.c.l.b16 %v1114_v9  ;;  %v1118_v22 = vrot.slane %v1116_v3, 4  ;;  %v2886_v2 = vld [vmem:[%s3841_s1 + $0x60] sm:$0xff]  ;;  %v2888_v9 = vld [vmem:[%s3841_s1 + $0x70] sm:$0xff] }
  0x4d   : > { %2629 = vmatmul.msk.bf16.vlgmr.msrb.gmra.mxu3 %vm467_vm2, %v2864_v34  ;;  %v720_v30 = vsel %vm3205_vm6, %v718_v6, %v719_v62  ;;  %v759_v12 = vunpack.c.l.b16 %v717_v26  ;;  %v1121_v38 = vrot.slane %v1119_v4, 5  ;;  %v1127_v23 = vrot.slane %v1125_v10, 5  ;;  %v2853_v3 = vld [vmem:[%s3051_s5 + $0x24] sm:$0xff]  ;;  %1712 = vmatpush.bf16.msra.mxu2 %v2886_v2  ;;  %v2876_v10 = vld [vmem:[%s3841_s1 + $0x50] sm:$0xff]  ;;  %v2649_v26 = vld [vmem:[%s3051_s5 + $0x3c] sm:$0xf] }
  0x4e   : > { %v760_v13 = vunpack.c.l.b16 %v720_v30  ;;  %v1131_v24 = vrot.slane %v1129_v11, 4  ;;  %v1280_v29 = vpack.c.b16 %v1266_v21, %v1265_v20  ;;  %v1135_v36 = vshll.u32 %v3283_v28, 16  ;;  %v2890_v11 = vld [vmem:[%s3841_s1 + $0x80] sm:$0xff]  ;;  %2057 = vmatpush.bf16.msra.mxu3 %v2888_v9  ;;  %1547 = vmatpush.bf16.msra.mxu1 %v2876_v10 }
  0x4f   : > { %v1122_v34 = vor.u32 %v1121_v38, %v1118_v22  ;;  %v1140_v43 = vshrl.u32 %v2646_v7, 16  ;;  %v1149_v45 = vshll.u32 %v3291_v39, 16  ;;  %v1153_v46 = vshrl.u32 %v3291_v39, 16  ;;  %v3323_v30 = vld [vmem:[%s3051_s5 + $0x40] sm:$0xf]  ;;  %2274 = vmatpush.bf16.msra.mxu0 %v2890_v11 }
  0x50   : > { %v772_v27 = vpack.c.b16 %v760_v13, %v759_v12  ;;  %v1132_v35 = vor.u32 %v1131_v24, %v1127_v23  ;;  %v1137_v63 = vrot.slane %v1135_v36, 5  ;;  %v1164_v20 = vshrl.u32 %v2649_v26, 16  ;;  %v2868_v9 = vld [vmem:[%s3051_s5 + $0x3c] sm:$0xff] }
  0x51   : > { %2669 = vmatmul.msk.bf16.vlgmr.msrb.gmra.mxu0 %vm467_vm2, %v1279_v44  ;;  %v1123_v40 = vrot.slane %v1122_v34, 4  ;;  %v1143_v44 = vshll.u32 %v2646_v7, 16  ;;  %v1151_v54 = vrot.slane %v1149_v45, 5  ;;  %v1155_v55 = vrot.slane %v1153_v46, 4 }
  0x52   : > { %v1133_v52 = vrot.slane %v1132_v35, 4  ;;  %v1167_v21 = vshll.u32 %v2649_v26, 16  ;;  %v1173_v22 = vshll.u32 %v3323_v30, 16  ;;  %v1177_v38 = vshrl.u32 %v3323_v30, 16  ;;  %v2867_v35 = vld [vmem:[%s3051_s5 + $0x30] sm:$0xff] }
  0x53   : > { %2540 = vmatmul.msk.bf16.gmra.mxu1 %vm467_vm2, %v2851_v50  ;;  %v1128_v48 = vsel %vm3079_vm3, %v1123_v40, %v1127_v23  ;;  %v1142_v50 = vrot.slane %v1140_v43, 4  ;;  %v1145_v53 = vrot.slane %v1143_v44, 5  ;;  %v1156_v62 = vor.u32 %v1155_v55, %v1151_v54  ;;  %v3338_v43 = vld [vmem:[%s3051_s5 + $0x44] sm:$0x1] }
  0x54   : > { %v1138_v49 = vsel %vm3079_vm3, %v1133_v52, %v1137_v63  ;;  %v1267_v58 = vunpack.c.l.b16 %v1128_v48  ;;  %v723_v23 = vrot.slane %v3065_v15, 5  ;;  %v1166_v36 = vrot.slane %v1164_v20, 4 }
  0x55   : > { %v1268_v59 = vunpack.c.l.b16 %v1138_v49  ;;  %v1146_v61 = vor.u32 %v1145_v53, %v1142_v50  ;;  %v1157_v4 = vrot.slane %v1156_v62, 4  ;;  %v1175_v7 = vrot.slane %v1173_v22, 5  ;;  %v2854_v49 = vld [vmem:[%s3051_s5 + $0x30] sm:$0xff] }
  0x56   : > { %v1179_v40 = vrot.slane %v1177_v38, 4  ;;  %v725_v52 = vrot.slane %v723_v23, 4  ;;  %v726_v63 = vrot.slane %v3068_v16, 5  ;;  %v1183_v46 = vshll.u32 %v3338_v43, 16 }
  0x57   : > { %v1281_v1 = vpack.c.b16 %v1268_v59, %v1267_v58  ;;  %v3351_v58 = vld [vmem:[%s3051_s5 + $0x4c] sm:$0xf] }
  0x58   : > { %v1180_v45 = vor.u32 %v1179_v40, %v1175_v7  ;;  %v727_v48 = vsel %vm3205_vm6, %v725_v52, %v726_v63  ;;  %v1185_v55 = vrot.slane %v1183_v46, 5  ;;  %v3377_v63 = vld [vmem:[%s3051_s5 + $0x58] sm:$0xf] }
  0x59   : > { %2564 = vmatmul.msk.bf16.gmra.mxu2 %vm467_vm2, %v770_v0  ;;  %v1159_v0 = vshll.u32 %v3303_v5, 16  ;;  %v762_v50 = vunpack.c.l.b16 %v727_v48 }
  0x5b   : > { %v1161_v6 = vrot.slane %v1159_v0, 5  ;;  %v730_v0 = vrot.slane %v3138_v51, 5 }
  0x5d   : > { %2630 = vmatmul.msk.bf16.gmra.mxu3 %vm467_vm2, %v2865_v14  ;;  %v1162_v13 = vsel %vm3079_vm3, %v1157_v4, %v1161_v6  ;;  %v670_v14 = vld [vmem:[%s3051_s5 + $0x30] sm:$0xe]  ;;  %v1201_v4 = vshrl.u32 %v3351_v58, 16  ;;  %v732_v26 = vrot.slane %v730_v0, 4 }
  0x5e   : > { %v2551_v34 = vrot.slane %v670_v14, 9 }
  0x5f   : > { %v1203_v20 = vrot.slane %v1201_v4, 4 }
  0x60   : > { %v724_v15 = vsel %vm3205_vm6, %v2551_v34, %v723_v23  ;;  %v2855_v34 = vld [vmem:[%s3051_s5 + $0x3c] sm:$0xff] }
  0x61   : > { %2670 = vmatmul.msk.bf16.gmra.mxu0 %vm467_vm2, %v1280_v29  ;;  %v1270_v29 = vunpack.c.l.b16 %v1162_v13  ;;  %v761_v16 = vunpack.c.l.b16 %v724_v15 }
  0x63   : > { %2541 = vmatmul.msk.bf16.gmra.mxu1 %vm467_vm2, %v2852_v37  ;;  %v1169_v37 = vrot.slane %v1167_v21, 5  ;;  %v773_v59 = vpack.c.b16 %v762_v50, %v761_v16  ;;  %v3365_v21 = vld [vmem:[%s3051_s5 + $0x50] sm:$0x1]  ;;  %v1225_v16 = vshrl.u32 %v3377_v63, 16  ;;  %v672_v50 = vld [vmem:[%s3051_s5 + $0x48] sm:$0xe] }
  0x69   : > { %2565 = vmatmul.msk.bf16.gmra.mxu2 %vm467_vm2, %v771_v47  ;;  %v1147_v47 = vrot.slane %v1146_v61, 4 }
  0x6b   : > { %v1152_v12 = vsel %vm3079_vm3, %v1147_v47, %v1151_v54  ;;  %v1181_v54 = vrot.slane %v1180_v45, 4  ;;  %v1197_v47 = vshll.u32 %v3351_v58, 16  ;;  %v1221_v45 = vshll.u32 %v3377_v63, 16 }
  0x6c   : > { %v1269_v24 = vunpack.c.l.b16 %v1152_v12  ;;  %v733_v12 = vrot.slane %v3144_v56, 5  ;;  %v1207_v56 = vshll.u32 %v3365_v21, 16 }
  0x6d   : > { %2631 = vmatmul.msk.bf16.gmra.mxu3 %vm467_vm2, %v2866_v57  ;;  %v2652_v57 = vld [vmem:[%s3051_s5 + $0x48] sm:$0xf]  ;;  %v1186_v62 = vsel %vm3079_vm3, %v1181_v54, %v1185_v55  ;;  %v1199_v14 = vrot.slane %v1197_v47, 5 }
  0x6e   : > { %v1282_v44 = vpack.c.b16 %v1270_v29, %v1269_v24  ;;  %v1188_v2 = vshrl.u32 %v2652_v57, 16  ;;  %v1272_v10 = vunpack.c.l.b16 %v1186_v62  ;;  %v734_v23 = vsel %vm3205_vm6, %v732_v26, %v733_v12  ;;  %v2869_v55 = vld [vmem:[%s3051_s5 + $0x48] sm:$0xff] }
  0x6f   : > { %v1204_v29 = vor.u32 %v1203_v20, %v1199_v14  ;;  %v1209_v52 = vrot.slane %v1207_v56, 5  ;;  %v2553_v62 = vrot.slane %v672_v50, 9  ;;  %v2658_v20 = vld [vmem:[%s3051_s5 + $0x60] sm:$0xf]  ;;  %v3425_v50 = vld [vmem:[%s3051_s5 + $0x68] sm:$0x1] }
  0x70   : > { %v1190_v13 = vrot.slane %v1188_v2, 4  ;;  %v1227_v2 = vrot.slane %v1225_v16, 4 }
  0x71   : > { %2671 = vmatmul.msk.bf16.gmra.mxu0 %vm467_vm2, %v1281_v1  ;;  %v671_v1 = vld [vmem:[%s3051_s5 + $0x3c] sm:$0xe]  ;;  %v1205_v40 = vrot.slane %v1204_v29, 4  ;;  %v1239_v29 = vshll.u32 %v2658_v20, 16 }
  0x72   : > { %v2552_v11 = vrot.slane %v671_v1, 9  ;;  %v740_v1 = vrot.slane %v3084_v42, 5 }
  0x73   : > { %2542 = vmatmul.msk.bf16.gmra.mxu1 %vm467_vm2, %v2853_v3  ;;  %v1191_v3 = vshll.u32 %v2652_v57, 16  ;;  %v1210_v48 = vsel %vm3079_vm3, %v1205_v40, %v1209_v52 }
  0x74   : > { %v731_v38 = vsel %vm3205_vm6, %v2552_v11, %v730_v0  ;;  %v2856_v11 = vld [vmem:[%s3051_s5 + $0x48] sm:$0xff] }
  0x75   : > { %v1193_v51 = vrot.slane %v1191_v3, 5  ;;  %v3392_v3 = vld [vmem:[%s3051_s5 + $0x5c] sm:$0x1] }
  0x76   : > { %v1231_v42 = vshll.u32 %v3392_v3, 16 }
  0x77   : > { %v1194_v24 = vor.u32 %v1193_v51, %v1190_v13 }
  0x79   : > { %2566 = vmatmul.msk.bf16.gmra.mxu2 %vm467_vm2, %v772_v27  ;;  %v1170_v27 = vor.u32 %v1169_v37, %v1166_v36  ;;  %v764_v36 = vunpack.c.l.b16 %v734_v23  ;;  %v2655_v37 = vld [vmem:[%s3051_s5 + $0x54] sm:$0xf] }
  0x7a   : > { %v1215_v15 = vshll.u32 %v2655_v37, 16 }
  0x7b   : > { %v1171_v53 = vrot.slane %v1170_v27, 4 }
  0x7c   : > { %v1217_v54 = vrot.slane %v1215_v15, 5 }
  0x7d   : > { %2632 = vmatmul.msk.bf16.gmra.mxu3 %vm467_vm2, %v2867_v35  ;;  %v1176_v61 = vsel %vm3079_vm3, %v1171_v53, %v1175_v7  ;;  %v763_v35 = vunpack.c.l.b16 %v731_v38  ;;  %v1195_v7 = vrot.slane %v1194_v24, 4  ;;  %v1236_v24 = vshrl.u32 %v2658_v20, 16 }
  0x7e   : > { %v1271_v6 = vunpack.c.l.b16 %v1176_v61  ;;  %v1223_v61 = vrot.slane %v1221_v45, 5  ;;  %v1241_v45 = vrot.slane %v1239_v29, 5 }
  0x7f   : > { %v774_v27 = vpack.c.b16 %v764_v36, %v763_v35  ;;  %v1200_v46 = vsel %vm3079_vm3, %v1195_v7, %v1199_v14  ;;  %v1233_v14 = vrot.slane %v1231_v42, 5  ;;  %v744_v36 = vrot.slane %v3155_v17, 5  ;;  %v673_v7 = vld [vmem:[%s3051_s5 + $0x54] sm:$0xe] }
  0x80   : > { %v1283_v22 = vpack.c.b16 %v1272_v10, %v1271_v6  ;;  %v1273_v57 = vunpack.c.l.b16 %v1200_v46  ;;  %v1228_v10 = vor.u32 %v1227_v2, %v1223_v61  ;;  %v747_v17 = vrot.slane %v3158_v18, 5  ;;  %v2857_v2 = vld [vmem:[%s3051_s5 + $0x54] sm:$0xff] }
  0x81   : > { %2672 = vmatmul.msk.bf16.gmra.mxu0 %vm467_vm2, %v1282_v44  ;;  %v1212_v44 = vshrl.u32 %v2655_v37, 16 }
  0x82   : > { %v1229_v51 = vrot.slane %v1228_v10, 4 }
  0x83   : > { %2543 = vmatmul.msk.bf16.gmra.mxu1 %vm467_vm2, %v2854_v49  ;;  %v737_v49 = vrot.slane %v3075_v31, 5  ;;  %v1214_v53 = vrot.slane %v1212_v44, 4  ;;  %v2870_v44 = vld [vmem:[%s3051_s5 + $0x54] sm:$0xff] }
  0x85   : > { %v739_v0 = vrot.slane %v737_v49, 4  ;;  %v1218_v31 = vor.u32 %v1217_v54, %v1214_v53  ;;  %v738_v6 = vsel %vm3205_vm6, %v2553_v62, %v737_v49  ;;  %v746_v49 = vrot.slane %v744_v36, 4 }
  0x86   : > { %v765_v12 = vunpack.c.l.b16 %v738_v6 }
  0x87   : > { %v1219_v26 = vrot.slane %v1218_v31, 4  ;;  %v748_v62 = vsel %vm3205_vm6, %v746_v49, %v747_v17  ;;  %v2871_v49 = vld [vmem:[%s3051_s5 + $0x60] sm:$0xff] }
  0x88   : > { %v768_v42 = vunpack.c.l.b16 %v748_v62 }
  0x89   : > { %2567 = vmatmul.msk.bf16.gmra.mxu2 %vm467_vm2, %v773_v59  ;;  %v1274_v59 = vunpack.c.l.b16 %v1210_v48  ;;  %v1224_v38 = vsel %vm3079_vm3, %v1219_v26, %v1223_v61  ;;  %v2554_v48 = vrot.slane %v673_v7, 9 }
  0x8a   : > { %v1275_v40 = vunpack.c.l.b16 %v1224_v38  ;;  %v1425_v38 = vrot.slane %v3213_v41, 5 }
  0x8b   : > { %v1284_v47 = vpack.c.b16 %v1274_v59, %v1273_v57  ;;  %v2775_v59 = vld [vmem:[%s3051_s5 + $0x18] sm:$0xf]  ;;  %v745_v61 = vsel %vm3205_vm6, %v2554_v48, %v744_v36 }
  0x8c   : > { %v1795_v6 = vshrl.u32 %v2775_v59, 16  ;;  %v767_v10 = vunpack.c.l.b16 %v745_v61 }
  0x8d   : > { %2633 = vmatmul.msk.bf16.gmra.mxu3 %vm467_vm2, %v2868_v9  ;;  %v741_v9 = vsel %vm3205_vm6, %v739_v0, %v740_v1  ;;  %v1255_v0 = vshll.u32 %v3425_v50, 16  ;;  %v3439_v1 = vld [vmem:[%s3051_s5 + $0x1c] sm:$0xf] }
  0x8e   : > { %v766_v13 = vunpack.c.l.b16 %v741_v9  ;;  %v1798_v9 = vshll.u32 %v2775_v59, 16  ;;  %v1804_v26 = vshll.u32 %v3439_v1, 16  ;;  %v1797_v29 = vrot.slane %v1795_v6, 4 }
  0x8f   : > { %v1257_v20 = vrot.slane %v1255_v0, 5  ;;  %v2149_v6 = vrot.slane %v3439_v1, 5 }
  0x90   : > { %v775_v23 = vpack.c.b16 %v766_v13, %v765_v12  ;;  %v1808_v12 = vshrl.u32 %v3439_v1, 16  ;;  %v1806_v36 = vrot.slane %v1804_v26, 5 }
  0x91   : > { %2673 = vmatmul.msk.bf16.gmra.mxu0 %vm467_vm2, %v1283_v22  ;;  %v3406_v22 = vld [vmem:[%s3051_s5 + $0x64] sm:$0xf] }
  0x92   : > { %v1245_v56 = vshll.u32 %v3406_v22, 16  ;;  %v1249_v37 = vshrl.u32 %v3406_v22, 16 }
  0x93   : > { %2544 = vmatmul.msk.bf16.gmra.mxu1 %vm467_vm2, %v2855_v34  ;;  %v1234_v34 = vsel %vm3079_vm3, %v1229_v51, %v1233_v14 }
  0x94   : > { %v1276_v15 = vunpack.c.l.b16 %v1234_v34  ;;  %v1247_v46 = vrot.slane %v1245_v56, 5  ;;  %v1251_v16 = vrot.slane %v1249_v37, 4  ;;  %v1800_v56 = vrot.slane %v1798_v9, 5 }
  0x95   : > { %v776_v34 = vpack.c.b16 %v768_v42, %v767_v10  ;;  %v1810_v37 = vrot.slane %v1808_v12, 4  ;;  %v2778_v42 = vld [vmem:[%s3051_s5 + $0x24] sm:$0xf] }
  0x96   : > { %v1252_v18 = vor.u32 %v1251_v16, %v1247_v46  ;;  %v1801_v48 = vor.u32 %v1800_v56, %v1797_v29  ;;  %v2678_v29 = vld [vmem:[%s3051_s5 + $0x18] sm:$0xe]  ;;  %v1819_v56 = vshrl.u32 %v2778_v42, 16 }
  0x97   : > { %v1811_v16 = vor.u32 %v1810_v37, %v1806_v36 }
  0x98   : > { %v1253_v14 = vrot.slane %v1252_v18, 4  ;;  %v1802_v62 = vrot.slane %v1801_v48, 4 }
  0x99   : > { %2568 = vmatmul.msk.bf16.gmra.mxu2 %vm467_vm2, %v774_v27  ;;  %v1238_v27 = vrot.slane %v1236_v24, 4  ;;  %v1812_v0 = vrot.slane %v1811_v16, 4 }
  0x9a   : > { %v1258_v41 = vsel %vm3079_vm3, %v1253_v14, %v1257_v20  ;;  %v1429_v20 = vrot.slane %v3230_v25, 5 }
  0x9b   : > { %v1242_v57 = vor.u32 %v1241_v45, %v1238_v27 }
  0x9d   : > { %2634 = vmatmul.msk.bf16.gmra.mxu3 %vm467_vm2, %v2869_v55  ;;  %v1285_v55 = vpack.c.b16 %v1276_v15, %v1275_v40  ;;  %v1243_v51 = vrot.slane %v1242_v57, 4 }
  0x9e   : > { %v3395_v4 = vpop.f32.mrf.mxu1 }
  0x9f   : > { %v1248_v40 = vsel %vm3079_vm3, %v1243_v51, %v1247_v46  ;;  %v1278_v46 = vunpack.c.l.b16 %v1258_v41  ;;  %v1807_v51 = vsel %vm3079_vm3, %v1802_v62, %v1806_v36  ;;  %v1431_v41 = vrot.slane %v1429_v20, 4 }
  0xa0   : > { %v1277_v17 = vunpack.c.l.b16 %v1248_v40  ;;  %v2686_v40 = vrot.slane %v2678_v29, 9 }
  0xa1   : > { %2674 = vmatmul.msk.bf16.gmra.mxu0 %vm467_vm2, %v1284_v47  ;;  %v1422_v47 = vrot.slane %v3198_v19, 5 }
  0xa2   : > { %v1286_v18 = vpack.c.b16 %v1278_v46, %v1277_v17  ;;  %v1821_v46 = vrot.slane %v1819_v56, 4 }
  0xa3   : > { %2545 = vmatmul.msk.bf16.gmra.mxu1 %vm467_vm2, %v2856_v11  ;;  %v2677_v11 = vld [vmem:[%s3051_s5 + $0xc] sm:$0xe]  ;;  %v1424_v24 = vrot.slane %v1422_v47, 4 }
  0xa5   : > { %v1426_v45 = vsel %vm3205_vm6, %v1424_v24, %v1425_v38 }
  0xa6   : > { %v3414_v35 = vpop.f32.mrf.mxu1  ;;  %v1481_v59 = vunpack.c.l.b16 %v1426_v45  ;;  %v1990_v45 = vunpack.c.l.b16 %v1807_v51 }
  0xa8   : > { %v3419_v52 = vpop.f32.mrf.mxu2 }
  0xa9   : > { %2569 = vmatmul.msk.bf16.gmra.mxu2 %vm467_vm2, %v775_v23  ;;  %v2685_v23 = vrot.slane %v2677_v11, 9  ;;  %v3479_v11 = vld [vmem:[%s3051_s5 + $0x28] sm:$0xf] }
  0xaa   : > { %v1828_v37 = vshll.u32 %v3479_v11, 16  ;;  %v1832_v36 = vshrl.u32 %v3479_v11, 16 }
  0xab   : > { %v1423_v27 = vsel %vm3205_vm6, %v2685_v23, %v1422_v47  ;;  %v2815_v47 = vld [vmem:[%s3051_s5 + $0x18] sm:$0xe]  ;;  %v2151_v23 = vrot.slane %v2149_v6, 4 }
  0xac   : > { %v3427_v53 = vpop.f32.mrf.mxu0  ;;  %v3429_v54 = vpop.f32.mrf.mxu3  ;;  %v1480_v57 = vunpack.c.l.b16 %v1423_v27  ;;  %v2823_v14 = vrot.slane %v2815_v47, 9  ;;  %v2878_v27 = vld [vmem:[%s3051_s5 + $0x18] sm:$0xff] }
  0xad   : > { %2635 = vmatmul.msk.bf16.gmra.mxu3 %vm467_vm2, %v2870_v44  ;;  %v2777_v44 = vld [vmem:[%s3051_s5 + $0x20] sm:$0x1] }
  0xae   : > { %v1496_v10 = vpack.c.b16 %v1481_v59, %v1480_v57  ;;  %v2152_v24 = vrot.slane %v2777_v44, 5  ;;  %v1834_v57 = vrot.slane %v1832_v36, 4  ;;  %v3505_v59 = vld [vmem:[%s3051_s5 + $0x2c] sm:$0x1] }
  0xaf   : > { %v1838_v51 = vshll.u32 %v3505_v59, 16 }
  0xb0   : > { %v3442_v31 = vpop.f32.mrf.mxu1  ;;  %v3449_v13 = vpop.f32.mrf.mxu2 }
  0xb1   : > { %2675 = vmatmul.msk.bf16.gmra.mxu0 %vm467_vm2, %v1285_v55  ;;  %v1814_v55 = vshll.u32 %v2777_v44, 16  ;;  %v2150_v44 = vsel %vm3205_vm6, %v2823_v14, %v2149_v6 }
  0xb2   : > { %v2207_v47 = vunpack.c.l.b16 %v2150_v44 }
  0xb3   : > { %2546 = vmatmul.msk.bf16.gmra.mxu1 %vm467_vm2, %v2857_v2  ;;  %v1816_v2 = vrot.slane %v1814_v55, 5  ;;  %v1830_v55 = vrot.slane %v1828_v37, 5 }
  0xb4   : > { %v3453_v19 = vpop.f32.mrf.mxu0  ;;  %v3455_v7 = vpop.f32.mrf.mxu3 }
  0xb5   : > { %v1817_v38 = vsel %vm3079_vm3, %v1812_v0, %v1816_v2 }
  0xb6   : > { %v1991_v48 = vunpack.c.l.b16 %v1817_v38 }
  0xb8   : > { %v3462_v15 = vpop.f32.mrf.mxu1  ;;  %v2006_v2 = vpack.c.b16 %v1991_v48, %v1990_v45 }
  0xb9   : > { %2570 = vmatmul.msk.bf16.gmra.mxu2 %vm467_vm2, %v776_v34  ;;  %v1822_v34 = vshll.u32 %v2778_v42, 16 }
  0xbb   : > { %v1824_v16 = vrot.slane %v1822_v34, 5  ;;  %v3520_v34 = vld [vmem:[%s3051_s5 + $0x34] sm:$0xf] }
  0xbc   : > { %v3470_v61 = vpop.f32.mrf.mxu2 }
  0xbd   : > { %2636 = vmatmul.msk.bf16.gmra.mxu3 %vm467_vm2, %v2871_v49  ;;  %v2153_v49 = vsel %vm3205_vm6, %v2151_v23, %v2152_v24  ;;  %v1825_v42 = vor.u32 %v1824_v16, %v1821_v46  ;;  %v2816_v24 = vld [vmem:[%s3051_s5 + $0x24] sm:$0xe]  ;;  %v1436_v46 = vrot.slane %v3265_v60, 5  ;;  %v1852_v16 = vshll.u32 %v3520_v34, 16 }
  0xbe   : > { %v3475_v9 = vpop.f32.mrf.mxu0  ;;  %v2208_v6 = vunpack.c.l.b16 %v2153_v49 }
  0xbf   : > { %v1826_v36 = vrot.slane %v1825_v42, 4 }
  0xc0   : > { %v3481_v26 = vpop.f32.mrf.mxu3  ;;  %v626_v12 = vpop.f32.mrf.mxu1  ;;  %v2223_v29 = vpack.c.b16 %v2208_v6, %v2207_v47  ;;  %v2159_v47 = vrot.slane %v3505_v59, 5 }
  0xc1   : > { %2676 = vmatmul.msk.bf16.gmra.mxu0 %vm467_vm2, %v1286_v18  ;;  %v627_v1 = vadd.f32 %v626_v12, %v3427_v53  ;;  %v1432_v53 = vrot.slane %v3252_v8, 5  ;;  %v1430_v18 = vsel %vm3205_vm6, %v2686_v40, %v1429_v20  ;;  %v1835_v12 = vor.u32 %v1834_v57, %v1830_v55  ;;  %v2781_v20 = vld [vmem:[%s3051_s5 + $0x30] sm:$0xf] }
  0xc2   : > { %v1482_v14 = vunpack.c.l.b16 %v1430_v18  ;;  %v1843_v45 = vshrl.u32 %v2781_v20, 16  ;;  %v1846_v48 = vshll.u32 %v2781_v20, 16  ;;  %v1439_v57 = vrot.slane %v3283_v28, 5 }
  0xc3   : > { %2701 = vmatmul.msk.bf16.vlgmr.msra.gmra.mxu1 %vm467_vm2, %v1496_v10  ;;  %v1433_v0 = vsel %vm3205_vm6, %v1431_v41, %v1432_v53  ;;  %v1836_v40 = vrot.slane %v1835_v12, 4  ;;  %v2156_v41 = vrot.slane %v3479_v11, 5  ;;  %v2679_v11 = vld [vmem:[%s3051_s5 + $0x24] sm:$0xe] }
  0xc4   : > { %v3494_v25 = vpop.f32.mrf.mxu2  ;;  %v1483_v38 = vunpack.c.l.b16 %v1433_v0  ;;  %v1831_v0 = vsel %vm3079_vm3, %v1826_v36, %v1830_v55  ;;  %v1845_v6 = vrot.slane %v1843_v45, 4  ;;  %v1848_v42 = vrot.slane %v1846_v48, 5 }
  0xc5   : > { %v2158_v60 = vrot.slane %v2156_v41, 4  ;;  %v1854_v55 = vrot.slane %v1852_v16, 5  ;;  %v1992_v20 = vunpack.c.l.b16 %v1831_v0 }
  0xc6   : > { %v3502_v17 = vpop.f32.mrf.mxu0  ;;  %v1497_v53 = vpack.c.b16 %v1483_v38, %v1482_v14  ;;  %v1438_v14 = vrot.slane %v1436_v46, 4 }
  0xc7   : > { %v2160_v36 = vsel %vm3205_vm6, %v2158_v60, %v2159_v47  ;;  %v2817_v47 = vld [vmem:[%s3051_s5 + $0x30] sm:$0xe] }
  0xc8   : > { %v3507_v62 = vpop.f32.mrf.mxu3  ;;  %v628_v8 = vpop.f32.mrf.mxu1 }
  0xc9   : > { %2767 = vmatmul.msk.bf16.vlgmr.msra.gmra.mxu2 %vm467_vm2, %v2878_v27  ;;  %v629_v10 = vadd.f32 %v628_v8, %v3453_v19  ;;  %v1840_v19 = vrot.slane %v1838_v51, 5  ;;  %v2824_v27 = vrot.slane %v2816_v24, 9  ;;  %v2687_v51 = vrot.slane %v2679_v11, 9  ;;  %v2879_v24 = vld [vmem:[%s3051_s5 + $0x24] sm:$0xff] }
  0xcb   : > { %v2157_v28 = vsel %vm3205_vm6, %v2824_v27, %v2156_v41  ;;  %v1440_v27 = vsel %vm3205_vm6, %v1438_v14, %v1439_v57 }
  0xcc   : > { %v822_v23 = vpop.f32.mrf.mxu2 }
  0xcd   : > { %2807 = vmatmul.msk.bf16.vlgmr.msra.gmra.mxu3 %vm467_vm2, %v2006_v2  ;;  %v862_v56 = vadd.f32 %v822_v23, %v627_v1  ;;  %v1856_v1 = vshrl.u32 %v3520_v34, 16  ;;  %v1841_v2 = vsel %vm3079_vm3, %v1836_v40, %v1840_v19  ;;  %v2209_v40 = vunpack.c.l.b16 %v2157_v28 }
  0xce   : > { %v1332_v37 = vpop.f32.mrf.mxu0  ;;  %v1849_v19 = vor.u32 %v1848_v42, %v1845_v6  ;;  %v2163_v42 = vrot.slane %v3520_v34, 5 }
  0xcf   : > { %v1858_v38 = vrot.slane %v1856_v1, 4 }
  0xd0   : > { %v987_v44 = vpop.f32.mrf.mxu3  ;;  %v631_v49 = vpop.f32.mrf.mxu1 }
  0xd1   : > { %2839 = vmatmul.msk.bf16.vlgmr.msra.gmra.mxu0 %vm467_vm2, %v2223_v29  ;;  %v1027_v8 = vadd.f32 %v987_v44, %v862_v56  ;;  %v632_v18 = vadd.f32 %v631_v49, %v3475_v9  ;;  %v1993_v29 = vunpack.c.l.b16 %v1841_v2  ;;  %v3542_v56 = vld [vmem:[%s3051_s5 + $0x38] sm:$0x1]  ;;  %v2210_v49 = vunpack.c.l.b16 %v2160_v36 }
  0xd2   : > { %v1862_v45 = vshll.u32 %v3542_v56, 16 }
  0xd3   : > { %2702 = vmatmul.msk.bf16.gmra.mxu1 %vm467_vm2, %v1497_v53  ;;  %v3538_v9 = vadd.f32 %v1332_v37, %v1027_v8  ;;  %v1437_v53 = vsel %vm3205_vm6, %v2687_v51, %v1436_v46  ;;  %v2007_v44 = vpack.c.b16 %v1993_v29, %v1992_v20  ;;  %v1485_v8 = vunpack.c.l.b16 %v1440_v27  ;;  %v3560_v51 = vld [vmem:[%s3051_s5 + $0x40] sm:$0xf] }
  0xd4   : > { %v824_v12 = vpop.f32.mrf.mxu2  ;;  %v1484_v1 = vunpack.c.l.b16 %v1437_v53  ;;  %v1850_v46 = vrot.slane %v1849_v19, 4  ;;  %v1864_v2 = vrot.slane %v1862_v45, 5  ;;  %v2224_v57 = vpack.c.b16 %v2210_v49, %v2209_v40  ;;  %v2880_v49 = vld [vmem:[%s3051_s5 + $0x30] sm:$0xff] }
  0xd5   : > { %v863_v23 = vadd.f32 %v824_v12, %v629_v10  ;;  %v1859_v10 = vor.u32 %v1858_v38, %v1854_v55  ;;  %v2784_v12 = vld [vmem:[%s3051_s5 + $0x3c] sm:$0xf]  ;;  %v1443_v20 = vrot.slane %v3291_v39, 5  ;;  %v2165_v19 = vrot.slane %v2163_v42, 4 }
  0xd6   : > { %v1334_v59 = vpop.f32.mrf.mxu0  ;;  %v1867_v36 = vshrl.u32 %v2784_v12, 16  ;;  %v1870_v40 = vshll.u32 %v2784_v12, 16  ;;  %v1446_v53 = vrot.slane %v3303_v5, 5 }
  0xd7   : > { %v1860_v0 = vrot.slane %v1859_v10, 4 }
  0xd8   : > { %v989_v41 = vpop.f32.mrf.mxu3  ;;  %v633_v37 = vpop.f32.mrf.mxu1 }
  0xd9   : > { %v1028_v48 = vadd.f32 %v989_v41, %v863_v23  ;;  %2768 = vmatmul.msk.bf16.gmra.mxu2 %vm467_vm2, %v2879_v24  ;;  %v634_v16 = vadd.f32 %v633_v37, %v3502_v17  ;;  %v1498_v17 = vpack.c.b16 %v1485_v8, %v1484_v1  ;;  %v1855_v23 = vsel %vm3079_vm3, %v1850_v46, %v1854_v55 }
  0xda   : > { %v1865_v24 = vsel %vm3079_vm3, %v1860_v0, %v1864_v2  ;;  %v2166_v41 = vrot.slane %v3542_v56, 5  ;;  %v1876_v55 = vshll.u32 %v3560_v51, 16  ;;  %v1880_v37 = vshrl.u32 %v3560_v51, 16  ;;  %v2786_v2 = vld [vmem:[%s3051_s5 + $0x44] sm:$0x1] }
  0xdb   : > { %v3555_v28 = vadd.f32 %v1334_v59, %v1028_v48  ;;  %v2680_v59 = vld [vmem:[%s3051_s5 + $0x30] sm:$0xe]  ;;  %v1995_v10 = vunpack.c.l.b16 %v1865_v24  ;;  %v1445_v48 = vrot.slane %v1443_v20, 4  ;;  %v1869_v1 = vrot.slane %v1867_v36, 4  ;;  %v2818_v36 = vld [vmem:[%s3051_s5 + $0x3c] sm:$0xe] }
  0xdc   : > { %v827_v11 = vpop.f32.mrf.mxu2  ;;  %v2688_v45 = vrot.slane %v2680_v59, 9  ;;  %v1872_v8 = vrot.slane %v1870_v40, 5  ;;  %v2167_v5 = vsel %vm3205_vm6, %v2165_v19, %v2166_v41  ;;  %v1878_v46 = vrot.slane %v1876_v55, 5 }
  0xdd   : > { %2808 = vmatmul.msk.bf16.gmra.mxu3 %vm467_vm2, %v2007_v44  ;;  %v864_v60 = vadd.f32 %v827_v11, %v632_v18  ;;  %v2825_v18 = vrot.slane %v2817_v47, 9  ;;  %v1882_v0 = vrot.slane %v1880_v37, 4  ;;  %v1886_v24 = vshll.u32 %v2786_v2, 16  ;;  %v3594_v37 = vld [vmem:[%s3051_s5 + $0x4c] sm:$0xf] }
  0xde   : > { %v1337_v6 = vpop.f32.mrf.mxu0 }
  0xdf   : > { %v2164_v56 = vsel %vm3205_vm6, %v2825_v18, %v2163_v42  ;;  %v1447_v42 = vsel %vm3205_vm6, %v1445_v48, %v1446_v53  ;;  %v2170_v18 = vrot.slane %v3560_v51, 5  ;;  %v2173_v48 = vrot.slane %v2786_v2, 5 }
  0xe0   : > { %v992_v14 = vpop.f32.mrf.mxu3  ;;  %v636_v38 = vpop.f32.mrf.mxu1  ;;  %v2211_v47 = vunpack.c.l.b16 %v2164_v56  ;;  %v1487_v59 = vunpack.c.l.b16 %v1447_v42 }
  0xe1   : > { %2840 = vmatmul.msk.bf16.gmra.mxu0 %vm467_vm2, %v2224_v57  ;;  %v1029_v29 = vadd.f32 %v992_v14, %v864_v60  ;;  %v637_v34 = vadd.f32 %v636_v38, %v3395_v4  ;;  %v1994_v4 = vunpack.c.l.b16 %v1855_v23  ;;  %v1873_v38 = vor.u32 %v1872_v8, %v1869_v1 }
  0xe2   : > { %v1883_v23 = vor.u32 %v1882_v0, %v1878_v46  ;;  %v2172_v51 = vrot.slane %v2170_v18, 4  ;;  %v1450_v8 = vrot.slane %v3323_v30, 5 }
  0xe3   : > { %2703 = vmatmul.msk.bf16.gmra.mxu1 %vm467_vm2, %v1498_v17  ;;  %v3575_v39 = vadd.f32 %v1337_v6, %v1029_v29  ;;  %v2008_v60 = vpack.c.b16 %v1995_v10, %v1994_v4  ;;  %v2212_v17 = vunpack.c.l.b16 %v2167_v5  ;;  %v1874_v55 = vrot.slane %v1873_v38, 4 }
  0xe4   : > { %v829_v27 = vpop.f32.mrf.mxu2  ;;  %v1888_v4 = vrot.slane %v1886_v24, 5  ;;  %v2826_v10 = vrot.slane %v2818_v36, 9  ;;  %v1904_v5 = vshrl.u32 %v3594_v37, 16  ;;  %v2881_v24 = vld [vmem:[%s3051_s5 + $0x3c] sm:$0xff]  ;;  %v3620_v36 = vld [vmem:[%s3051_s5 + $0x50] sm:$0x1] }
  0xe5   : > { %v865_v44 = vadd.f32 %v829_v27, %v634_v16  ;;  %v1444_v16 = vsel %vm3205_vm6, %v2688_v45, %v1443_v20  ;;  %v2787_v20 = vld [vmem:[%s3051_s5 + $0x48] sm:$0xf]  ;;  %v2225_v19 = vpack.c.b16 %v2212_v17, %v2211_v47  ;;  %v1884_v27 = vrot.slane %v1883_v23, 4 }
  0xe6   : > { %v1339_v11 = vpop.f32.mrf.mxu0  ;;  %v1486_v29 = vunpack.c.l.b16 %v1444_v16  ;;  %v1879_v2 = vsel %vm3079_vm3, %v1874_v55, %v1878_v46  ;;  %v2171_v30 = vsel %vm3205_vm6, %v2826_v10, %v2170_v18  ;;  %v1452_v17 = vrot.slane %v1450_v8, 4 }
  0xe7   : > { %v1889_v47 = vsel %vm3079_vm3, %v1884_v27, %v1888_v4  ;;  %v1906_v38 = vrot.slane %v1904_v5, 4 }
  0xe8   : > { %v994_v57 = vpop.f32.mrf.mxu3  ;;  %v638_v6 = vpop.f32.mrf.mxu1  ;;  %v1499_v45 = vpack.c.b16 %v1487_v59, %v1486_v29  ;;  %v1996_v29 = vunpack.c.l.b16 %v1879_v2  ;;  %v1997_v18 = vunpack.c.l.b16 %v1889_v47  ;;  %v2177_v2 = vrot.slane %v3594_v37, 5 }
  0xe9   : > { %v1030_v12 = vadd.f32 %v994_v57, %v865_v44  ;;  %2769 = vmatmul.msk.bf16.gmra.mxu2 %vm467_vm2, %v2880_v49  ;;  %v639_v14 = vadd.f32 %v638_v6, %v3414_v35  ;;  %v1891_v44 = vshrl.u32 %v2787_v20, 16  ;;  %v1894_v49 = vshll.u32 %v2787_v20, 16  ;;  %v2681_v57 = vld [vmem:[%s3051_s5 + $0x3c] sm:$0xe] }
  0xea   : > { %v2174_v6 = vsel %vm3205_vm6, %v2172_v51, %v2173_v48  ;;  %v2009_v10 = vpack.c.b16 %v1997_v18, %v1996_v29  ;;  %v2179_v29 = vrot.slane %v2177_v2, 4  ;;  %v2180_v18 = vrot.slane %v3620_v36, 5 }
  0xeb   : > { %v3596_v53 = vadd.f32 %v1339_v11, %v1030_v12  ;;  %v1896_v16 = vrot.slane %v1894_v49, 5  ;;  %v2689_v12 = vrot.slane %v2681_v57, 9  ;;  %v2214_v20 = vunpack.c.l.b16 %v2174_v6  ;;  %v2790_v49 = vld [vmem:[%s3051_s5 + $0x54] sm:$0xf] }
  0xec   : > { %v832_v40 = vpop.f32.mrf.mxu2  ;;  %v1918_v6 = vshll.u32 %v2790_v49, 16 }
  0xed   : > { %2809 = vmatmul.msk.bf16.gmra.mxu3 %vm467_vm2, %v2008_v60  ;;  %v866_v41 = vadd.f32 %v832_v40, %v637_v34  ;;  %v1900_v34 = vshll.u32 %v3594_v37, 16  ;;  %v1453_v60 = vrot.slane %v3338_v43, 5  ;;  %v2213_v40 = vunpack.c.l.b16 %v2171_v30 }
  0xee   : > { %v1342_v35 = vpop.f32.mrf.mxu0  ;;  %v1451_v55 = vsel %vm3205_vm6, %v2689_v12, %v1450_v8  ;;  %v1915_v30 = vshrl.u32 %v2790_v49, 16  ;;  %v1457_v37 = vrot.slane %v3351_v58, 5  ;;  %v1460_v58 = vrot.slane %v3365_v21, 5 }
  0xef   : > { %v3616_v46 = vrot.slane %v1900_v34, 5  ;;  %v1488_v48 = vunpack.c.l.b16 %v1451_v55  ;;  %v2181_v49 = vsel %vm3205_vm6, %v2179_v29, %v2180_v18  ;;  %v2793_v29 = vld [vmem:[%s3051_s5 + $0x60] sm:$0xf] }
  0xf0   : > { %v997_v56 = vpop.f32.mrf.mxu3  ;;  %v641_v1 = vpop.f32.mrf.mxu1 }
  0xf1   : > { %2841 = vmatmul.msk.bf16.gmra.mxu0 %vm467_vm2, %v2225_v19  ;;  %v1031_v11 = vadd.f32 %v997_v56, %v866_v41  ;;  %v642_v0 = vadd.f32 %v641_v1, %v3442_v31  ;;  %v1893_v31 = vrot.slane %v1891_v44, 4  ;;  %v3632_v56 = vld [vmem:[%s3051_s5 + $0x58] sm:$0xf]  ;;  %v2226_v1 = vpack.c.b16 %v2214_v20, %v2213_v40 }
  0xf2   : > { %v1917_v40 = vrot.slane %v1915_v30, 4  ;;  %v1920_v20 = vrot.slane %v1918_v6, 5 }
  0xf3   : > { %2704 = vmatmul.msk.bf16.gmra.mxu1 %vm467_vm2, %v1499_v45  ;;  %v3614_v42 = vadd.f32 %v1342_v35, %v1031_v11  ;;  %v1454_v35 = vsel %vm3205_vm6, %v1452_v17, %v1453_v60  ;;  %v1897_v27 = vor.u32 %v1896_v16, %v1893_v31  ;;  %v1910_v45 = vshll.u32 %v3620_v36, 16  ;;  %v2819_v60 = vld [vmem:[%s3051_s5 + $0x48] sm:$0xe] }
  0xf4   : > { %v834_v43 = vpop.f32.mrf.mxu2  ;;  %v1489_v44 = vunpack.c.l.b16 %v1454_v35  ;;  %v1924_v31 = vshll.u32 %v3632_v56, 16  ;;  %v1928_v16 = vshrl.u32 %v3632_v56, 16 }
  0xf5   : > { %v867_v23 = vadd.f32 %v834_v43, %v639_v14  ;;  %v1907_v14 = vor.u32 %v1906_v38, %v3616_v46  ;;  %v1898_v34 = vrot.slane %v1897_v27, 4  ;;  %v1912_v57 = vrot.slane %v1910_v45, 5 }
  0xf6   : > { %v1344_v59 = vpop.f32.mrf.mxu0  ;;  %v1500_v43 = vpack.c.b16 %v1489_v44, %v1488_v48  ;;  %v2827_v38 = vrot.slane %v2819_v60, 9  ;;  %v1459_v27 = vrot.slane %v1457_v37, 4 }
  0xf7   : > { %v1908_v5 = vrot.slane %v1907_v14, 4  ;;  %v3655_v14 = vld [vmem:[%s3051_s5 + $0x5c] sm:$0x1] }
  0xf8   : > { %v999_v19 = vpop.f32.mrf.mxu3  ;;  %v643_v41 = vpop.f32.mrf.mxu1  ;;  %v2178_v44 = vsel %vm3205_vm6, %v2827_v38, %v2177_v2  ;;  %v1934_v21 = vshll.u32 %v3655_v14, 16  ;;  %v2820_v38 = vld [vmem:[%s3051_s5 + $0x54] sm:$0xe] }
  0xf9   : > { %v1032_v4 = vadd.f32 %v999_v19, %v867_v23  ;;  %2770 = vmatmul.msk.bf16.gmra.mxu2 %vm467_vm2, %v2881_v24  ;;  %v644_v51 = vadd.f32 %v643_v41, %v3462_v15  ;;  %v1913_v24 = vsel %vm3079_vm3, %v1908_v5, %v1912_v57  ;;  %v1926_v19 = vrot.slane %v1924_v31, 5 }
  0xfa   : > { %v1930_v41 = vrot.slane %v1928_v16, 4  ;;  %v1999_v36 = vunpack.c.l.b16 %v1913_v24  ;;  %v2215_v2 = vunpack.c.l.b16 %v2178_v44  ;;  %v1467_v44 = vrot.slane %v3392_v3, 5 }
  0xfb   : > { %v3637_v47 = vadd.f32 %v1344_v59, %v1032_v4  ;;  %v2682_v59 = vld [vmem:[%s3051_s5 + $0x48] sm:$0xe] }
  0xfc   : > { %v837_v8 = vpop.f32.mrf.mxu2  ;;  %v2690_v35 = vrot.slane %v2682_v59, 9 }
  0xfd   : > { %2810 = vmatmul.msk.bf16.gmra.mxu3 %vm467_vm2, %v2009_v10  ;;  %v868_v11 = vadd.f32 %v837_v8, %v642_v0  ;;  %v1903_v0 = vsel %vm3079_vm3, %v1898_v34, %v3616_v46  ;;  %v2882_v10 = vld [vmem:[%s3051_s5 + $0x48] sm:$0xff]  ;;  %v1931_v8 = vor.u32 %v1930_v41, %v1926_v19  ;;  %v2828_v41 = vrot.slane %v2820_v38, 9 }
  0xfe   : > { %v1347_v15 = vpop.f32.mrf.mxu0  ;;  %v1998_v45 = vunpack.c.l.b16 %v1903_v0 }
  0xff   : > { %v1932_v6 = vrot.slane %v1931_v8, 4 }
 0x100   : > { %v1002_v12 = vpop.f32.mrf.mxu3  ;;  %v646_v17 = vpop.f32.mrf.mxu1  ;;  %v2010_v60 = vpack.c.b16 %v1999_v36, %v1998_v45  ;;  %v2187_v45 = vrot.slane %v3655_v14, 5  ;;  %v2683_v36 = vld [vmem:[%s3051_s5 + $0x54] sm:$0xe] }
 0x101   : > { %2842 = vmatmul.msk.bf16.gmra.mxu0 %vm467_vm2, %v2226_v1  ;;  %v1033_v23 = vadd.f32 %v1002_v12, %v868_v11  ;;  %v1921_v1 = vor.u32 %v1920_v20, %v1917_v40  ;;  %v1461_v11 = vsel %vm3205_vm6, %v1459_v27, %v1460_v58  ;;  %v647_v31 = vadd.f32 %v646_v17, %v3419_v52  ;;  %v3676_v40 = vld [vmem:[%s3051_s5 + $0x64] sm:$0xf] }
 0x102   : > { %v1936_v12 = vrot.slane %v1934_v21, 5  ;;  %v1939_v27 = vshrl.u32 %v2793_v29, 16 }
 0x103   : > { %2705 = vmatmul.msk.bf16.gmra.mxu1 %vm467_vm2, %v1500_v43  ;;  %v3651_v46 = vadd.f32 %v1347_v15, %v1033_v23  ;;  %v2216_v15 = vunpack.c.l.b16 %v2181_v49  ;;  %v1922_v30 = vrot.slane %v1921_v1, 4  ;;  %v1491_v43 = vunpack.c.l.b16 %v1461_v11 }
 0x104   : > { %v839_v55 = vpop.f32.mrf.mxu2  ;;  %v1937_v17 = vsel %vm3079_vm3, %v1932_v6, %v1936_v12  ;;  %v1941_v11 = vrot.slane %v1939_v27, 4 }
 0x105   : > { %v869_v4 = vadd.f32 %v839_v55, %v644_v51  ;;  %v1458_v51 = vsel %vm3205_vm6, %v2690_v35, %v1457_v37  ;;  %v2184_v37 = vrot.slane %v3632_v56, 5  ;;  %v2227_v23 = vpack.c.b16 %v2216_v15, %v2215_v2  ;;  %v2883_v2 = vld [vmem:[%s3051_s5 + $0x54] sm:$0xff] }
 0x106   : > { %v1349_v48 = vpop.f32.mrf.mxu0  ;;  %v1490_v16 = vunpack.c.l.b16 %v1458_v51  ;;  %v1927_v52 = vsel %vm3079_vm3, %v1922_v30, %v1926_v19  ;;  %v1464_v35 = vrot.slane %v3377_v63, 5  ;;  %v1948_v19 = vshll.u32 %v3676_v40, 16  ;;  %v2795_v30 = vld [vmem:[%s3051_s5 + $0x68] sm:$0x1] }
 0x107   : > { %v2186_v55 = vrot.slane %v2184_v37, 4  ;;  %v2000_v49 = vunpack.c.l.b16 %v1927_v52  ;;  %v2001_v63 = vunpack.c.l.b16 %v1937_v17  ;;  %v2185_v8 = vsel %vm3205_vm6, %v2828_v41, %v2184_v37 }
 0x108   : > { %v1004_v34 = vpop.f32.mrf.mxu3  ;;  %v648_v5 = vpop.f32.mrf.mxu1  ;;  %v1501_v20 = vpack.c.b16 %v1491_v43, %v1490_v16  ;;  %v1466_v51 = vrot.slane %v1464_v35, 4  ;;  %v2217_v6 = vunpack.c.l.b16 %v2185_v8 }
 0x109   : > { %v1034_v57 = vadd.f32 %v1004_v34, %v869_v4  ;;  %2771 = vmatmul.msk.bf16.gmra.mxu2 %vm467_vm2, %v2882_v10  ;;  %v1942_v4 = vshll.u32 %v2793_v29, 16  ;;  %v649_v1 = vadd.f32 %v648_v5, %v3449_v13  ;;  %v2691_v34 = vrot.slane %v2683_v36, 9 }
 0x10a   : > { %v2188_v3 = vsel %vm3205_vm6, %v2186_v55, %v2187_v45  ;;  %v1950_v13 = vrot.slane %v1948_v19, 5  ;;  %v1958_v29 = vshll.u32 %v2795_v30, 16  ;;  %v2191_v36 = vrot.slane %v3676_v40, 5  ;;  %v2796_v19 = vld [vmem:[%s3051_s5 + $0x6c] sm:$0xf] }
 0x10b   : > { %v3673_v18 = vadd.f32 %v1349_v48, %v1034_v57  ;;  %v1952_v48 = vshrl.u32 %v3676_v40, 16  ;;  %v1944_v57 = vrot.slane %v1942_v4, 5  ;;  %v2218_v16 = vunpack.c.l.b16 %v2188_v3  ;;  %v2821_v4 = vld [vmem:[%s3051_s5 + $0x60] sm:$0xe] }
 0x10c   : > { %v842_v0 = vpop.f32.mrf.mxu2  ;;  %v1465_v12 = vsel %vm3205_vm6, %v2691_v34, %v1464_v35  ;;  %v1960_v27 = vrot.slane %v1958_v29, 5  ;;  %v2684_v34 = vld [vmem:[%s3051_s5 + $0x60] sm:$0xe]  ;;  %v1963_v40 = vshrl.u32 %v2796_v19, 16  ;;  %v1474_v3 = vrot.slane %v3425_v50, 5 }
 0x10d   : > { %2811 = vmatmul.msk.bf16.gmra.mxu3 %vm467_vm2, %v2010_v60  ;;  %v870_v24 = vadd.f32 %v842_v0, %v647_v31  ;;  %v1954_v5 = vrot.slane %v1952_v48, 4  ;;  %v1468_v0 = vsel %vm3205_vm6, %v1466_v51, %v1467_v44  ;;  %v1945_v38 = vor.u32 %v1944_v57, %v1941_v11 }
 0x10e   : > { %v1352_v59 = vpop.f32.mrf.mxu0  ;;  %v1493_v52 = vunpack.c.l.b16 %v1468_v0  ;;  %v2228_v17 = vpack.c.b16 %v2218_v16, %v2217_v6  ;;  %v1966_v51 = vshll.u32 %v2796_v19, 16  ;;  %v2193_v11 = vrot.slane %v2191_v36, 4 }
 0x10f   : > { %v2194_v57 = vrot.slane %v2795_v30, 5  ;;  %v2884_v30 = vld [vmem:[%s3051_s5 + $0x60] sm:$0xff] }
 0x110   : > { %v1007_v56 = vpop.f32.mrf.mxu3  ;;  %v651_v58 = vpop.f32.mrf.mxu1 }
 0x111   : > { %2843 = vmatmul.msk.bf16.gmra.mxu0 %vm467_vm2, %v2227_v23  ;;  %v1035_v10 = vadd.f32 %v1007_v56, %v870_v24  ;;  %v2011_v23 = vpack.c.b16 %v2001_v63, %v2000_v49  ;;  %v1955_v24 = vor.u32 %v1954_v5, %v1950_v13  ;;  %v1946_v56 = vrot.slane %v1945_v38, 4 }
 0x112   : > { %v1471_v63 = vrot.slane %v3406_v22, 5  ;;  %v1965_v38 = vrot.slane %v1963_v40, 4 }
 0x113   : > { %2706 = vmatmul.msk.bf16.gmra.mxu1 %vm467_vm2, %v1501_v20  ;;  %v3693_v21 = vadd.f32 %v1352_v59, %v1035_v10  ;;  %v652_v59 = vadd.f32 %v651_v58, %v3470_v61  ;;  %v1492_v20 = vunpack.c.l.b16 %v1465_v12  ;;  %v1956_v35 = vrot.slane %v1955_v24, 4  ;;  %v3712_v58 = vld [vmem:[%s3051_s5 + $0x70] sm:$0xf]  ;;  %v2798_v24 = vld [vmem:[%s3051_s5 + $0x74] sm:$0x1] }
 0x114   : > { %v844_v14 = vpop.f32.mrf.mxu2  ;;  %v1951_v49 = vsel %vm3079_vm3, %v1946_v56, %v1950_v13  ;;  %v1473_v16 = vrot.slane %v1471_v63, 4  ;;  %v2198_v40 = vrot.slane %v3712_v58, 5 }
 0x115   : > { %v871_v60 = vadd.f32 %v844_v14, %v649_v1  ;;  %v1502_v61 = vpack.c.b16 %v1493_v52, %v1492_v20  ;;  %v2829_v1 = vrot.slane %v2821_v4, 9  ;;  %v1961_v14 = vsel %vm3079_vm3, %v1956_v35, %v1960_v27 }
 0x116   : > { %v1354_v15 = vpop.f32.mrf.mxu0  ;;  %v2003_v6 = vunpack.c.l.b16 %v1961_v14  ;;  %v1982_v4 = vshll.u32 %v2798_v24, 16 }
 0x117   : > { %v2192_v0 = vsel %vm3205_vm6, %v2829_v1, %v2191_v36 }
 0x118   : > { %v1009_v31 = vpop.f32.mrf.mxu3  ;;  %v653_v43 = vpop.f32.mrf.mxu1 }
 0x119   : > { %v1036_v37 = vadd.f32 %v1009_v31, %v871_v60  ;;  %2772 = vmatmul.msk.bf16.gmra.mxu2 %vm467_vm2, %v2883_v2  ;;  %v1972_v60 = vshll.u32 %v3712_v58, 16  ;;  %v1976_v2 = vshrl.u32 %v3712_v58, 16  ;;  %v654_v22 = vadd.f32 %v653_v43, %v3494_v25 }
 0x11a   : > { %v2692_v31 = vrot.slane %v2684_v34, 9  ;;  %v2195_v25 = vsel %vm3205_vm6, %v2193_v11, %v2194_v57  ;;  %v1984_v34 = vrot.slane %v1982_v4, 5  ;;  %v2822_v11 = vld [vmem:[%s3051_s5 + $0x6c] sm:$0xe] }
 0x11b   : > { %v3707_v10 = vadd.f32 %v1354_v15, %v1036_v37  ;;  %v2002_v15 = vunpack.c.l.b16 %v1951_v49  ;;  %v1968_v37 = vrot.slane %v1966_v51, 5  ;;  %v1974_v43 = vrot.slane %v1972_v60, 5 }
 0x11c   : > { %v847_v41 = vpop.f32.mrf.mxu2  ;;  %v1472_v52 = vsel %vm3205_vm6, %v2692_v31, %v1471_v63 }
 0x11d   : > { %2812 = vmatmul.msk.bf16.gmra.mxu3 %vm467_vm2, %v2011_v23  ;;  %v872_v55 = vadd.f32 %v847_v41, %v652_v59  ;;  %v1978_v23 = vrot.slane %v1976_v2, 4  ;;  %v2219_v59 = vunpack.c.l.b16 %v2192_v0  ;;  %v2012_v56 = vpack.c.b16 %v2003_v6, %v2002_v15 }
 0x11e   : > { %v1357_v45 = vpop.f32.mrf.mxu0  ;;  %v1969_v35 = vor.u32 %v1968_v37, %v1965_v38  ;;  %v1494_v36 = vunpack.c.l.b16 %v1472_v52 }
 0x11f   : > { %v1979_v27 = vor.u32 %v1978_v23, %v1974_v43 }
 0x120   : > { %v1012_v48 = vpop.f32.mrf.mxu3  ;;  %v656_v44 = vpop.f32.mrf.mxu1  ;;  %v1970_v63 = vrot.slane %v1969_v35, 4 }
 0x121   : > { %2844 = vmatmul.msk.bf16.gmra.mxu0 %vm467_vm2, %v2228_v17  ;;  %v1037_v8 = vadd.f32 %v1012_v48, %v872_v55  ;;  %v1475_v17 = vsel %vm3205_vm6, %v1473_v16, %v1474_v3  ;;  %v2220_v55 = vunpack.c.l.b16 %v2195_v25  ;;  %v1980_v14 = vrot.slane %v1979_v27, 4  ;;  %v2885_v16 = vld [vmem:[%s3051_s5 + $0x6c] sm:$0xff]  ;;  %s2477_s5 = sshll.u32 %s2961_s9, 4 }
 0x122   : > { %v1495_v19 = vunpack.c.l.b16 %v1475_v17  ;;  %v1975_v60 = vsel %vm3079_vm3, %v1970_v63, %v1974_v43  ;;  %v2830_v3 = vrot.slane %v2822_v11, 9  ;;  %p189_p6 = scmp.lt.s32.totalorder %s2477_s5, 31 }
 0x123   : > { %2707 = vmatmul.msk.bf16.gmra.mxu1 %vm467_vm2, %v1502_v61  ;;  %v3726_v13 = vadd.f32 %v1357_v45, %v1037_v8  ;;  %v657_v45 = vadd.f32 %v656_v44, %v3429_v54  ;;  %v2229_v49 = vpack.c.b16 %v2220_v55, %v2219_v59  ;;  %v1985_v2 = vsel %vm3079_vm3, %v1980_v14, %v1984_v34 }
 0x124   : > { %v849_v5 = vpop.f32.mrf.mxu2  ;;  %v1503_v51 = vpack.c.b16 %v1495_v19, %v1494_v36  ;;  %v2199_v38 = vsel %vm3205_vm6, %v2830_v3, %v2198_v40  ;;  %s3860_s5 = smov (!%p189_p6, %s2477_s5), 31 }
 0x125   : > { %v873_v12 = vadd.f32 %v849_v5, %v654_v22  ;;  %v2200_v22 = vrot.slane %v2198_v40, 4  ;;  %v2201_v5 = vrot.slane %v2798_v24, 5  ;;  %v2221_v43 = vunpack.c.l.b16 %v2199_v38  ;;  %s195_s18 = sadd.s32 %s2478_s17, %s3860_s5 }
 0x126   : > { %v1359_v50 = vpop.f32.mrf.mxu0  ;;  %s2479_s9 = sshll.u32 %s195_s18, 3 }
 0x127   : > { %v2202_v32 = vsel %vm3205_vm6, %v2200_v22, %v2201_v5  ;;  %s3776_s21 = scalar_lea.vmem %s3842_s2, %s2479_s9 }
 0x128   : > { %v1014_v29 = vpop.f32.mrf.mxu3  ;;  %v658_v20 = vpop.f32.mrf.mxu1  ;;  %v2222_v23 = vunpack.c.l.b16 %v2202_v32 }
 0x129   : > { %v1038_v41 = vadd.f32 %v1014_v29, %v873_v12  ;;  %2773 = vmatmul.msk.bf16.gmra.mxu2 %vm467_vm2, %v2884_v30  ;;  %v659_v15 = vadd.f32 %v658_v20, %v3455_v7  ;;  %v2004_v12 = vunpack.c.l.b16 %v1975_v60  ;;  %v2005_v30 = vunpack.c.l.b16 %v1985_v2 }
 0x12a   : > { %v2230_v20 = vpack.c.b16 %v2222_v23, %v2221_v43 }
 0x12b   : > { %v3740_v61 = vadd.f32 %v1359_v50, %v1038_v41  ;;  %v2013_v7 = vpack.c.b16 %v2005_v30, %v2004_v12 }
 0x12c   : > { %v852_v48 = vpop.f32.mrf.mxu2 }
 0x12d   : > { %2813 = vmatmul.msk.bf16.gmra.mxu3 %vm467_vm2, %v2012_v56  ;;  %v874_v1 = vadd.f32 %v852_v48, %v657_v45 }
 0x12e   : > { %v1362_v8 = vpop.f32.mrf.mxu0 }
 0x130   : > { %v1017_v57 = vpop.f32.mrf.mxu3  ;;  %v661_v54 = vpop.f32.mrf.mxu1 }
 0x131   : > { %2845 = vmatmul.msk.bf16.gmra.mxu0 %vm467_vm2, %v2229_v49  ;;  %v1039_v44 = vadd.f32 %v1017_v57, %v874_v1  ;;  %v662_v24 = vadd.f32 %v661_v54, %v3481_v26 }
 0x133   : > { %2708 = vmatmul.msk.bf16.gmra.mxu1 %vm467_vm2, %v1503_v51  ;;  %v3752_v58 = vadd.f32 %v1362_v8, %v1039_v44 }
 0x134   : > { %v854_v6 = vpop.f32.mrf.mxu2 }
 0x135   : > { %v875_v31 = vadd.f32 %v854_v6, %v659_v15 }
 0x136   : > { %v1364_v0 = vpop.f32.mrf.mxu0 }
 0x138   : > { %v1019_v37 = vpop.f32.mrf.mxu3  ;;  %v663_v50 = vpop.f32.mrf.mxu1 }
 0x139   : > { %v1040_v25 = vadd.f32 %v1019_v37, %v875_v31  ;;  %2774 = vmatmul.msk.bf16.gmra.mxu2 %vm467_vm2, %v2885_v16  ;;  %v664_v55 = vadd.f32 %v663_v50, %v3507_v62 }
 0x13b   : > { %v3761_v29 = vadd.f32 %v1364_v0, %v1040_v25 }
 0x13c   : > { %v857_v59 = vpop.f32.mrf.mxu2 }
 0x13d   : > { %2814 = vmatmul.msk.bf16.gmra.mxu3 %vm467_vm2, %v2013_v7  ;;  %v876_v52 = vadd.f32 %v857_v59, %v662_v24 }
 0x13e   : > { %v1367_v33 = vpop.f32.mrf.mxu0 }
 0x140   : > { %v1022_v17 = vpop.f32.mrf.mxu3  ;;  %v1549_v41 = vpop.f32.mrf.mxu1 }
 0x141   : > { %2846 = vmatmul.msk.bf16.gmra.mxu0 %vm467_vm2, %v2230_v20  ;;  %v1041_v56 = vadd.f32 %v1022_v17, %v876_v52  ;;  %v1589_v48 = vadd.f32 %v1549_v41, %v3538_v9 }
 0x143   : > { %v3767_v35 = vadd.f32 %v1367_v33, %v1041_v56 }
 0x144   : > { %v859_v26 = vpop.f32.mrf.mxu2 }
 0x145   : > { %v877_v27 = vadd.f32 %v859_v26, %v664_v55 }
 0x146   : > { %v1369_v4 = vpop.f32.mrf.mxu0 }
 0x148   : > { %v1024_v45 = vpop.f32.mrf.mxu3  ;;  %v1551_v36 = vpop.f32.mrf.mxu1 }
 0x149   : > { %v1042_v19 = vadd.f32 %v1024_v45, %v877_v27  ;;  %v1590_v9 = vadd.f32 %v1551_v36, %v3555_v28 }
 0x14b   : > { %v3771_v49 = vadd.f32 %v1369_v4, %v1042_v19 }
 0x14c   : > { %v1714_v1 = vpop.f32.mrf.mxu2 }
 0x14d   : > { %v1754_v63 = vadd.f32 %v1714_v1, %v1589_v48 }
 0x14e   : > { %v2276_v8 = vpop.f32.mrf.mxu0 }
 0x150   : > { %v2059_v62 = vpop.f32.mrf.mxu3  ;;  %v1554_v14 = vpop.f32.mrf.mxu1 }
 0x151   : > { %v2099_v34 = vadd.f32 %v2059_v62, %v1754_v63  ;;  %v1591_v3 = vadd.f32 %v1554_v14, %v3575_v39 }
 0x153   : > { %v2316_v40 = vadd.f32 %v2276_v8, %v2099_v34 }
 0x154   : > { %v1716_v51 = vpop.f32.mrf.mxu2 }
 0x155   : > { %2332 = vst.msk [vmem:[%s3776_s21] sm:$0xff] %vm467_vm2, %v2316_v40  ;;  %v1755_v11 = vadd.f32 %v1716_v51, %v1590_v9 }
 0x156   : > { %v2278_v57 = vpop.f32.mrf.mxu0 }
 0x158   : > { %v2061_v54 = vpop.f32.mrf.mxu3  ;;  %v1556_v44 = vpop.f32.mrf.mxu1 }
 0x159   : > { %v2100_v60 = vadd.f32 %v2061_v54, %v1755_v11  ;;  %v1592_v12 = vadd.f32 %v1556_v44, %v3596_v53 }
 0x15b   : > { %v2317_v2 = vadd.f32 %v2278_v57, %v2100_v60 }
 0x15c   : > { %v1719_v22 = vpop.f32.mrf.mxu2 }
 0x15d   : > { %2333 = vst.msk [vmem:[%s3776_s21 + $0x8] sm:$0xff] %vm467_vm2, %v2317_v2  ;;  %v1756_v5 = vadd.f32 %v1719_v22, %v1591_v3 }
 0x15e   : > { %v2281_v15 = vpop.f32.mrf.mxu0 }
 0x160   : > { %v2064_v6 = vpop.f32.mrf.mxu3  ;;  %v1559_v28 = vpop.f32.mrf.mxu1 }
 0x161   : > { %v2101_v31 = vadd.f32 %v2064_v6, %v1756_v5  ;;  %v1593_v25 = vadd.f32 %v1559_v28, %v3614_v42 }
 0x163   : > { %v2318_v16 = vadd.f32 %v2281_v15, %v2101_v31 }
 0x164   : > { %v1721_v30 = vpop.f32.mrf.mxu2 }
 0x165   : > { %2334 = vst.msk [vmem:[%s3776_s21 + $0x10] sm:$0xff] %vm467_vm2, %v2318_v16  ;;  %v1757_v0 = vadd.f32 %v1721_v30, %v1592_v12 }
 0x166   : > { %v2283_v38 = vpop.f32.mrf.mxu0 }
 0x168   : > { %v2066_v32 = vpop.f32.mrf.mxu3  ;;  %v1561_v39 = vpop.f32.mrf.mxu1 }
 0x169   : > { %v2102_v37 = vadd.f32 %v2066_v32, %v1757_v0  ;;  %v1594_v52 = vadd.f32 %v1561_v39, %v3637_v47 }
 0x16b   : > { %v2319_v50 = vadd.f32 %v2283_v38, %v2102_v37 }
 0x16c   : > { %v1724_v7 = vpop.f32.mrf.mxu2 }
 0x16d   : > { %2335 = vst.msk [vmem:[%s3776_s21 + $0x18] sm:$0xff] %vm467_vm2, %v2319_v50  ;;  %v1758_v43 = vadd.f32 %v1724_v7, %v1593_v25 }
 0x16e   : > { %v2286_v23 = vpop.f32.mrf.mxu0 }
 0x170   : > { %v2069_v24 = vpop.f32.mrf.mxu3  ;;  %v1564_v53 = vpop.f32.mrf.mxu1 }
 0x171   : > { %v2103_v59 = vadd.f32 %v2069_v24, %v1758_v43  ;;  %v1595_v27 = vadd.f32 %v1564_v53, %v3651_v46 }
 0x173   : > { %v2320_v20 = vadd.f32 %v2286_v23, %v2103_v59 }
 0x174   : > { %v1726_v33 = vpop.f32.mrf.mxu2 }
 0x175   : > { %2336 = vst.msk [vmem:[%s3776_s21 + $0x20] sm:$0xff] %vm467_vm2, %v2320_v20  ;;  %v1759_v17 = vadd.f32 %v1726_v33, %v1594_v52 }
 0x176   : > { %v2288_v41 = vpop.f32.mrf.mxu0 }
 0x178   : > { %v2071_v56 = vpop.f32.mrf.mxu3  ;;  %v1566_v42 = vpop.f32.mrf.mxu1 }
 0x179   : > { %v2104_v55 = vadd.f32 %v2071_v56, %v1759_v17  ;;  %v1596_v63 = vadd.f32 %v1566_v42, %v3673_v18 }
 0x17b   : > { %v2321_v26 = vadd.f32 %v2288_v41, %v2104_v55 }
 0x17c   : > { %v1729_v4 = vpop.f32.mrf.mxu2 }
 0x17d   : > { %2337 = vst.msk [vmem:[%s3776_s21 + $0x28] sm:$0xff] %vm467_vm2, %v2321_v26  ;;  %v1760_v45 = vadd.f32 %v1729_v4, %v1595_v27 }
 0x17e   : > { %v2291_v36 = vpop.f32.mrf.mxu0 }
 0x180   : > { %v2074_v19 = vpop.f32.mrf.mxu3  ;;  %v1569_v47 = vpop.f32.mrf.mxu1 }
 0x181   : > { %v2105_v48 = vadd.f32 %v2074_v19, %v1760_v45  ;;  %v1597_v51 = vadd.f32 %v1569_v47, %v3693_v21 }
 0x183   : > { %v2322_v1 = vadd.f32 %v2291_v36, %v2105_v48 }
 0x184   : > { %v1731_v8 = vpop.f32.mrf.mxu2 }
 0x185   : > { %2338 = vst.msk [vmem:[%s3776_s21 + $0x30] sm:$0xff] %vm467_vm2, %v2322_v1  ;;  %v1761_v62 = vadd.f32 %v1731_v8, %v1596_v63 }
 0x186   : > { %v2293_v14 = vpop.f32.mrf.mxu0 }
 0x188   : > { %v2076_v34 = vpop.f32.mrf.mxu3  ;;  %v1571_v46 = vpop.f32.mrf.mxu1 }
 0x189   : > { %v2106_v40 = vadd.f32 %v2076_v34, %v1761_v62  ;;  %v1598_v3 = vadd.f32 %v1571_v46, %v3707_v10 }
 0x18b   : > { %v2323_v9 = vadd.f32 %v2293_v14, %v2106_v40 }
 0x18c   : > { %v1734_v11 = vpop.f32.mrf.mxu2 }
 0x18d   : > { %2339 = vst.msk [vmem:[%s3776_s21 + $0x38] sm:$0xff] %vm467_vm2, %v2323_v9  ;;  %v1762_v57 = vadd.f32 %v1734_v11, %v1597_v51 }
 0x18e   : > { %v2296_v54 = vpop.f32.mrf.mxu0 }
 0x190   : > { %v2079_v44 = vpop.f32.mrf.mxu3  ;;  %v1574_v18 = vpop.f32.mrf.mxu1 }
 0x191   : > { %v2107_v60 = vadd.f32 %v2079_v44, %v1762_v57  ;;  %v1599_v16 = vadd.f32 %v1574_v18, %v3726_v13 }
 0x193   : > { %v2324_v2 = vadd.f32 %v2296_v54, %v2107_v60 }
 0x194   : > { %v1736_v22 = vpop.f32.mrf.mxu2 }
 0x195   : > { %2340 = vst.msk [vmem:[%s3776_s21 + $0x40] sm:$0xff] %vm467_vm2, %v2324_v2  ;;  %v1763_v5 = vadd.f32 %v1736_v22, %v1598_v3 }
 0x196   : > { %v2298_v15 = vpop.f32.mrf.mxu0 }
 0x198   : > { %v2081_v6 = vpop.f32.mrf.mxu3  ;;  %v1576_v21 = vpop.f32.mrf.mxu1 }
 0x199   : > { %v2108_v28 = vadd.f32 %v2081_v6, %v1763_v5  ;;  %v1600_v37 = vadd.f32 %v1576_v21, %v3740_v61 }
 0x19b   : > { %v2325_v31 = vadd.f32 %v2298_v15, %v2108_v28 }
 0x19c   : > { %v1739_v12 = vpop.f32.mrf.mxu2 }
 0x19d   : > { %2341 = vst.msk [vmem:[%s3776_s21 + $0x48] sm:$0xff] %vm467_vm2, %v2325_v31  ;;  %v1764_v30 = vadd.f32 %v1739_v12, %v1599_v16 }
 0x19e   : > { %v2301_v0 = vpop.f32.mrf.mxu0 }
 0x1a0   : > { %v2084_v38 = vpop.f32.mrf.mxu3  ;;  %v1579_v32 = vpop.f32.mrf.mxu1 }
 0x1a1   : > { %v2109_v10 = vadd.f32 %v2084_v38, %v1764_v30  ;;  %v1601_v24 = vadd.f32 %v1579_v32, %v3752_v58 }
 0x1a3   : > { %v2326_v39 = vadd.f32 %v2301_v0, %v2109_v10 }
 0x1a4   : > { %v1741_v50 = vpop.f32.mrf.mxu2 }
 0x1a5   : > { %2342 = vst.msk [vmem:[%s3776_s21 + $0x50] sm:$0xff] %vm467_vm2, %v2326_v39  ;;  %v1765_v25 = vadd.f32 %v1741_v50, %v1600_v37 }
 0x1a6   : > { %v2303_v7 = vpop.f32.mrf.mxu0 }
 0x1a8   : > { %v2086_v43 = vpop.f32.mrf.mxu3  ;;  %v1581_v53 = vpop.f32.mrf.mxu1 }
 0x1a9   : > { %v2110_v13 = vadd.f32 %v2086_v43, %v1765_v25  ;;  %v1602_v41 = vadd.f32 %v1581_v53, %v3761_v29 }
 0x1ab   : > { %v2327_v23 = vadd.f32 %v2303_v7, %v2110_v13 }
 0x1ac   : > { %v1744_v59 = vpop.f32.mrf.mxu2 }
 0x1ad   : > { %2343 = vst.msk [vmem:[%s3776_s21 + $0x58] sm:$0xff] %vm467_vm2, %v2327_v23  ;;  %v1766_v20 = vadd.f32 %v1744_v59, %v1601_v24 }
 0x1ae   : > { %v2306_v52 = vpop.f32.mrf.mxu0 }
 0x1b0   : > { %v2089_v33 = vpop.f32.mrf.mxu3  ;;  %v1584_v55 = vpop.f32.mrf.mxu1 }
 0x1b1   : > { %v2111_v61 = vadd.f32 %v2089_v33, %v1766_v20  ;;  %v1603_v45 = vadd.f32 %v1584_v55, %v3767_v35 }
 0x1b3   : > { %v2328_v17 = vadd.f32 %v2306_v52, %v2111_v61 }
 0x1b4   : > { %v1746_v56 = vpop.f32.mrf.mxu2 }
 0x1b5   : > { %2344 = vst.msk [vmem:[%s3776_s21 + $0x60] sm:$0xff] %vm467_vm2, %v2328_v17  ;;  %v1767_v42 = vadd.f32 %v1746_v56, %v1602_v41 }
 0x1b6   : > { %v2308_v26 = vpop.f32.mrf.mxu0 }
 0x1b8   : > { %v2091_v58 = vpop.f32.mrf.mxu3  ;;  %v1586_v47 = vpop.f32.mrf.mxu1 }
 0x1b9   : > { %v2112_v27 = vadd.f32 %v2091_v58, %v1767_v42  ;;  %v1604_v8 = vadd.f32 %v1586_v47, %v3771_v49 }
 0x1bb   : > { %v2329_v4 = vadd.f32 %v2308_v26, %v2112_v27 }
 0x1bc   : > { %v1749_v36 = vpop.f32.mrf.mxu2 }
 0x1bd   : > { %2345 = vst.msk [vmem:[%s3776_s21 + $0x68] sm:$0xff] %vm467_vm2, %v2329_v4  ;;  %v1768_v19 = vadd.f32 %v1749_v36, %v1603_v45 }
 0x1be   : > { %v2311_v48 = vpop.f32.mrf.mxu0 }
 0x1c0   : > { %v2094_v29 = vpop.f32.mrf.mxu3 }
 0x1c1   : > { %v2113_v1 = vadd.f32 %v2094_v29, %v1768_v19 }
 0x1c3   : > { %v2330_v63 = vadd.f32 %v2311_v48, %v2113_v1 }
 0x1c4   : > { %v1751_v62 = vpop.f32.mrf.mxu2 }
 0x1c5   : > { %2346 = vst.msk [vmem:[%s3776_s21 + $0x70] sm:$0xff] %vm467_vm2, %v2330_v63  ;;  %v1769_v14 = vadd.f32 %v1751_v62, %v1604_v8 }
 0x1c6   : > { %v2313_v40 = vpop.f32.mrf.mxu0 }
 0x1c8   : > { %v2096_v34 = vpop.f32.mrf.mxu3 }
 0x1c9   : > { %v2114_v46 = vadd.f32 %v2096_v34, %v1769_v14 }
 0x1cb   : > { %v2331_v35 = vadd.f32 %v2313_v40, %v2114_v46 }
 0x1cd   : > { %2347 = vst.msk [vmem:[%s3776_s21 + $0x78] sm:$0xff] %vm467_vm2, %v2331_v35 }
 0x1ce PF: > { %s12_s13 = sadd.s32 1, %s2977_s13   ;;  %s3847_s9 = smov %s2969_s11 }
 0x1cf   : > { %p9_p7 = scmp.ge.s32.totalorder %s12_s13, 6   ;;  %s3848_s10 = smov %s2973_s12 }
 0x1d0   : > { %s3849_s11 = smov %s3852_s14  ;;  %s3850_s12 = smov %s3856_s15 }
 0x1d1   :  { %11 = sbr.rel (!%p9_p7) target bundleno = 3 (0x3), region = 64 }

</bundles_post_ra>
